<compile_context>
chip_gen: v5e
topology: v5e:2x2
jax: 0.10.0
libtpu: 0.0.40
codegen_flags: <defaults>
</compile_context>

<pallas_src>
import jax
import jax.numpy as jnp
from jax.experimental import pallas as pl
from jax.experimental.pallas import tpu as pltpu

_EPS = 1e-5

# Explicit VMEM budget (safe on v5e/v6e/v7x); batch/image grid is "parallel"
# so v7x's two TensorCores split the work.
_COMPILER_PARAMS = pltpu.CompilerParams(
    dimension_semantics=("parallel",),
    vmem_limit_bytes=32 * 1024 * 1024,
)


# ----------------------------------------------------------------------------
# In-kernel helpers
# ----------------------------------------------------------------------------
def _pad_into_scratch(pad_s, interior):
    """Write `interior` (B,H,W,C) into the middle of the (B,H+2,W+2,C) VMEM
    scratch and zero the 1-pixel border.  Zero padding for the 3x3 conv lives
    only in VMEM - no HBM pad round-trip.  The border is re-zeroed every grid
    step so the kernel is correct when the grid is split across TensorCores."""
    B, H, W, C = interior.shape
    Hp, Wp = H + 2, W + 2
    dt = pad_s.dtype
    pad_s[:, 0:1, :, :] = jnp.zeros((B, 1, Wp, C), dt)
    pad_s[:, Hp - 1:Hp, :, :] = jnp.zeros((B, 1, Wp, C), dt)
    pad_s[:, 1:H + 1, 0:1, :] = jnp.zeros((B, H, 1, C), dt)
    pad_s[:, 1:H + 1, Wp - 1:Wp, :] = jnp.zeros((B, H, 1, C), dt)
    pad_s[:, 1:H + 1, 1:W + 1, :] = interior.astype(dt)


def _conv3x3_packed(xp, w_ref, M, Cout):
    """K-packed 3x3 conv on the padded block: 3 MXU matmuls with K = 3*Cin
    (taps of one kernel row packed along the contraction dim)."""
    B, Hp, Wp, Cin = xp.shape
    H, W = Hp - 2, Wp - 2
    acc = jnp.zeros((M, Cout), jnp.float32)
    for dy in range(3):
        lhs = jnp.concatenate(
            [xp[:, dy:dy + H, dx:dx + W, :] for dx in range(3)], axis=-1
        ).reshape(M, 3 * Cin)
        acc = acc + jnp.dot(lhs, w_ref[dy], preferred_element_type=jnp.float32)
    return acc


def _accumulate_stats(acc, ssum_ref, ssq_ref):
    """Per-channel partial sum / sum-of-squares of the f32 accumulator,
    reduced in row chunks so the squared temporary stays small."""
    M, C = acc.shape
    rows = M // 8
    acc3 = acc.reshape(rows, 8, C)
    n_chunks = 4 if rows % 4 == 0 else 1
    step = rows // n_chunks
    ss = jnp.zeros((8, C), jnp.float32)
    sq = jnp.zeros((8, C), jnp.float32)
    for c in range(n_chunks):
        blk = acc3[c * step:(c + 1) * step]
        ss = ss + jnp.sum(blk, axis=0)
        sq = sq + jnp.sum(blk * blk, axis=0)
    ssum_ref[0] = ss
    ssq_ref[0] = sq


# ----------------------------------------------------------------------------
# Kernels
# ----------------------------------------------------------------------------
def _conv1_kernel(x_ref, w_ref, h_ref, ssum_ref, ssq_ref, pad_s):
    """conv1 (3x3, stride 1) on a B-image block + per-channel partial stats.

    x_ref : (B, H, W, Cin)      bf16   unpadded input block
    w_ref : (3, 3*Cin, Cout)    bf16   K-packed taps (row-major over dy)
    h_ref : (B, H, W, Cout)     bf16   raw (pre-BN) conv output
    ssum  : (1, 8, Cout)        f32    partial per-channel sums
    ssq   : (1, 8, Cout)        f32    partial per-channel sum of squares
    pad_s : (B, H+2, W+2, Cin)  bf16   VMEM scratch (zero-padded image)
    """
    B, H, W, Cout = h_ref.shape
    _pad_into_scratch(pad_s, x_ref[...])
    acc = _conv3x3_packed(pad_s[...], w_ref, B * H * W, Cout)
    h_ref[...] = acc.reshape(B, H, W, Cout).astype(h_ref.dtype)
    _accumulate_stats(acc, ssum_ref, ssq_ref)


def _bn_relu_conv2_kernel(h1_ref, s_ref, b_ref, w_ref,
                          h_ref, ssum_ref, ssq_ref, pad_s):
    """relu(bn1(h1)) fused with conv2 (3x3, stride 1) + partial stats.

    h1_ref : (B, H, W, C)  bf16  raw conv1 output
    s_ref  : (1, C) f32          folded BN scale = gamma * rsqrt(var+eps)
    b_ref  : (1, C) f32          folded BN bias  = beta - mean*scale
    """
    B, H, W, Cout = h_ref.shape
    C = h1_ref.shape[-1]
    s = s_ref[...].reshape(1, 1, 1, C)
    b = b_ref[...].reshape(1, 1, 1, C)
    # f32 math fused into the expression; result written straight into the
    # zero-padded VMEM scratch interior (no border masking needed).
    a = jnp.maximum(h1_ref[...].astype(jnp.float32) * s + b, 0.0)
    _pad_into_scratch(pad_s, a)
    acc = _conv3x3_packed(pad_s[...], w_ref, B * H * W, Cout)
    h_ref[...] = acc.reshape(B, H, W, Cout).astype(h_ref.dtype)
    _accumulate_stats(acc, ssum_ref, ssq_ref)


def _bn_add_relu_kernel(h_ref, res_ref, s_ref, b_ref, o_ref):
    """out = relu(bn2(h2) + identity); bf16 in / bf16 out, f32 math in regs."""
    C = h_ref.shape[-1]
    s = s_ref[...].reshape(1, 1, 1, C)
    b = b_ref[...].reshape(1, 1, 1, C)
    h = h_ref[...].astype(jnp.float32)
    r = res_ref[...].astype(jnp.float32)
    o_ref[...] = jnp.maximum(h * s + b + r, 0.0).astype(o_ref.dtype)


# ----------------------------------------------------------------------------
# pallas_call wrappers (grid over batch blocks of B images)
# ----------------------------------------------------------------------------
def _conv1_call(x, w, B):
    N, H, W, Cin = x.shape
    Cout = w.shape[-1]
    G = N // B
    return pl.pallas_call(
        _conv1_kernel,
        grid=(G,),
        in_specs=[
            pl.BlockSpec((B, H, W, Cin), lambda n: (n, 0, 0, 0)),
            pl.BlockSpec((3, 3 * Cin, Cout), lambda n: (0, 0, 0)),
        ],
        out_shape=(
            jax.ShapeDtypeStruct((N, H, W, Cout), jnp.bfloat16),
            jax.ShapeDtypeStruct((G, 8, Cout), jnp.float32),
            jax.ShapeDtypeStruct((G, 8, Cout), jnp.float32),
        ),
        out_specs=(
            pl.BlockSpec((B, H, W, Cout), lambda n: (n, 0, 0, 0)),
            pl.BlockSpec((1, 8, Cout), lambda n: (n, 0, 0)),
            pl.BlockSpec((1, 8, Cout), lambda n: (n, 0, 0)),
        ),
        scratch_shapes=[pltpu.VMEM((B, H + 2, W + 2, Cin), jnp.bfloat16)],
        compiler_params=_COMPILER_PARAMS,
    )(x, w)


def _bn_relu_conv2_call(h1, scale, bias, w, B):
    N, H, W, C = h1.shape
    Cout = w.shape[-1]
    G = N // B
    return pl.pallas_call(
        _bn_relu_conv2_kernel,
        grid=(G,),
        in_specs=[
            pl.BlockSpec((B, H, W, C), lambda n: (n, 0, 0, 0)),
            pl.BlockSpec((1, C), lambda n: (0, 0)),
            pl.BlockSpec((1, C), lambda n: (0, 0)),
            pl.BlockSpec((3, 3 * C, Cout), lambda n: (0, 0, 0)),
        ],
        out_shape=(
            jax.ShapeDtypeStruct((N, H, W, Cout), jnp.bfloat16),
            jax.ShapeDtypeStruct((G, 8, Cout), jnp.float32),
            jax.ShapeDtypeStruct((G, 8, Cout), jnp.float32),
        ),
        out_specs=(
            pl.BlockSpec((B, H, W, Cout), lambda n: (n, 0, 0, 0)),
            pl.BlockSpec((1, 8, Cout), lambda n: (n, 0, 0)),
            pl.BlockSpec((1, 8, Cout), lambda n: (n, 0, 0)),
        ),
        scratch_shapes=[pltpu.VMEM((B, H + 2, W + 2, C), jnp.bfloat16)],
        compiler_params=_COMPILER_PARAMS,
    )(h1, scale, bias, w)


def _bn_add_relu_call(h2, residual, scale, bias, B):
    N, H, W, C = h2.shape
    G = N // B
    return pl.pallas_call(
        _bn_add_relu_kernel,
        grid=(G,),
        in_specs=[
            pl.BlockSpec((B, H, W, C), lambda n: (n, 0, 0, 0)),
            pl.BlockSpec((B, H, W, C), lambda n: (n, 0, 0, 0)),
            pl.BlockSpec((1, C), lambda n: (0, 0)),
            pl.BlockSpec((1, C), lambda n: (0, 0)),
        ],
        out_shape=jax.ShapeDtypeStruct((N, H, W, C), jnp.bfloat16),
        out_specs=pl.BlockSpec((B, H, W, C), lambda n: (n, 0, 0, 0)),
        compiler_params=_COMPILER_PARAMS,
    )(h2, residual, scale, bias)


# ----------------------------------------------------------------------------
# BasicBlock forward
# ----------------------------------------------------------------------------
def _fold_bn(ssum, ssq, gamma, beta, count):
    """Batch-stat BN folded into per-channel scale/bias (single-pass stats)."""
    s = jnp.sum(ssum, axis=(0, 1))
    sq = jnp.sum(ssq, axis=(0, 1))
    mean = s / count
    var = jnp.maximum(sq / count - mean * mean, 0.0)
    scale = gamma / jnp.sqrt(var + _EPS)
    bias = beta - mean * scale
    return scale[None, :].astype(jnp.float32), bias[None, :].astype(jnp.float32)


def init_basicblock_params(key, inplanes, planes):
    k1, k2 = jax.random.split(key)
    # PyTorch conv weight layout (Cout, Cin, kH, kW); bias=False.
    w1 = 0.1 * jax.random.normal(k1, (planes, inplanes, 3, 3), jnp.float32)
    w2 = 0.1 * jax.random.normal(k2, (planes, planes, 3, 3), jnp.float32)
    g1 = 1.0 + 0.01 * jnp.arange(planes, dtype=jnp.float32)
    b1 = 0.02 * jnp.arange(planes, dtype=jnp.float32)
    g2 = 1.0 - 0.005 * jnp.arange(planes, dtype=jnp.float32)
    b2 = 0.02 * (jnp.arange(planes, dtype=jnp.float32) + 1.0)
    return dict(w1=w1, w2=w2, g1=g1, b1=b1, g2=g2, b2=b2)


def basic_block_forward(params, x_nchw, block_batch=2):
    """BasicBlock forward (stride=1, downsample=None, groups=1, dilation=1)."""
    N, Cin, H, W = x_nchw.shape
    planes = params["w1"].shape[0]
    B = block_batch
    assert Cin == planes, "identity skip needs inplanes == planes (stride=1)"
    assert N % B == 0 and (B * H * W) % 8 == 0
    # TODO(synk): stride>1 / downsample branch not implemented (module defaults).
    # TODO(synk): BN running_mean/running_var buffer updates not emitted.

    # Layout once per block, in bf16 (also serves as the bf16 residual).
    x_nhwc = jnp.transpose(x_nchw, (0, 2, 3, 1)).astype(jnp.bfloat16)

    # (Cout, Cin, kH, kW) -> (kH, kW*Cin, Cout): K-packed, K = 3*Cin per matmul.
    w1 = jnp.transpose(params["w1"], (2, 3, 1, 0)).reshape(
        3, 3 * Cin, planes).astype(jnp.bfloat16)
    w2 = jnp.transpose(params["w2"], (2, 3, 1, 0)).reshape(
        3, 3 * planes, planes).astype(jnp.bfloat16)

    count = float(N * H * W)

    # conv1 (raw) + per-channel batch stats in one pass.
    h1, ss1, sq1 = _conv1_call(x_nhwc, w1, B)
    scale1, bias1 = _fold_bn(ss1, sq1, params["g1"], params["b1"], count)

    # bn1 + relu1 fused into conv2 (raw) + its batch stats.
    h2, ss2, sq2 = _bn_relu_conv2_call(h1, scale1, bias1, w2, B)
    scale2, bias2 = _fold_bn(ss2, sq2, params["g2"], params["b2"], count)

    # bn2 + identity add + relu2 (bf16 in / bf16 out, f32 math in registers).
    out_nhwc = _bn_add_relu_call(h2, x_nhwc, scale2, bias2, B)
    return jnp.transpose(out_nhwc, (0, 3, 1, 2)).astype(jnp.float32)


if __name__ == "__main__":
    key = jax.random.PRNGKey(0)
    k_param, k_x = jax.random.split(key)

    # Small BasicBlock-consistent shapes; 128 channels keeps MXU/lanes dense,
    # 8 images with 2 per grid step keeps the grid long enough to pipeline.
    N, planes, H, W = 8, 128, 8, 8
    params = init_basicblock_params(k_param, planes, planes)
    x = jax.random.normal(k_x, (N, planes, H, W), jnp.float32)

    out = jax.jit(basic_block_forward)(params, x)
    out = jax.block_until_ready(out)
    assert out.shape == (N, planes, H, W)
    assert bool(jnp.all(out >= 0.0))  # final ReLU
    print("KERNEL_OK")
</pallas_src>

<mosaic_0001>
module attributes {stable_mosaic.version = 11 : i64} {
  func.func @_conv1_kernel(%arg0: i32, %arg1: memref<2x8x8x128xbf16, #tpu.memory_space<vmem>>, %arg2: memref<3x384x128xbf16, #tpu.memory_space<vmem>>, %arg3: memref<2x8x8x128xbf16, #tpu.memory_space<vmem>>, %arg4: memref<1x8x128xf32, #tpu.memory_space<vmem>>, %arg5: memref<1x8x128xf32, #tpu.memory_space<vmem>>, %arg6: memref<2x10x10x128xbf16, #tpu.memory_space<vmem>>) attributes {dimension_semantics = [#tpu.dimension_semantics<parallel>], iteration_bounds = array<i64: 4>, scalar_prefetch = 0 : i64, scratch_operands = 1 : i64, tpu.core_type = #tpu.core_type<tc>, window_params = [{transform_indices = @transform_0, window_bounds = array<i64: 2, 8, 8, 128>}, {pipeline_mode = #tpu.pipeline_mode<synchronous>, transform_indices = @transform_1, window_bounds = array<i64: 3, 384, 128>}, {transform_indices = @transform_2, window_bounds = array<i64: 2, 8, 8, 128>}, {transform_indices = @transform_3, window_bounds = array<i64: 1, 8, 128>}, {transform_indices = @transform_4, window_bounds = array<i64: 1, 8, 128>}]} {
    %c0 = arith.constant 0 : index
    %c0_0 = arith.constant 0 : index
    %c0_1 = arith.constant 0 : index
    %c0_2 = arith.constant 0 : index
    %0 = vector.load %arg1[%c0, %c0_0, %c0_1, %c0_2] : memref<2x8x8x128xbf16, #tpu.memory_space<vmem>>, vector<2x8x8x128xbf16>
    %cst = arith.constant 0.000000e+00 : bf16
    %1 = vector.broadcast %cst : bf16 to vector<2x1x10x128xbf16>
    %c0_3 = arith.constant 0 : index
    %c0_4 = arith.constant 0 : index
    %c0_5 = arith.constant 0 : index
    %c0_6 = arith.constant 0 : index
    %2 = vector.load %arg6[%c0_3, %c0_4, %c0_5, %c0_6] : memref<2x10x10x128xbf16, #tpu.memory_space<vmem>>, vector<2x1x10x128xbf16>
    tpu.vector_store %arg6[%c0_3, %c0_4, %c0_5, %c0_6], %1 {strides = array<i32>} : memref<2x10x10x128xbf16, #tpu.memory_space<vmem>>, vector<2x1x10x128xbf16>,
    %cst_7 = arith.constant 0.000000e+00 : bf16
    %3 = vector.broadcast %cst_7 : bf16 to vector<2x1x10x128xbf16>
    %c0_8 = arith.constant 0 : index
    %c9 = arith.constant 9 : index
    %c0_9 = arith.constant 0 : index
    %c0_10 = arith.constant 0 : index
    %4 = vector.load %arg6[%c0_8, %c9, %c0_9, %c0_10] : memref<2x10x10x128xbf16, #tpu.memory_space<vmem>>, vector<2x1x10x128xbf16>
    tpu.vector_store %arg6[%c0_8, %c9, %c0_9, %c0_10], %3 {strides = array<i32>} : memref<2x10x10x128xbf16, #tpu.memory_space<vmem>>, vector<2x1x10x128xbf16>,
    %cst_11 = arith.constant 0.000000e+00 : bf16
    %5 = vector.broadcast %cst_11 : bf16 to vector<2x8x1x128xbf16>
    %c0_12 = arith.constant 0 : index
    %c1 = arith.constant 1 : index
    %c0_13 = arith.constant 0 : index
    %c0_14 = arith.constant 0 : index
    %6 = vector.load %arg6[%c0_12, %c1, %c0_13, %c0_14] : memref<2x10x10x128xbf16, #tpu.memory_space<vmem>>, vector<2x8x1x128xbf16>
    tpu.vector_store %arg6[%c0_12, %c1, %c0_13, %c0_14], %5 {strides = array<i32>} : memref<2x10x10x128xbf16, #tpu.memory_space<vmem>>, vector<2x8x1x128xbf16>,
    %cst_15 = arith.constant 0.000000e+00 : bf16
    %7 = vector.broadcast %cst_15 : bf16 to vector<2x8x1x128xbf16>
    %c0_16 = arith.constant 0 : index
    %c1_17 = arith.constant 1 : index
    %c9_18 = arith.constant 9 : index
    %c0_19 = arith.constant 0 : index
    %8 = vector.load %arg6[%c0_16, %c1_17, %c9_18, %c0_19] : memref<2x10x10x128xbf16, #tpu.memory_space<vmem>>, vector<2x8x1x128xbf16>
    tpu.vector_store %arg6[%c0_16, %c1_17, %c9_18, %c0_19], %7 {strides = array<i32>} : memref<2x10x10x128xbf16, #tpu.memory_space<vmem>>, vector<2x8x1x128xbf16>,
    %c0_20 = arith.constant 0 : index
    %c1_21 = arith.constant 1 : index
    %c1_22 = arith.constant 1 : index
    %c0_23 = arith.constant 0 : index
    %9 = vector.load %arg6[%c0_20, %c1_21, %c1_22, %c0_23] : memref<2x10x10x128xbf16, #tpu.memory_space<vmem>>, vector<2x8x8x128xbf16>
    tpu.vector_store %arg6[%c0_20, %c1_21, %c1_22, %c0_23], %0 {strides = array<i32>} : memref<2x10x10x128xbf16, #tpu.memory_space<vmem>>, vector<2x8x8x128xbf16>,
    %c0_24 = arith.constant 0 : index
    %c0_25 = arith.constant 0 : index
    %c0_26 = arith.constant 0 : index
    %c0_27 = arith.constant 0 : index
    %10 = vector.load %arg6[%c0_24, %c0_25, %c0_26, %c0_27] : memref<2x10x10x128xbf16, #tpu.memory_space<vmem>>, vector<2x10x10x128xbf16>
    %cst_28 = arith.constant 0.000000e+00 : f32
    %11 = vector.broadcast %cst_28 : f32 to vector<128x128xf32>
    %12 = vector.extract_strided_slice %10 {offsets = [0, 0, 0, 0], sizes = [2, 8, 8, 128], strides = [1, 1, 1, 1]} : vector<2x10x10x128xbf16> to vector<2x8x8x128xbf16>
    %13 = vector.extract_strided_slice %10 {offsets = [0, 0, 1, 0], sizes = [2, 8, 8, 128], strides = [1, 1, 1, 1]} : vector<2x10x10x128xbf16> to vector<2x8x8x128xbf16>
    %14 = vector.extract_strided_slice %10 {offsets = [0, 0, 2, 0], sizes = [2, 8, 8, 128], strides = [1, 1, 1, 1]} : vector<2x10x10x128xbf16> to vector<2x8x8x128xbf16>
    %15 = tpu.concatenate %12, %13, %14 in 3 : vector<2x8x8x128xbf16>, vector<2x8x8x128xbf16>, vector<2x8x8x128xbf16> -> vector<2x8x8x384xbf16>
    %16 = vector.shape_cast %15 : vector<2x8x8x384xbf16> to vector<128x384xbf16>
    %c0_29 = arith.constant 0 : index
    %c0_30 = arith.constant 0 : index
    %c0_31 = arith.constant 0 : index
    %17 = vector.load %arg2[%c0_29, %c0_30, %c0_31] : memref<3x384x128xbf16, #tpu.memory_space<vmem>>, vector<1x384x128xbf16>
    %18 = vector.shape_cast %17 : vector<1x384x128xbf16> to vector<384x128xbf16>
    %cst_32 = arith.constant dense<0.000000e+00> : vector<128x128xf32>
    %19 = tpu.matmul %16, %18, %cst_32 {dimension_numbers = #tpu.dot_dimension_numbers<[1], [0], [0], [1], [0, 0, 1, 1], [], []>} : vector<128x384xbf16>, vector<384x128xbf16>, vector<128x128xf32> -> vector<128x128xf32>
    %20 = arith.addf %11, %19 : vector<128x128xf32>
    %21 = vector.extract_strided_slice %10 {offsets = [0, 1, 0, 0], sizes = [2, 8, 8, 128], strides = [1, 1, 1, 1]} : vector<2x10x10x128xbf16> to vector<2x8x8x128xbf16>
    %22 = vector.extract_strided_slice %10 {offsets = [0, 1, 1, 0], sizes = [2, 8, 8, 128], strides = [1, 1, 1, 1]} : vector<2x10x10x128xbf16> to vector<2x8x8x128xbf16>
    %23 = vector.extract_strided_slice %10 {offsets = [0, 1, 2, 0], sizes = [2, 8, 8, 128], strides = [1, 1, 1, 1]} : vector<2x10x10x128xbf16> to vector<2x8x8x128xbf16>
    %24 = tpu.concatenate %21, %22, %23 in 3 : vector<2x8x8x128xbf16>, vector<2x8x8x128xbf16>, vector<2x8x8x128xbf16> -> vector<2x8x8x384xbf16>
    %25 = vector.shape_cast %24 : vector<2x8x8x384xbf16> to vector<128x384xbf16>
    %c1_33 = arith.constant 1 : index
    %c0_34 = arith.constant 0 : index
    %c0_35 = arith.constant 0 : index
    %26 = vector.load %arg2[%c1_33, %c0_34, %c0_35] : memref<3x384x128xbf16, #tpu.memory_space<vmem>>, vector<1x384x128xbf16>
    %27 = vector.shape_cast %26 : vector<1x384x128xbf16> to vector<384x128xbf16>
    %cst_36 = arith.constant dense<0.000000e+00> : vector<128x128xf32>
    %28 = tpu.matmul %25, %27, %cst_36 {dimension_numbers = #tpu.dot_dimension_numbers<[1], [0], [0], [1], [0, 0, 1, 1], [], []>} : vector<128x384xbf16>, vector<384x128xbf16>, vector<128x128xf32> -> vector<128x128xf32>
    %29 = arith.addf %20, %28 : vector<128x128xf32>
    %30 = vector.extract_strided_slice %10 {offsets = [0, 2, 0, 0], sizes = [2, 8, 8, 128], strides = [1, 1, 1, 1]} : vector<2x10x10x128xbf16> to vector<2x8x8x128xbf16>
    %31 = vector.extract_strided_slice %10 {offsets = [0, 2, 1, 0], sizes = [2, 8, 8, 128], strides = [1, 1, 1, 1]} : vector<2x10x10x128xbf16> to vector<2x8x8x128xbf16>
    %32 = vector.extract_strided_slice %10 {offsets = [0, 2, 2, 0], sizes = [2, 8, 8, 128], strides = [1, 1, 1, 1]} : vector<2x10x10x128xbf16> to vector<2x8x8x128xbf16>
    %33 = tpu.concatenate %30, %31, %32 in 3 : vector<2x8x8x128xbf16>, vector<2x8x8x128xbf16>, vector<2x8x8x128xbf16> -> vector<2x8x8x384xbf16>
    %34 = vector.shape_cast %33 : vector<2x8x8x384xbf16> to vector<128x384xbf16>
    %c2 = arith.constant 2 : index
    %c0_37 = arith.constant 0 : index
    %c0_38 = arith.constant 0 : index
    %35 = vector.load %arg2[%c2, %c0_37, %c0_38] : memref<3x384x128xbf16, #tpu.memory_space<vmem>>, vector<1x384x128xbf16>
    %36 = vector.shape_cast %35 : vector<1x384x128xbf16> to vector<384x128xbf16>
    %cst_39 = arith.constant dense<0.000000e+00> : vector<128x128xf32>
    %37 = tpu.matmul %34, %36, %cst_39 {dimension_numbers = #tpu.dot_dimension_numbers<[1], [0], [0], [1], [0, 0, 1, 1], [], []>} : vector<128x384xbf16>, vector<384x128xbf16>, vector<128x128xf32> -> vector<128x128xf32>
    %38 = arith.addf %29, %37 : vector<128x128xf32>
    %39 = vector.shape_cast %38 : vector<128x128xf32> to vector<2x8x8x128xf32>
    %40 = arith.truncf %39 : vector<2x8x8x128xf32> to vector<2x8x8x128xbf16>
    %c0_40 = arith.constant 0 : index
    %c0_41 = arith.constant 0 : index
    %c0_42 = arith.constant 0 : index
    %c0_43 = arith.constant 0 : index
    %41 = vector.load %arg3[%c0_40, %c0_41, %c0_42, %c0_43] : memref<2x8x8x128xbf16, #tpu.memory_space<vmem>>, vector<2x8x8x128xbf16>
    tpu.vector_store %arg3[%c0_40, %c0_41, %c0_42, %c0_43], %40 {strides = array<i32>} : memref<2x8x8x128xbf16, #tpu.memory_space<vmem>>, vector<2x8x8x128xbf16>,
    %42 = vector.shape_cast %38 : vector<128x128xf32> to vector<16x8x128xf32>
    %cst_44 = arith.constant 0.000000e+00 : f32
    %43 = vector.broadcast %cst_44 : f32 to vector<8x128xf32>
    %cst_45 = arith.constant 0.000000e+00 : f32
    %44 = vector.broadcast %cst_45 : f32 to vector<8x128xf32>
    %45 = vector.extract_strided_slice %42 {offsets = [0, 0, 0], sizes = [4, 8, 128], strides = [1, 1, 1]} : vector<16x8x128xf32> to vector<4x8x128xf32>
    %cst_46 = arith.constant dense<0.000000e+00> : vector<8x128xf32>
    %46 = vector.multi_reduction <add>, %45, %cst_46 [0] : vector<4x8x128xf32> to vector<8x128xf32>
    %47 = arith.addf %43, %46 : vector<8x128xf32>
    %48 = arith.mulf %45, %45 : vector<4x8x128xf32>
    %cst_47 = arith.constant dense<0.000000e+00> : vector<8x128xf32>
    %49 = vector.multi_reduction <add>, %48, %cst_47 [0] : vector<4x8x128xf32> to vector<8x128xf32>
    %50 = arith.addf %44, %49 : vector<8x128xf32>
    %51 = vector.extract_strided_slice %42 {offsets = [4, 0, 0], sizes = [4, 8, 128], strides = [1, 1, 1]} : vector<16x8x128xf32> to vector<4x8x128xf32>
    %cst_48 = arith.constant dense<0.000000e+00> : vector<8x128xf32>
    %52 = vector.multi_reduction <add>, %51, %cst_48 [0] : vector<4x8x128xf32> to vector<8x128xf32>
    %53 = arith.addf %47, %52 : vector<8x128xf32>
    %54 = arith.mulf %51, %51 : vector<4x8x128xf32>
    %cst_49 = arith.constant dense<0.000000e+00> : vector<8x128xf32>
    %55 = vector.multi_reduction <add>, %54, %cst_49 [0] : vector<4x8x128xf32> to vector<8x128xf32>
    %56 = arith.addf %50, %55 : vector<8x128xf32>
    %57 = vector.extract_strided_slice %42 {offsets = [8, 0, 0], sizes = [4, 8, 128], strides = [1, 1, 1]} : vector<16x8x128xf32> to vector<4x8x128xf32>
    %cst_50 = arith.constant dense<0.000000e+00> : vector<8x128xf32>
    %58 = vector.multi_reduction <add>, %57, %cst_50 [0] : vector<4x8x128xf32> to vector<8x128xf32>
    %59 = arith.addf %53, %58 : vector<8x128xf32>
    %60 = arith.mulf %57, %57 : vector<4x8x128xf32>
    %cst_51 = arith.constant dense<0.000000e+00> : vector<8x128xf32>
    %61 = vector.multi_reduction <add>, %60, %cst_51 [0] : vector<4x8x128xf32> to vector<8x128xf32>
    %62 = arith.addf %56, %61 : vector<8x128xf32>
    %63 = vector.extract_strided_slice %42 {offsets = [12, 0, 0], sizes = [4, 8, 128], strides = [1, 1, 1]} : vector<16x8x128xf32> to vector<4x8x128xf32>
    %cst_52 = arith.constant dense<0.000000e+00> : vector<8x128xf32>
    %64 = vector.multi_reduction <add>, %63, %cst_52 [0] : vector<4x8x128xf32> to vector<8x128xf32>
    %65 = arith.addf %59, %64 : vector<8x128xf32>
    %66 = arith.mulf %63, %63 : vector<4x8x128xf32>
    %cst_53 = arith.constant dense<0.000000e+00> : vector<8x128xf32>
    %67 = vector.multi_reduction <add>, %66, %cst_53 [0] : vector<4x8x128xf32> to vector<8x128xf32>
    %68 = arith.addf %62, %67 : vector<8x128xf32>
    %c0_54 = arith.constant 0 : index
    %c0_55 = arith.constant 0 : index
    %c0_56 = arith.constant 0 : index
    %69 = vector.load %arg4[%c0_54, %c0_55, %c0_56] : memref<1x8x128xf32, #tpu.memory_space<vmem>>, vector<1x8x128xf32>
    %70 = vector.shape_cast %69 : vector<1x8x128xf32> to vector<8x128xf32>
    %71 = vector.shape_cast %65 : vector<8x128xf32> to vector<1x8x128xf32>
    tpu.vector_store %arg4[%c0_54, %c0_55, %c0_56], %71 {strides = array<i32>} : memref<1x8x128xf32, #tpu.memory_space<vmem>>, vector<1x8x128xf32>,
    %c0_57 = arith.constant 0 : index
    %c0_58 = arith.constant 0 : index
    %c0_59 = arith.constant 0 : index
    %72 = vector.load %arg5[%c0_57, %c0_58, %c0_59] : memref<1x8x128xf32, #tpu.memory_space<vmem>>, vector<1x8x128xf32>
    %73 = vector.shape_cast %72 : vector<1x8x128xf32> to vector<8x128xf32>
    %74 = vector.shape_cast %68 : vector<8x128xf32> to vector<1x8x128xf32>
    tpu.vector_store %arg5[%c0_57, %c0_58, %c0_59], %74 {strides = array<i32>} : memref<1x8x128xf32, #tpu.memory_space<vmem>>, vector<1x8x128xf32>,
    return
  }
  func.func @transform_0(%arg0: i32) -> (i32, i32, i32, i32) {
    %c0_i32 = arith.constant 0 : i32
    %c0_i32_0 = arith.constant 0 : i32
    %c0_i32_1 = arith.constant 0 : i32
    %c0_i32_2 = arith.constant 0 : i32
    return %arg0, %c0_i32, %c0_i32_0, %c0_i32_1 : i32, i32, i32, i32
  }
  func.func @transform_1(%arg0: i32) -> (i32, i32, i32) {
    %c0_i32 = arith.constant 0 : i32
    %c0_i32_0 = arith.constant 0 : i32
    %c0_i32_1 = arith.constant 0 : i32
    %c0_i32_2 = arith.constant 0 : i32
    return %c0_i32, %c0_i32_0, %c0_i32_1 : i32, i32, i32
  }
  func.func @transform_2(%arg0: i32) -> (i32, i32, i32, i32) {
    %c0_i32 = arith.constant 0 : i32
    %c0_i32_0 = arith.constant 0 : i32
    %c0_i32_1 = arith.constant 0 : i32
    %c0_i32_2 = arith.constant 0 : i32
    return %arg0, %c0_i32, %c0_i32_0, %c0_i32_1 : i32, i32, i32, i32
  }
  func.func @transform_3(%arg0: i32) -> (i32, i32, i32) {
    %c0_i32 = arith.constant 0 : i32
    %c0_i32_0 = arith.constant 0 : i32
    %c0_i32_1 = arith.constant 0 : i32
    return %arg0, %c0_i32, %c0_i32_0 : i32, i32, i32
  }
  func.func @transform_4(%arg0: i32) -> (i32, i32, i32) {
    %c0_i32 = arith.constant 0 : i32
    %c0_i32_0 = arith.constant 0 : i32
    %c0_i32_1 = arith.constant 0 : i32
    return %arg0, %c0_i32, %c0_i32_0 : i32, i32, i32
  }
}

module attributes {stable_mosaic.version = 11 : i64} {
  func.func @_bn_relu_conv2_kernel(%arg0: i32, %arg1: memref<2x8x8x128xbf16, #tpu.memory_space<vmem>>, %arg2: memref<1x128xf32, #tpu.memory_space<vmem>>, %arg3: memref<1x128xf32, #tpu.memory_space<vmem>>, %arg4: memref<3x384x128xbf16, #tpu.memory_space<vmem>>, %arg5: memref<2x8x8x128xbf16, #tpu.memory_space<vmem>>, %arg6: memref<1x8x128xf32, #tpu.memory_space<vmem>>, %arg7: memref<1x8x128xf32, #tpu.memory_space<vmem>>, %arg8: memref<2x10x10x128xbf16, #tpu.memory_space<vmem>>) attributes {dimension_semantics = [#tpu.dimension_semantics<parallel>], iteration_bounds = array<i64: 4>, scalar_prefetch = 0 : i64, scratch_operands = 1 : i64, tpu.core_type = #tpu.core_type<tc>, window_params = [{transform_indices = @transform_0, window_bounds = array<i64: 2, 8, 8, 128>}, {pipeline_mode = #tpu.pipeline_mode<synchronous>, transform_indices = @transform_1, window_bounds = array<i64: 1, 128>}, {pipeline_mode = #tpu.pipeline_mode<synchronous>, transform_indices = @transform_2, window_bounds = array<i64: 1, 128>}, {pipeline_mode = #tpu.pipeline_mode<synchronous>, transform_indices = @transform_3, window_bounds = array<i64: 3, 384, 128>}, {transform_indices = @transform_4, window_bounds = array<i64: 2, 8, 8, 128>}, {transform_indices = @transform_5, window_bounds = array<i64: 1, 8, 128>}, {transform_indices = @transform_6, window_bounds = array<i64: 1, 8, 128>}]} {
    %c0 = arith.constant 0 : index
    %c0_0 = arith.constant 0 : index
    %0 = vector.load %arg2[%c0, %c0_0] : memref<1x128xf32, #tpu.memory_space<vmem>>, vector<1x128xf32>
    %1 = vector.shape_cast %0 : vector<1x128xf32> to vector<1x1x1x128xf32>
    %c0_1 = arith.constant 0 : index
    %c0_2 = arith.constant 0 : index
    %2 = vector.load %arg3[%c0_1, %c0_2] : memref<1x128xf32, #tpu.memory_space<vmem>>, vector<1x128xf32>
    %3 = vector.shape_cast %2 : vector<1x128xf32> to vector<1x1x1x128xf32>
    %c0_3 = arith.constant 0 : index
    %c0_4 = arith.constant 0 : index
    %c0_5 = arith.constant 0 : index
    %c0_6 = arith.constant 0 : index
    %4 = vector.load %arg1[%c0_3, %c0_4, %c0_5, %c0_6] : memref<2x8x8x128xbf16, #tpu.memory_space<vmem>>, vector<2x8x8x128xbf16>
    %5 = arith.extf %4 : vector<2x8x8x128xbf16> to vector<2x8x8x128xf32>
    %6 = vector.broadcast %1 : vector<1x1x1x128xf32> to vector<2x8x8x128xf32>
    %7 = arith.mulf %5, %6 : vector<2x8x8x128xf32>
    %8 = vector.broadcast %3 : vector<1x1x1x128xf32> to vector<2x8x8x128xf32>
    %9 = arith.addf %7, %8 : vector<2x8x8x128xf32>
    %cst = arith.constant 0.000000e+00 : f32
    %10 = vector.broadcast %cst : f32 to vector<2x8x8x128xf32>
    %11 = arith.maximumf %9, %10 : vector<2x8x8x128xf32>
    %cst_7 = arith.constant 0.000000e+00 : bf16
    %12 = vector.broadcast %cst_7 : bf16 to vector<2x1x10x128xbf16>
    %c0_8 = arith.constant 0 : index
    %c0_9 = arith.constant 0 : index
    %c0_10 = arith.constant 0 : index
    %c0_11 = arith.constant 0 : index
    %13 = vector.load %arg8[%c0_8, %c0_9, %c0_10, %c0_11] : memref<2x10x10x128xbf16, #tpu.memory_space<vmem>>, vector<2x1x10x128xbf16>
    tpu.vector_store %arg8[%c0_8, %c0_9, %c0_10, %c0_11], %12 {strides = array<i32>} : memref<2x10x10x128xbf16, #tpu.memory_space<vmem>>, vector<2x1x10x128xbf16>,
    %cst_12 = arith.constant 0.000000e+00 : bf16
    %14 = vector.broadcast %cst_12 : bf16 to vector<2x1x10x128xbf16>
    %c0_13 = arith.constant 0 : index
    %c9 = arith.constant 9 : index
    %c0_14 = arith.constant 0 : index
    %c0_15 = arith.constant 0 : index
    %15 = vector.load %arg8[%c0_13, %c9, %c0_14, %c0_15] : memref<2x10x10x128xbf16, #tpu.memory_space<vmem>>, vector<2x1x10x128xbf16>
    tpu.vector_store %arg8[%c0_13, %c9, %c0_14, %c0_15], %14 {strides = array<i32>} : memref<2x10x10x128xbf16, #tpu.memory_space<vmem>>, vector<2x1x10x128xbf16>,
    %cst_16 = arith.constant 0.000000e+00 : bf16
    %16 = vector.broadcast %cst_16 : bf16 to vector<2x8x1x128xbf16>
    %c0_17 = arith.constant 0 : index
    %c1 = arith.constant 1 : index
    %c0_18 = arith.constant 0 : index
    %c0_19 = arith.constant 0 : index
    %17 = vector.load %arg8[%c0_17, %c1, %c0_18, %c0_19] : memref<2x10x10x128xbf16, #tpu.memory_space<vmem>>, vector<2x8x1x128xbf16>
    tpu.vector_store %arg8[%c0_17, %c1, %c0_18, %c0_19], %16 {strides = array<i32>} : memref<2x10x10x128xbf16, #tpu.memory_space<vmem>>, vector<2x8x1x128xbf16>,
    %cst_20 = arith.constant 0.000000e+00 : bf16
    %18 = vector.broadcast %cst_20 : bf16 to vector<2x8x1x128xbf16>
    %c0_21 = arith.constant 0 : index
    %c1_22 = arith.constant 1 : index
    %c9_23 = arith.constant 9 : index
    %c0_24 = arith.constant 0 : index
    %19 = vector.load %arg8[%c0_21, %c1_22, %c9_23, %c0_24] : memref<2x10x10x128xbf16, #tpu.memory_space<vmem>>, vector<2x8x1x128xbf16>
    tpu.vector_store %arg8[%c0_21, %c1_22, %c9_23, %c0_24], %18 {strides = array<i32>} : memref<2x10x10x128xbf16, #tpu.memory_space<vmem>>, vector<2x8x1x128xbf16>,
    %20 = arith.truncf %11 : vector<2x8x8x128xf32> to vector<2x8x8x128xbf16>
    %c0_25 = arith.constant 0 : index
    %c1_26 = arith.constant 1 : index
    %c1_27 = arith.constant 1 : index
    %c0_28 = arith.constant 0 : index
    %21 = vector.load %arg8[%c0_25, %c1_26, %c1_27, %c0_28] : memref<2x10x10x128xbf16, #tpu.memory_space<vmem>>, vector<2x8x8x128xbf16>
    tpu.vector_store %arg8[%c0_25, %c1_26, %c1_27, %c0_28], %20 {strides = array<i32>} : memref<2x10x10x128xbf16, #tpu.memory_space<vmem>>, vector<2x8x8x128xbf16>,
    %c0_29 = arith.constant 0 : index
    %c0_30 = arith.constant 0 : index
    %c0_31 = arith.constant 0 : index
    %c0_32 = arith.constant 0 : index
    %22 = vector.load %arg8[%c0_29, %c0_30, %c0_31, %c0_32] : memref<2x10x10x128xbf16, #tpu.memory_space<vmem>>, vector<2x10x10x128xbf16>
    %cst_33 = arith.constant 0.000000e+00 : f32
    %23 = vector.broadcast %cst_33 : f32 to vector<128x128xf32>
    %24 = vector.extract_strided_slice %22 {offsets = [0, 0, 0, 0], sizes = [2, 8, 8, 128], strides = [1, 1, 1, 1]} : vector<2x10x10x128xbf16> to vector<2x8x8x128xbf16>
    %25 = vector.extract_strided_slice %22 {offsets = [0, 0, 1, 0], sizes = [2, 8, 8, 128], strides = [1, 1, 1, 1]} : vector<2x10x10x128xbf16> to vector<2x8x8x128xbf16>
    %26 = vector.extract_strided_slice %22 {offsets = [0, 0, 2, 0], sizes = [2, 8, 8, 128], strides = [1, 1, 1, 1]} : vector<2x10x10x128xbf16> to vector<2x8x8x128xbf16>
    %27 = tpu.concatenate %24, %25, %26 in 3 : vector<2x8x8x128xbf16>, vector<2x8x8x128xbf16>, vector<2x8x8x128xbf16> -> vector<2x8x8x384xbf16>
    %28 = vector.shape_cast %27 : vector<2x8x8x384xbf16> to vector<128x384xbf16>
    %c0_34 = arith.constant 0 : index
    %c0_35 = arith.constant 0 : index
    %c0_36 = arith.constant 0 : index
    %29 = vector.load %arg4[%c0_34, %c0_35, %c0_36] : memref<3x384x128xbf16, #tpu.memory_space<vmem>>, vector<1x384x128xbf16>
    %30 = vector.shape_cast %29 : vector<1x384x128xbf16> to vector<384x128xbf16>
    %cst_37 = arith.constant dense<0.000000e+00> : vector<128x128xf32>
    %31 = tpu.matmul %28, %30, %cst_37 {dimension_numbers = #tpu.dot_dimension_numbers<[1], [0], [0], [1], [0, 0, 1, 1], [], []>} : vector<128x384xbf16>, vector<384x128xbf16>, vector<128x128xf32> -> vector<128x128xf32>
    %32 = arith.addf %23, %31 : vector<128x128xf32>
    %33 = vector.extract_strided_slice %22 {offsets = [0, 1, 0, 0], sizes = [2, 8, 8, 128], strides = [1, 1, 1, 1]} : vector<2x10x10x128xbf16> to vector<2x8x8x128xbf16>
    %34 = vector.extract_strided_slice %22 {offsets = [0, 1, 1, 0], sizes = [2, 8, 8, 128], strides = [1, 1, 1, 1]} : vector<2x10x10x128xbf16> to vector<2x8x8x128xbf16>
    %35 = vector.extract_strided_slice %22 {offsets = [0, 1, 2, 0], sizes = [2, 8, 8, 128], strides = [1, 1, 1, 1]} : vector<2x10x10x128xbf16> to vector<2x8x8x128xbf16>
    %36 = tpu.concatenate %33, %34, %35 in 3 : vector<2x8x8x128xbf16>, vector<2x8x8x128xbf16>, vector<2x8x8x128xbf16> -> vector<2x8x8x384xbf16>
    %37 = vector.shape_cast %36 : vector<2x8x8x384xbf16> to vector<128x384xbf16>
    %c1_38 = arith.constant 1 : index
    %c0_39 = arith.constant 0 : index
    %c0_40 = arith.constant 0 : index
    %38 = vector.load %arg4[%c1_38, %c0_39, %c0_40] : memref<3x384x128xbf16, #tpu.memory_space<vmem>>, vector<1x384x128xbf16>
    %39 = vector.shape_cast %38 : vector<1x384x128xbf16> to vector<384x128xbf16>
    %cst_41 = arith.constant dense<0.000000e+00> : vector<128x128xf32>
    %40 = tpu.matmul %37, %39, %cst_41 {dimension_numbers = #tpu.dot_dimension_numbers<[1], [0], [0], [1], [0, 0, 1, 1], [], []>} : vector<128x384xbf16>, vector<384x128xbf16>, vector<128x128xf32> -> vector<128x128xf32>
    %41 = arith.addf %32, %40 : vector<128x128xf32>
    %42 = vector.extract_strided_slice %22 {offsets = [0, 2, 0, 0], sizes = [2, 8, 8, 128], strides = [1, 1, 1, 1]} : vector<2x10x10x128xbf16> to vector<2x8x8x128xbf16>
    %43 = vector.extract_strided_slice %22 {offsets = [0, 2, 1, 0], sizes = [2, 8, 8, 128], strides = [1, 1, 1, 1]} : vector<2x10x10x128xbf16> to vector<2x8x8x128xbf16>
    %44 = vector.extract_strided_slice %22 {offsets = [0, 2, 2, 0], sizes = [2, 8, 8, 128], strides = [1, 1, 1, 1]} : vector<2x10x10x128xbf16> to vector<2x8x8x128xbf16>
    %45 = tpu.concatenate %42, %43, %44 in 3 : vector<2x8x8x128xbf16>, vector<2x8x8x128xbf16>, vector<2x8x8x128xbf16> -> vector<2x8x8x384xbf16>
    %46 = vector.shape_cast %45 : vector<2x8x8x384xbf16> to vector<128x384xbf16>
    %c2 = arith.constant 2 : index
    %c0_42 = arith.constant 0 : index
    %c0_43 = arith.constant 0 : index
    %47 = vector.load %arg4[%c2, %c0_42, %c0_43] : memref<3x384x128xbf16, #tpu.memory_space<vmem>>, vector<1x384x128xbf16>
    %48 = vector.shape_cast %47 : vector<1x384x128xbf16> to vector<384x128xbf16>
    %cst_44 = arith.constant dense<0.000000e+00> : vector<128x128xf32>
    %49 = tpu.matmul %46, %48, %cst_44 {dimension_numbers = #tpu.dot_dimension_numbers<[1], [0], [0], [1], [0, 0, 1, 1], [], []>} : vector<128x384xbf16>, vector<384x128xbf16>, vector<128x128xf32> -> vector<128x128xf32>
    %50 = arith.addf %41, %49 : vector<128x128xf32>
    %51 = vector.shape_cast %50 : vector<128x128xf32> to vector<2x8x8x128xf32>
    %52 = arith.truncf %51 : vector<2x8x8x128xf32> to vector<2x8x8x128xbf16>
    %c0_45 = arith.constant 0 : index
    %c0_46 = arith.constant 0 : index
    %c0_47 = arith.constant 0 : index
    %c0_48 = arith.constant 0 : index
    %53 = vector.load %arg5[%c0_45, %c0_46, %c0_47, %c0_48] : memref<2x8x8x128xbf16, #tpu.memory_space<vmem>>, vector<2x8x8x128xbf16>
    tpu.vector_store %arg5[%c0_45, %c0_46, %c0_47, %c0_48], %52 {strides = array<i32>} : memref<2x8x8x128xbf16, #tpu.memory_space<vmem>>, vector<2x8x8x128xbf16>,
    %54 = vector.shape_cast %50 : vector<128x128xf32> to vector<16x8x128xf32>
    %cst_49 = arith.constant 0.000000e+00 : f32
    %55 = vector.broadcast %cst_49 : f32 to vector<8x128xf32>
    %cst_50 = arith.constant 0.000000e+00 : f32
    %56 = vector.broadcast %cst_50 : f32 to vector<8x128xf32>
    %57 = vector.extract_strided_slice %54 {offsets = [0, 0, 0], sizes = [4, 8, 128], strides = [1, 1, 1]} : vector<16x8x128xf32> to vector<4x8x128xf32>
    %cst_51 = arith.constant dense<0.000000e+00> : vector<8x128xf32>
    %58 = vector.multi_reduction <add>, %57, %cst_51 [0] : vector<4x8x128xf32> to vector<8x128xf32>
    %59 = arith.addf %55, %58 : vector<8x128xf32>
    %60 = arith.mulf %57, %57 : vector<4x8x128xf32>
    %cst_52 = arith.constant dense<0.000000e+00> : vector<8x128xf32>
    %61 = vector.multi_reduction <add>, %60, %cst_52 [0] : vector<4x8x128xf32> to vector<8x128xf32>
    %62 = arith.addf %56, %61 : vector<8x128xf32>
    %63 = vector.extract_strided_slice %54 {offsets = [4, 0, 0], sizes = [4, 8, 128], strides = [1, 1, 1]} : vector<16x8x128xf32> to vector<4x8x128xf32>
    %cst_53 = arith.constant dense<0.000000e+00> : vector<8x128xf32>
    %64 = vector.multi_reduction <add>, %63, %cst_53 [0] : vector<4x8x128xf32> to vector<8x128xf32>
    %65 = arith.addf %59, %64 : vector<8x128xf32>
    %66 = arith.mulf %63, %63 : vector<4x8x128xf32>
    %cst_54 = arith.constant dense<0.000000e+00> : vector<8x128xf32>
    %67 = vector.multi_reduction <add>, %66, %cst_54 [0] : vector<4x8x128xf32> to vector<8x128xf32>
    %68 = arith.addf %62, %67 : vector<8x128xf32>
    %69 = vector.extract_strided_slice %54 {offsets = [8, 0, 0], sizes = [4, 8, 128], strides = [1, 1, 1]} : vector<16x8x128xf32> to vector<4x8x128xf32>
    %cst_55 = arith.constant dense<0.000000e+00> : vector<8x128xf32>
    %70 = vector.multi_reduction <add>, %69, %cst_55 [0] : vector<4x8x128xf32> to vector<8x128xf32>
    %71 = arith.addf %65, %70 : vector<8x128xf32>
    %72 = arith.mulf %69, %69 : vector<4x8x128xf32>
    %cst_56 = arith.constant dense<0.000000e+00> : vector<8x128xf32>
    %73 = vector.multi_reduction <add>, %72, %cst_56 [0] : vector<4x8x128xf32> to vector<8x128xf32>
    %74 = arith.addf %68, %73 : vector<8x128xf32>
    %75 = vector.extract_strided_slice %54 {offsets = [12, 0, 0], sizes = [4, 8, 128], strides = [1, 1, 1]} : vector<16x8x128xf32> to vector<4x8x128xf32>
    %cst_57 = arith.constant dense<0.000000e+00> : vector<8x128xf32>
    %76 = vector.multi_reduction <add>, %75, %cst_57 [0] : vector<4x8x128xf32> to vector<8x128xf32>
    %77 = arith.addf %71, %76 : vector<8x128xf32>
    %78 = arith.mulf %75, %75 : vector<4x8x128xf32>
    %cst_58 = arith.constant dense<0.000000e+00> : vector<8x128xf32>
    %79 = vector.multi_reduction <add>, %78, %cst_58 [0] : vector<4x8x128xf32> to vector<8x128xf32>
    %80 = arith.addf %74, %79 : vector<8x128xf32>
    %c0_59 = arith.constant 0 : index
    %c0_60 = arith.constant 0 : index
    %c0_61 = arith.constant 0 : index
    %81 = vector.load %arg6[%c0_59, %c0_60, %c0_61] : memref<1x8x128xf32, #tpu.memory_space<vmem>>, vector<1x8x128xf32>
    %82 = vector.shape_cast %81 : vector<1x8x128xf32> to vector<8x128xf32>
    %83 = vector.shape_cast %77 : vector<8x128xf32> to vector<1x8x128xf32>
    tpu.vector_store %arg6[%c0_59, %c0_60, %c0_61], %83 {strides = array<i32>} : memref<1x8x128xf32, #tpu.memory_space<vmem>>, vector<1x8x128xf32>,
    %c0_62 = arith.constant 0 : index
    %c0_63 = arith.constant 0 : index
    %c0_64 = arith.constant 0 : index
    %84 = vector.load %arg7[%c0_62, %c0_63, %c0_64] : memref<1x8x128xf32, #tpu.memory_space<vmem>>, vector<1x8x128xf32>
    %85 = vector.shape_cast %84 : vector<1x8x128xf32> to vector<8x128xf32>
    %86 = vector.shape_cast %80 : vector<8x128xf32> to vector<1x8x128xf32>
    tpu.vector_store %arg7[%c0_62, %c0_63, %c0_64], %86 {strides = array<i32>} : memref<1x8x128xf32, #tpu.memory_space<vmem>>, vector<1x8x128xf32>,
    return
  }
  func.func @transform_0(%arg0: i32) -> (i32, i32, i32, i32) {
    %c0_i32 = arith.constant 0 : i32
    %c0_i32_0 = arith.constant 0 : i32
    %c0_i32_1 = arith.constant 0 : i32
    %c0_i32_2 = arith.constant 0 : i32
    return %arg0, %c0_i32, %c0_i32_0, %c0_i32_1 : i32, i32, i32, i32
  }
  func.func @transform_1(%arg0: i32) -> (i32, i32) {
    %c0_i32 = arith.constant 0 : i32
    %c0_i32_0 = arith.constant 0 : i32
    %c0_i32_1 = arith.constant 0 : i32
    return %c0_i32, %c0_i32_0 : i32, i32
  }
  func.func @transform_2(%arg0: i32) -> (i32, i32) {
    %c0_i32 = arith.constant 0 : i32
    %c0_i32_0 = arith.constant 0 : i32
    %c0_i32_1 = arith.constant 0 : i32
    return %c0_i32, %c0_i32_0 : i32, i32
  }
  func.func @transform_3(%arg0: i32) -> (i32, i32, i32) {
    %c0_i32 = arith.constant 0 : i32
    %c0_i32_0 = arith.constant 0 : i32
    %c0_i32_1 = arith.constant 0 : i32
    %c0_i32_2 = arith.constant 0 : i32
    return %c0_i32, %c0_i32_0, %c0_i32_1 : i32, i32, i32
  }
  func.func @transform_4(%arg0: i32) -> (i32, i32, i32, i32) {
    %c0_i32 = arith.constant 0 : i32
    %c0_i32_0 = arith.constant 0 : i32
    %c0_i32_1 = arith.constant 0 : i32
    %c0_i32_2 = arith.constant 0 : i32
    return %arg0, %c0_i32, %c0_i32_0, %c0_i32_1 : i32, i32, i32, i32
  }
  func.func @transform_5(%arg0: i32) -> (i32, i32, i32) {
    %c0_i32 = arith.constant 0 : i32
    %c0_i32_0 = arith.constant 0 : i32
    %c0_i32_1 = arith.constant 0 : i32
    return %arg0, %c0_i32, %c0_i32_0 : i32, i32, i32
  }
  func.func @transform_6(%arg0: i32) -> (i32, i32, i32) {
    %c0_i32 = arith.constant 0 : i32
    %c0_i32_0 = arith.constant 0 : i32
    %c0_i32_1 = arith.constant 0 : i32
    return %arg0, %c0_i32, %c0_i32_0 : i32, i32, i32
  }
}

module attributes {stable_mosaic.version = 11 : i64} {
  func.func @_bn_add_relu_kernel(%arg0: i32, %arg1: memref<2x8x8x128xbf16, #tpu.memory_space<vmem>>, %arg2: memref<2x8x8x128xbf16, #tpu.memory_space<vmem>>, %arg3: memref<1x128xf32, #tpu.memory_space<vmem>>, %arg4: memref<1x128xf32, #tpu.memory_space<vmem>>, %arg5: memref<2x8x8x128xbf16, #tpu.memory_space<vmem>>) attributes {dimension_semantics = [#tpu.dimension_semantics<parallel>], iteration_bounds = array<i64: 4>, scalar_prefetch = 0 : i64, scratch_operands = 0 : i64, tpu.core_type = #tpu.core_type<tc>, window_params = [{transform_indices = @transform_0, window_bounds = array<i64: 2, 8, 8, 128>}, {transform_indices = @transform_1, window_bounds = array<i64: 2, 8, 8, 128>}, {pipeline_mode = #tpu.pipeline_mode<synchronous>, transform_indices = @transform_2, window_bounds = array<i64: 1, 128>}, {pipeline_mode = #tpu.pipeline_mode<synchronous>, transform_indices = @transform_3, window_bounds = array<i64: 1, 128>}, {transform_indices = @transform_4, window_bounds = array<i64: 2, 8, 8, 128>}]} {
    %c0 = arith.constant 0 : index
    %c0_0 = arith.constant 0 : index
    %0 = vector.load %arg3[%c0, %c0_0] : memref<1x128xf32, #tpu.memory_space<vmem>>, vector<1x128xf32>
    %1 = vector.shape_cast %0 : vector<1x128xf32> to vector<1x1x1x128xf32>
    %c0_1 = arith.constant 0 : index
    %c0_2 = arith.constant 0 : index
    %2 = vector.load %arg4[%c0_1, %c0_2] : memref<1x128xf32, #tpu.memory_space<vmem>>, vector<1x128xf32>
    %3 = vector.shape_cast %2 : vector<1x128xf32> to vector<1x1x1x128xf32>
    %c0_3 = arith.constant 0 : index
    %c0_4 = arith.constant 0 : index
    %c0_5 = arith.constant 0 : index
    %c0_6 = arith.constant 0 : index
    %4 = vector.load %arg1[%c0_3, %c0_4, %c0_5, %c0_6] : memref<2x8x8x128xbf16, #tpu.memory_space<vmem>>, vector<2x8x8x128xbf16>
    %5 = arith.extf %4 : vector<2x8x8x128xbf16> to vector<2x8x8x128xf32>
    %c0_7 = arith.constant 0 : index
    %c0_8 = arith.constant 0 : index
    %c0_9 = arith.constant 0 : index
    %c0_10 = arith.constant 0 : index
    %6 = vector.load %arg2[%c0_7, %c0_8, %c0_9, %c0_10] : memref<2x8x8x128xbf16, #tpu.memory_space<vmem>>, vector<2x8x8x128xbf16>
    %7 = arith.extf %6 : vector<2x8x8x128xbf16> to vector<2x8x8x128xf32>
    %8 = vector.broadcast %1 : vector<1x1x1x128xf32> to vector<2x8x8x128xf32>
    %9 = arith.mulf %5, %8 : vector<2x8x8x128xf32>
    %10 = vector.broadcast %3 : vector<1x1x1x128xf32> to vector<2x8x8x128xf32>
    %11 = arith.addf %9, %10 : vector<2x8x8x128xf32>
    %12 = arith.addf %11, %7 : vector<2x8x8x128xf32>
    %cst = arith.constant 0.000000e+00 : f32
    %13 = vector.broadcast %cst : f32 to vector<2x8x8x128xf32>
    %14 = arith.maximumf %12, %13 : vector<2x8x8x128xf32>
    %15 = arith.truncf %14 : vector<2x8x8x128xf32> to vector<2x8x8x128xbf16>
    %c0_11 = arith.constant 0 : index
    %c0_12 = arith.constant 0 : index
    %c0_13 = arith.constant 0 : index
    %c0_14 = arith.constant 0 : index
    %16 = vector.load %arg5[%c0_11, %c0_12, %c0_13, %c0_14] : memref<2x8x8x128xbf16, #tpu.memory_space<vmem>>, vector<2x8x8x128xbf16>
    tpu.vector_store %arg5[%c0_11, %c0_12, %c0_13, %c0_14], %15 {strides = array<i32>} : memref<2x8x8x128xbf16, #tpu.memory_space<vmem>>, vector<2x8x8x128xbf16>,
    return
  }
  func.func @transform_0(%arg0: i32) -> (i32, i32, i32, i32) {
    %c0_i32 = arith.constant 0 : i32
    %c0_i32_0 = arith.constant 0 : i32
    %c0_i32_1 = arith.constant 0 : i32
    %c0_i32_2 = arith.constant 0 : i32
    return %arg0, %c0_i32, %c0_i32_0, %c0_i32_1 : i32, i32, i32, i32
  }
  func.func @transform_1(%arg0: i32) -> (i32, i32, i32, i32) {
    %c0_i32 = arith.constant 0 : i32
    %c0_i32_0 = arith.constant 0 : i32
    %c0_i32_1 = arith.constant 0 : i32
    %c0_i32_2 = arith.constant 0 : i32
    return %arg0, %c0_i32, %c0_i32_0, %c0_i32_1 : i32, i32, i32, i32
  }
  func.func @transform_2(%arg0: i32) -> (i32, i32) {
    %c0_i32 = arith.constant 0 : i32
    %c0_i32_0 = arith.constant 0 : i32
    %c0_i32_1 = arith.constant 0 : i32
    return %c0_i32, %c0_i32_0 : i32, i32
  }
  func.func @transform_3(%arg0: i32) -> (i32, i32) {
    %c0_i32 = arith.constant 0 : i32
    %c0_i32_0 = arith.constant 0 : i32
    %c0_i32_1 = arith.constant 0 : i32
    return %c0_i32, %c0_i32_0 : i32, i32
  }
  func.func @transform_4(%arg0: i32) -> (i32, i32, i32, i32) {
    %c0_i32 = arith.constant 0 : i32
    %c0_i32_0 = arith.constant 0 : i32
    %c0_i32_1 = arith.constant 0 : i32
    %c0_i32_2 = arith.constant 0 : i32
    return %arg0, %c0_i32, %c0_i32_0, %c0_i32_1 : i32, i32, i32, i32
  }
}

</mosaic_0001>

<bundles_post_ra>
// kernel: basic_block_forward.5
= control target key start
LH: loop header
LB: loop body
LE: loop exit
PB: predicated region body
PF: predicated region fallthrough
CT: control target
= control target key end

     0   :  { %s656_s15 = smov 0   ;;  %s753_s0 = inlined_call_operand.vmem [shape: bf16[8,8,8,128], index: 0, kind: input, shape index: {}]   ;;  %s754_s1 = inlined_call_operand.vmem [shape: bf16[8,8,8,128], index: 1, kind: input, shape index: {}]   ;;  %s755_s2 = inlined_call_operand.vmem [shape: f32[1,128], index: 2, kind: input, shape index: {}]   ;;  %s756_s3 = inlined_call_operand.vmem [shape: f32[1,128], index: 3, kind: input, shape index: {}]   ;;  %s757_s4 = inlined_call_operand.vmem [shape: bf16[8,8,8,128], index: 4, kind: output, shape index: {}]  }
   0x1 LB: > { %s469_s16 = sadd.s32 4294967295, %s629_s15   ;;  %p473_p0 = scmp.ge.s32.totalorder %s629_s15, 1  ;;  %s629_s15 = sphi %s656_s15, %s14_s15  }
   0x2   : > { %p176_p1 = scmp.lt.s32.totalorder %s629_s15, 5 }
   0x4   : > { %p177_p2 = pnand %p473_p0, %p176_p1 }
   0x5   : > { %s474_s17 = sshll.u32 (!%p177_p2), %s469_s16, 1 }
   0x6   : > { %180 = sbr.rel (%p177_p2) target bundleno = 48 (0x30), region = 36  ;;  %p211_p3 = scmp.lt.s32.totalorder (!%p177_p2), %s474_s17, 7 }
   0xb   : > { %s759_s17 = smov (!%p211_p3, %s474_s17), 7  ;;  %v681_v0 = vld [vmem:[%s755_s2] ss:$0 sm:$0xff] }
   0xc   : > { %s664_s18 = sshll.u32 %s759_s17, 5  ;;  %v686_v1 = vld [vmem:[%s756_s3] ss:$0 sm:$0xff] }
   0xd   : > { %s670_s21 = scalar_lea.vmem %s753_s0, %s664_s18  ;;  %s676_s24 = scalar_lea.vmem %s754_s1, %s664_s18 }
   0xe   : > { %v489_v2 = vld [vmem:[%s670_s21] sm:$0xff]   ;;  %v592_v4 = vld [vmem:[%s670_s21 + $0x8] sm:$0xff]   ;;  %v593_v10 = vld [vmem:[%s670_s21 + $0x10] sm:$0xff]   ;;  %s713_s5 = scalar_lea.vmem %s757_s4, %s664_s18 }
   0xf   : > { %v521_v3 = vld [vmem:[%s676_s24] sm:$0xff]   ;;  %v490_v5 = vunpack.c.l.bf16 %v489_v2  ;;  %v491_v6 = vunpack.c.h.bf16 %v489_v2  ;;  %v599_v9 = vld [vmem:[%s676_s24 + $0x8] sm:$0xff]   ;;  %v600_v11 = vld [vmem:[%s676_s24 + $0x10] sm:$0xff]   ;;  %v494_v12 = vunpack.c.l.bf16 %v592_v4  ;;  %v495_v13 = vunpack.c.h.bf16 %v592_v4 }
  0x10   : > { %v522_v7 = vunpack.c.l.bf16 %v521_v3  ;;  %v523_v8 = vunpack.c.h.bf16 %v521_v3  ;;  %v526_v14 = vunpack.c.l.bf16 %v599_v9  ;;  %v527_v15 = vunpack.c.h.bf16 %v599_v9  ;;  %v594_v20 = vld [vmem:[%s670_s21 + $0x18] sm:$0xff]   ;;  %v595_v42 = vld [vmem:[%s670_s21 + $0x20] sm:$0xff]   ;;  %v596_v56 = vld [vmem:[%s670_s21 + $0x28] sm:$0xff]  }
  0x11   : > { %v300_v16 = vmul.f32 %v681_v0, %v490_v5  ;;  %v301_v17 = vmul.f32 %v681_v0, %v491_v6  ;;  %v498_v18 = vunpack.c.l.bf16 %v593_v10  ;;  %v499_v19 = vunpack.c.h.bf16 %v593_v10  ;;  %v601_v29 = vld [vmem:[%s676_s24 + $0x18] sm:$0xff]   ;;  %v602_v51 = vld [vmem:[%s676_s24 + $0x20] sm:$0xff]   ;;  %v603_v61 = vld [vmem:[%s676_s24 + $0x28] sm:$0xff]  }
  0x12   : > { %v302_v21 = vmul.f32 %v681_v0, %v494_v12  ;;  %v303_v22 = vmul.f32 %v681_v0, %v495_v13  ;;  %v530_v23 = vunpack.c.l.bf16 %v600_v11  ;;  %v531_v24 = vunpack.c.h.bf16 %v600_v11  ;;  %v604_v13 = vld [vmem:[%s676_s24 + $0x30] sm:$0xff]  }
  0x13   : > { %v319_v25 = vadd.f32 %v686_v1, %v300_v16  ;;  %v320_v26 = vadd.f32 %v686_v1, %v301_v17  ;;  %v304_v27 = vmul.f32 %v681_v0, %v498_v18  ;;  %v305_v28 = vmul.f32 %v681_v0, %v499_v19 }
  0x14   : > { %v321_v30 = vadd.f32 %v686_v1, %v302_v21  ;;  %v322_v31 = vadd.f32 %v686_v1, %v303_v22  ;;  %v502_v32 = vunpack.c.l.bf16 %v594_v20  ;;  %v503_v33 = vunpack.c.h.bf16 %v594_v20  ;;  %v598_v22 = vld [vmem:[%s670_s21 + $0x38] sm:$0xff]  }
  0x15   : > { %v335_v34 = vadd.f32 %v522_v7, %v319_v25  ;;  %v336_v35 = vadd.f32 %v523_v8, %v320_v26  ;;  %v323_v36 = vadd.f32 %v686_v1, %v304_v27  ;;  %v324_v37 = vadd.f32 %v686_v1, %v305_v28  ;;  %v597_v8 = vld [vmem:[%s670_s21 + $0x30] sm:$0xff]   ;;  %v605_v27 = vld [vmem:[%s676_s24 + $0x38] sm:$0xff]  }
  0x16   : > { %v337_v38 = vadd.f32 %v526_v14, %v321_v30  ;;  %v338_v39 = vadd.f32 %v527_v15, %v322_v31  ;;  %v534_v40 = vunpack.c.l.bf16 %v601_v29  ;;  %v535_v41 = vunpack.c.h.bf16 %v601_v29 }
  0x17   : > { %v351_v43 = vmax.f32 %v335_v34, 0.0  ;;  %v352_v44 = vmax.f32 %v336_v35, 0.0  ;;  %v339_v45 = vadd.f32 %v530_v23, %v323_v36  ;;  %v340_v46 = vadd.f32 %v531_v24, %v324_v37 }
  0x18   : > { %v353_v47 = vmax.f32 %v337_v38, 0.0  ;;  %v354_v48 = vmax.f32 %v338_v39, 0.0  ;;  %v306_v49 = vmul.f32 %v681_v0, %v502_v32  ;;  %v307_v50 = vmul.f32 %v681_v0, %v503_v33 }
  0x19   : > { %v555_v52 = vpack.c.bf16 %v352_v44, %v351_v43  ;;  %v355_v53 = vmax.f32 %v339_v45, 0.0  ;;  %v356_v54 = vmax.f32 %v340_v46, 0.0  ;;  %v506_v55 = vunpack.c.l.bf16 %v595_v42 }
  0x1a   : > { %v560_v57 = vpack.c.bf16 %v354_v48, %v353_v47  ;;  %v325_v58 = vadd.f32 %v686_v1, %v306_v49  ;;  %v326_v59 = vadd.f32 %v686_v1, %v307_v50  ;;  %v507_v60 = vunpack.c.h.bf16 %v595_v42 }
  0x1b   : > { %556 = vst [vmem:[%s713_s5] sm:$0xff] %v555_v52   ;;  %v565_v62 = vpack.c.bf16 %v356_v54, %v355_v53  ;;  %v538_v63 = vunpack.c.l.bf16 %v602_v51  ;;  %v539_v2 = vunpack.c.h.bf16 %v602_v51  ;;  %v308_v3 = vmul.f32 %v681_v0, %v506_v55 }
  0x1c   : > { %606 = vst [vmem:[%s713_s5 + $0x8] sm:$0xff] %v560_v57   ;;  %v341_v4 = vadd.f32 %v534_v40, %v325_v58  ;;  %v342_v5 = vadd.f32 %v535_v41, %v326_v59  ;;  %v309_v6 = vmul.f32 %v681_v0, %v507_v60  ;;  %v510_v7 = vunpack.c.l.bf16 %v596_v56 }
  0x1d   : > { %607 = vst [vmem:[%s713_s5 + $0x10] sm:$0xff] %v565_v62   ;;  %v327_v9 = vadd.f32 %v686_v1, %v308_v3  ;;  %v511_v10 = vunpack.c.h.bf16 %v596_v56  ;;  %v542_v11 = vunpack.c.l.bf16 %v603_v61  ;;  %v543_v12 = vunpack.c.h.bf16 %v603_v61 }
  0x1e   : > { %v357_v14 = vmax.f32 %v341_v4, 0.0  ;;  %v358_v15 = vmax.f32 %v342_v5, 0.0  ;;  %v328_v16 = vadd.f32 %v686_v1, %v309_v6  ;;  %v310_v17 = vmul.f32 %v681_v0, %v510_v7 }
  0x1f   : > { %v343_v18 = vadd.f32 %v538_v63, %v327_v9  ;;  %v311_v19 = vmul.f32 %v681_v0, %v511_v10  ;;  %v514_v20 = vunpack.c.l.bf16 %v597_v8  ;;  %v515_v21 = vunpack.c.h.bf16 %v597_v8 }
  0x20   : > { %v570_v23 = vpack.c.bf16 %v358_v15, %v357_v14  ;;  %v344_v24 = vadd.f32 %v539_v2, %v328_v16  ;;  %v329_v25 = vadd.f32 %v686_v1, %v310_v17  ;;  %v546_v26 = vunpack.c.l.bf16 %v604_v13 }
  0x21   : > { %v359_v28 = vmax.f32 %v343_v18, 0.0  ;;  %v330_v29 = vadd.f32 %v686_v1, %v311_v19  ;;  %v547_v30 = vunpack.c.h.bf16 %v604_v13  ;;  %v312_v31 = vmul.f32 %v681_v0, %v514_v20 }
  0x22   : > { %608 = vst [vmem:[%s713_s5 + $0x18] sm:$0xff] %v570_v23   ;;  %v360_v32 = vmax.f32 %v344_v24, 0.0  ;;  %v345_v33 = vadd.f32 %v542_v11, %v329_v25  ;;  %v313_v34 = vmul.f32 %v681_v0, %v515_v21  ;;  %v518_v35 = vunpack.c.l.bf16 %v598_v22 }
  0x23   : > { %v346_v36 = vadd.f32 %v543_v12, %v330_v29  ;;  %v331_v37 = vadd.f32 %v686_v1, %v312_v31  ;;  %v519_v38 = vunpack.c.h.bf16 %v598_v22  ;;  %v550_v39 = vunpack.c.l.bf16 %v605_v27 }
  0x24   : > { %v575_v40 = vpack.c.bf16 %v360_v32, %v359_v28  ;;  %v361_v41 = vmax.f32 %v345_v33, 0.0  ;;  %v332_v42 = vadd.f32 %v686_v1, %v313_v34  ;;  %v551_v43 = vunpack.c.h.bf16 %v605_v27 }
  0x25   : > { %v362_v44 = vmax.f32 %v346_v36, 0.0  ;;  %v347_v45 = vadd.f32 %v546_v26, %v331_v37  ;;  %v314_v46 = vmul.f32 %v681_v0, %v518_v35  ;;  %v315_v47 = vmul.f32 %v681_v0, %v519_v38 }
  0x26   : > { %609 = vst [vmem:[%s713_s5 + $0x20] sm:$0xff] %v575_v40   ;;  %v348_v48 = vadd.f32 %v547_v30, %v332_v42 }
  0x27   : > { %v580_v49 = vpack.c.bf16 %v362_v44, %v361_v41  ;;  %v363_v50 = vmax.f32 %v347_v45, 0.0  ;;  %v333_v51 = vadd.f32 %v686_v1, %v314_v46  ;;  %v334_v52 = vadd.f32 %v686_v1, %v315_v47 }
  0x28   : > { %v364_v53 = vmax.f32 %v348_v48, 0.0 }
  0x29   : > { %610 = vst [vmem:[%s713_s5 + $0x28] sm:$0xff] %v580_v49   ;;  %v349_v54 = vadd.f32 %v550_v39, %v333_v51  ;;  %v350_v55 = vadd.f32 %v551_v43, %v334_v52 }
  0x2a   : > { %v585_v56 = vpack.c.bf16 %v364_v53, %v363_v50 }
  0x2b   : > { %v365_v57 = vmax.f32 %v349_v54, 0.0  ;;  %v366_v58 = vmax.f32 %v350_v55, 0.0 }
  0x2c   : > { %611 = vst [vmem:[%s713_s5 + $0x30] sm:$0xff] %v585_v56  }
  0x2d   : > { %v590_v59 = vpack.c.bf16 %v366_v58, %v365_v57 }
  0x2f   : > { %612 = vst [vmem:[%s713_s5 + $0x38] sm:$0xff] %v590_v59  }
  0x30 PF: > { %s14_s15 = sadd.s32 1, %s629_s15  }
  0x31   : > { %p11_p4 = scmp.ge.s32.totalorder %s14_s15, 6  }
  0x33   :  { %13 = sbr.rel (!%p11_p4) target bundleno = 1 (0x1), region = 69 }

// kernel: basic_block_forward.3
= control target key start
LH: loop header
LB: loop body
LE: loop exit
PB: predicated region body
PF: predicated region fallthrough
CT: control target
= control target key end

     0   :  { %s2885_s15 = smov 0   ;;  %s3716_s0 = inlined_call_operand.vmem [shape: bf16[8,8,8,128], index: 0, kind: input, shape index: {}]   ;;  %s3717_s1 = inlined_call_operand.vmem [shape: bf16[3,384,128], index: 1, kind: input, shape index: {}]   ;;  %s3718_s2 = inlined_call_operand.vmem [shape: bf16[8,8,8,128], index: 2, kind: output, shape index: {0}]   ;;  %s3719_s3 = inlined_call_operand.vmem [shape: f32[4,8,128], index: 3, kind: output, shape index: {1}]   ;;  %s3720_s4 = inlined_call_operand.vmem [shape: f32[4,8,128], index: 4, kind: output, shape index: {2}]  }
   0x1 LB: > { %s2891_s16 = sadd.s32 4294967295, %s2857_s15   ;;  %p2302_p0 = scmp.ge.s32.totalorder %s2857_s15, 1  ;;  %s2857_s15 = sphi %s2885_s15, %s15_s15  }
   0x2   : > { %p169_p1 = scmp.lt.s32.totalorder %s2857_s15, 5 }
   0x4   : > { %p170_p2 = pnand %p2302_p0, %p169_p1 }
   0x5   : > { %s2303_s19 = sshll.u32 (!%p170_p2), %s2891_s16, 1  ;;  %p219_p4 = scmp.lt.s32.totalorder (!%p170_p2), %s2891_s16, 3 }
   0x6   : > { %173 = sbr.rel (%p170_p2) target bundleno = 489 (0x1e9), region = 28  ;;  %p206_p3 = scmp.lt.s32.totalorder (!%p170_p2), %s2303_s19, 7 }
   0xb   : > { %v2730_v0 = vld [vmem:[%s3717_s1 + $0xf8] sm:$0xff]  ;;  %vm254_vm0 = vcmask 1040384   ;;  %vm255_vm1 = vsmask.f32 256  ;;  %v2729_v1 = vld [vmem:[%s3717_s1 + $0xf0] sm:$0xff]  ;;  %s3730_s19 = smov (!%p206_p3, %s2303_s19), 7 }
   0xc   : > { %1212 = vmatpush.bf16.msra.mxu0 %v2730_v0  ;;  %2818 = vmatpush.bf16.msra.mxu1 %v2730_v0  ;;  %vm2902_vm2 = vmand %vm254_vm0, %vm255_vm1  ;;  %vm305_vm3 = vsmask.f32 7938  ;;  %v257_v3 = vld [vmem:[#allocation2 + $0x8] sm:$0x1]  ;;  %v260_v4 = vld [vmem:[#allocation2 + $0x10] sm:$0x1] }
   0xd   : > { %2819 = vmatpush.bf16.msra.mxu2 %v2730_v0  ;;  %2820 = vmatpush.bf16.msra.mxu3 %v2730_v0  ;;  %vm2909_vm4 = vmand %vm254_vm0, %vm305_vm3  ;;  %v2728_v6 = vld [vmem:[%s3717_s1 + $0xe8] sm:$0xff]  ;;  %v258_v7 = vsel %vm2902_vm2, 0, %v257_v3  ;;  %v261_v8 = vsel %vm2902_vm2, 0, %v260_v4  ;;  %v310_v10 = vld [vmem:[#allocation2 + $0x14] sm:$0x1]  ;;  %s2697_s24 = sshll.u32 %s3730_s19, 5 }
   0xe   : > { %v307_v9 = vld [vmem:[#allocation2 + $0xc] sm:$0x1]  ;;  %259 = vst [vmem:[#allocation2 + $0x8] sm:$0x1] %v258_v7  ;;  %v311_v12 = vsel %vm2909_vm4, 0, %v310_v10  ;;  %vm515_vm5 = vcmask 1043456   ;;  %s2930_s27 = scalar_lea.vmem %s3716_s0, %s2697_s24  ;;  %s3681_s11 = scalar_lea.vmem %s3718_s2, %s2697_s24 }
   0xf   : > { %v308_v11 = vsel %vm2909_vm4, 0, %v307_v9  ;;  %262 = vst [vmem:[#allocation2 + $0x10] sm:$0x1] %v261_v8  ;;  %v269_v13 = vld [vmem:[#allocation2 + $0x28] sm:$0x1]  ;;  %v2727_v25 = vld [vmem:[%s3717_s1 + $0xe0] sm:$0xff]  ;;  %vm2945_vm6 = vmand %vm515_vm5, %vm305_vm3 }
  0x10   : > { %1213 = vmatpush.bf16.msra.mxu0 %v2729_v1  ;;  %2821 = vmatpush.bf16.msra.mxu1 %v2729_v1  ;;  %v272_v14 = vld [vmem:[#allocation2 + $0x30] sm:$0x1]  ;;  %v228_v15 = vld [vmem:[%s2930_s27] sm:$0xf]  ;;  %v229_v16 = vld [vmem:[%s2930_s27 + $0x4] sm:$0xf] }
  0x11   : > { %2822 = vmatpush.bf16.msra.mxu2 %v2729_v1  ;;  %2823 = vmatpush.bf16.msra.mxu3 %v2729_v1  ;;  %309 = vst [vmem:[#allocation2 + $0xc] sm:$0x1] %v308_v11  ;;  %v356_v17 = vshrl.u32 %v228_v15, 16  ;;  %v359_v18 = vshll.u32 %v228_v15, 16  ;;  %v364_v19 = vshrl.u32 %v229_v16, 16  ;;  %v367_v20 = vshll.u32 %v229_v16, 16 }
  0x12   : > { %312 = vst [vmem:[#allocation2 + $0x14] sm:$0x1] %v311_v12  ;;  %v232_v21 = vld [vmem:[%s2930_s27 + $0x10] sm:$0xf]  ;;  %v233_v22 = vld [vmem:[%s2930_s27 + $0x14] sm:$0xf] }
  0x13   : > { %v270_v23 = vsel %vm2902_vm2, 0, %v269_v13  ;;  %v273_v24 = vsel %vm2902_vm2, 0, %v272_v14  ;;  %v358_v26 = vrot.slane %v356_v17, 7  ;;  %v366_v27 = vrot.slane %v364_v19, 7  ;;  %v2726_v38 = vld [vmem:[%s3717_s1 + $0xd8] sm:$0xff]  ;;  %v2725_v55 = vld [vmem:[%s3717_s1 + $0xd0] sm:$0xff] }
  0x14   : > { %1214 = vmatpush.bf16.msra.mxu0 %v2728_v6  ;;  %2824 = vmatpush.bf16.msra.mxu1 %v2728_v6  ;;  %271 = vst [vmem:[#allocation2 + $0x28] sm:$0x1] %v270_v23  ;;  %v388_v28 = vshrl.u32 %v232_v21, 16  ;;  %v391_v30 = vshll.u32 %v232_v21, 16  ;;  %v396_v31 = vshrl.u32 %v233_v22, 16  ;;  %v399_v32 = vshll.u32 %v233_v22, 16 }
  0x15   : > { %2825 = vmatpush.bf16.msra.mxu2 %v2728_v6  ;;  %2826 = vmatpush.bf16.msra.mxu3 %v2728_v6  ;;  %274 = vst [vmem:[#allocation2 + $0x30] sm:$0x1] %v273_v24  ;;  %v361_v33 = vor.u32 %v359_v18, %v358_v26  ;;  %v362_v34 = vrot.slane %v358_v26, 4  ;;  %v369_v35 = vor.u32 %v367_v20, %v366_v27  ;;  %v370_v36 = vrot.slane %v366_v27, 4  ;;  %v517_v37 = vld [vmem:[#allocation2 + $0x8] sm:$0xf] }
  0x16   : > { %v523_v39 = vld [vmem:[#allocation2 + $0x10] sm:$0xf]  ;;  %v2952_v40 = vrot.slane %v388_v28, 7  ;;  %v2954_v41 = vrot.slane %v396_v31, 7  ;;  %v236_v45 = vld [vmem:[%s2930_s27 + $0x20] sm:$0xf] }
  0x17   : > { %v518_v42 = vsel %vm2945_vm6, %v361_v33, %v517_v37  ;;  %v524_v44 = vsel %vm2945_vm6, %v369_v35, %v523_v39  ;;  %v2962_v46 = vld [vmem:[%s2930_s27 + $0x24] sm:$0xf]  ;;  %v281_v50 = vld [vmem:[#allocation2 + $0x58] sm:$0x1]  ;;  %v284_v53 = vld [vmem:[#allocation2 + $0x60] sm:$0x1] }
  0x18   : > { %1215 = vmatpush.bf16.msra.mxu0 %v2727_v25  ;;  %2827 = vmatpush.bf16.msra.mxu1 %v2727_v25  ;;  %v520_v43 = vld [vmem:[#allocation2 + $0xc] sm:$0x1]  ;;  %519 = vst [vmem:[#allocation2 + $0x8] sm:$0xf] %v518_v42  ;;  %v393_v49 = vor.u32 %v391_v30, %v2952_v40  ;;  %v401_v52 = vor.u32 %v399_v32, %v2954_v41  ;;  %v240_v54 = vld [vmem:[%s2930_s27 + $0x30] sm:$0xf] }
  0x19   : > { %2828 = vmatpush.bf16.msra.mxu2 %v2727_v25  ;;  %2829 = vmatpush.bf16.msra.mxu3 %v2727_v25  ;;  %v521_v47 = vsel %vm2902_vm2, %v362_v34, %v520_v43  ;;  %v526_v48 = vld [vmem:[#allocation2 + $0x14] sm:$0x1]  ;;  %525 = vst [vmem:[#allocation2 + $0x10] sm:$0xf] %v524_v44  ;;  %v420_v57 = vshrl.u32 %v236_v45, 16  ;;  %v282_v60 = vsel %vm2902_vm2, 0, %v281_v50 }
  0x1a   : > { %522 = vst [vmem:[#allocation2 + $0xc] sm:$0x1] %v521_v47  ;;  %v527_v51 = vsel %vm2902_vm2, %v370_v36, %v526_v48  ;;  %v428_v61 = vshrl.u32 %v2962_v46, 16  ;;  %v285_v63 = vsel %vm2902_vm2, 0, %v284_v53  ;;  %v241_v0 = vld [vmem:[%s2930_s27 + $0x34] sm:$0xf] }
  0x1b   : > { %v541_v56 = vld [vmem:[#allocation2 + $0x28] sm:$0xf]  ;;  %528 = vst [vmem:[#allocation2 + $0x14] sm:$0x1] %v527_v51  ;;  %v452_v1 = vshrl.u32 %v240_v54, 16  ;;  %v2987_v7 = vrot.slane %v420_v57, 7 }
  0x1c   : > { %1216 = vmatpush.bf16.msra.mxu0 %v2726_v38  ;;  %2830 = vmatpush.bf16.msra.mxu1 %v2726_v38  ;;  %v542_v58 = vsel %vm2945_vm6, %v393_v49, %v541_v56  ;;  %v547_v59 = vld [vmem:[#allocation2 + $0x30] sm:$0xf]  ;;  %v2724_v3 = vld [vmem:[%s3717_s1 + $0xc8] sm:$0xff]  ;;  %v293_v4 = vld [vmem:[#allocation2 + $0x78] sm:$0x1]  ;;  %v423_v8 = vshll.u32 %v236_v45, 16 }
  0x1d   : > { %2831 = vmatpush.bf16.msra.mxu2 %v2726_v38  ;;  %2832 = vmatpush.bf16.msra.mxu3 %v2726_v38  ;;  %543 = vst [vmem:[#allocation2 + $0x28] sm:$0xf] %v542_v58  ;;  %v548_v62 = vsel %vm2945_vm6, %v401_v52, %v547_v59  ;;  %v296_v6 = vld [vmem:[#allocation2 + $0x80] sm:$0x1]  ;;  %v294_v9 = vsel %vm2902_vm2, 0, %v293_v4  ;;  %v2993_v12 = vrot.slane %v428_v61, 7 }
  0x1e   : > { %549 = vst [vmem:[#allocation2 + $0x30] sm:$0xf] %v548_v62  ;;  %v297_v10 = vsel %vm2902_vm2, 0, %v296_v6  ;;  %v431_v13 = vshll.u32 %v2962_v46, 16  ;;  %v2996_v14 = vrot.slane %v452_v1, 7  ;;  %v455_v15 = vshll.u32 %v240_v54, 16 }
  0x1f   : > { %283 = vst [vmem:[#allocation2 + $0x58] sm:$0x1] %v282_v60  ;;  %v615_v11 = vld [vmem:[#allocation2 + $0x8] sm:$0xf]  ;;  %v460_v16 = vshrl.u32 %v241_v0, 16  ;;  %v463_v18 = vshll.u32 %v241_v0, 16  ;;  %v425_v21 = vor.u32 %v423_v8, %v2987_v7 }
  0x20   : > { %1217 = vmatpush.bf16.msra.mxu0 %v2725_v55  ;;  %2833 = vmatpush.bf16.msra.mxu1 %v2725_v55  ;;  %286 = vst [vmem:[#allocation2 + $0x60] sm:$0x1] %v285_v63  ;;  %v617_v17 = vld [vmem:[#allocation2 + $0x10] sm:$0xf]  ;;  %v2998_v19 = vunpack.c.l.b16 %v615_v11  ;;  %v2723_v23 = vld [vmem:[%s3717_s1 + $0xc0] sm:$0xff]  ;;  %v433_v25 = vor.u32 %v431_v13, %v2993_v12  ;;  %v457_v28 = vor.u32 %v455_v15, %v2996_v14  ;;  %v2746_v33 = vld [vmem:[%s3717_s1 + $0x178] sm:$0xff] }
  0x21   : > { %2834 = vmatpush.bf16.msra.mxu2 %v2725_v55  ;;  %2835 = vmatpush.bf16.msra.mxu3 %v2725_v55  ;;  %295 = vst [vmem:[#allocation2 + $0x78] sm:$0x1] %v294_v9  ;;  %v3000_v20 = vunpack.c.l.b16 %v617_v17  ;;  %v3003_v22 = vrot.slane %v460_v16, 7  ;;  %v2706_v34 = vld [vmem:[%s3717_s1 + $0x38] sm:$0xff]  ;;  %v2745_v47 = vld [vmem:[%s3717_s1 + $0x170] sm:$0xff]  ;;  %v2744_v56 = vld [vmem:[%s3717_s1 + $0x168] sm:$0xff] }
  0x22   : > { %298 = vst [vmem:[#allocation2 + $0x80] sm:$0x1] %v297_v10  ;;  %v2738_v43 = vld [vmem:[%s3717_s1 + $0x138] sm:$0xff]  ;;  %v2705_v48 = vld [vmem:[%s3717_s1 + $0x30] sm:$0xff]  ;;  %v230_v52 = vld [vmem:[%s2930_s27 + $0x8] sm:$0xf] }
  0x23   : > { %v465_v32 = vor.u32 %v463_v18, %v3003_v22  ;;  %v1020_v35 = vpack.c.b16 %v3000_v20, %v2998_v19  ;;  %v2714_v44 = vld [vmem:[%s3717_s1 + $0x78] sm:$0xff]  ;;  %v2737_v50 = vld [vmem:[%s3717_s1 + $0x130] sm:$0xff]  ;;  %v231_v53 = vld [vmem:[%s2930_s27 + $0xc] sm:$0xf]  ;;  %v372_v60 = vshrl.u32 %v230_v52, 16  ;;  %v375_v61 = vshll.u32 %v230_v52, 16 }
  0x24   : > { %1218 = vmatpush.bf16.msra.mxu0 %v2724_v3  ;;  %2836 = vmatpush.bf16.msra.mxu1 %v2724_v3  ;;  %v623_v24 = vld [vmem:[#allocation2 + $0x28] sm:$0xf]  ;;  %v2713_v51 = vld [vmem:[%s3717_s1 + $0x70] sm:$0xff]  ;;  %v263_v54 = vld [vmem:[#allocation2 + $0x18] sm:$0x1]  ;;  %v380_v63 = vshrl.u32 %v231_v53, 16 }
  0x25   : > { %2837 = vmatpush.bf16.msra.mxu2 %v2724_v3  ;;  %2838 = vmatpush.bf16.msra.mxu3 %v2724_v3  ;;  %v625_v26 = vld [vmem:[#allocation2 + $0x30] sm:$0xf]  ;;  %v3009_v27 = vunpack.c.l.b16 %v623_v24  ;;  %v266_v55 = vld [vmem:[#allocation2 + $0x20] sm:$0x1]  ;;  %v2704_v57 = vld [vmem:[%s3717_s1 + $0x28] sm:$0xff]  ;;  %v264_v58 = vsel %vm2902_vm2, 0, %v263_v54 }
  0x26   : > { %v3012_v30 = vunpack.c.l.b16 %v625_v26  ;;  %v565_v31 = vld [vmem:[#allocation2 + $0x58] sm:$0xf]  ;;  %v267_v59 = vsel %vm2902_vm2, 0, %v266_v55  ;;  %265 = vst [vmem:[#allocation2 + $0x18] sm:$0x1] %v264_v58  ;;  %v383_v0 = vshll.u32 %v231_v53, 16 }
  0x27   : > { %v566_v36 = vsel %vm2945_vm6, %v425_v21, %v565_v31  ;;  %v571_v37 = vld [vmem:[#allocation2 + $0x60] sm:$0xf]  ;;  %v234_v62 = vld [vmem:[%s2930_s27 + $0x18] sm:$0xf]  ;;  %v235_v1 = vld [vmem:[%s2930_s27 + $0x1c] sm:$0xf] }
  0x28   : > { %1219 = vmatpush.bf16.msra.mxu0 %v2723_v23  ;;  %2839 = vmatpush.bf16.msra.mxu1 %v2723_v23  ;;  %v1026_v38 = vpack.c.b16 %v3012_v30, %v3009_v27  ;;  %567 = vst [vmem:[#allocation2 + $0x58] sm:$0xf] %v566_v36  ;;  %v572_v39 = vsel %vm2945_vm6, %v433_v25, %v571_v37  ;;  %v589_v42 = vld [vmem:[#allocation2 + $0x78] sm:$0xf]  ;;  %v2736_v3 = vld [vmem:[%s3717_s1 + $0x128] sm:$0xff]  ;;  %v3071_v6 = vrot.slane %v372_v60, 7 }
  0x29   : > { %2840 = vmatpush.bf16.msra.mxu2 %v2723_v23  ;;  %2841 = vmatpush.bf16.msra.mxu3 %v2723_v23  ;;  %573 = vst [vmem:[#allocation2 + $0x60] sm:$0xf] %v572_v39  ;;  %v590_v45 = vsel %vm2945_vm6, %v457_v28, %v589_v42  ;;  %v595_v46 = vld [vmem:[#allocation2 + $0x80] sm:$0xf]  ;;  %v2712_v4 = vld [vmem:[%s3717_s1 + $0x68] sm:$0xff]  ;;  %v404_v9 = vshrl.u32 %v234_v62, 16 }
  0x2a   : > { %591 = vst [vmem:[#allocation2 + $0x78] sm:$0xf] %v590_v45  ;;  %v596_v49 = vsel %vm2945_vm6, %v465_v32, %v595_v46  ;;  %v275_v8 = vld [vmem:[#allocation2 + $0x38] sm:$0x1]  ;;  %v3073_v11 = vrot.slane %v380_v63, 7  ;;  %v2743_v18 = vld [vmem:[%s3717_s1 + $0x160] sm:$0xff]  ;;  %v377_v26 = vor.u32 %v375_v61, %v3071_v6 }
  0x2b   : > { %1220 = vmatmul.bf16.vlgmr.msra.gmra.mxu0 %v1020_v35  ;;  %1230 = vmatmul.bf16.vlgmr.msra.gmra.mxu1 %v1026_v38  ;;  %597 = vst [vmem:[#allocation2 + $0x80] sm:$0xf] %v596_v49  ;;  %v276_v13 = vsel %vm2902_vm2, 0, %v275_v8  ;;  %v278_v15 = vld [vmem:[#allocation2 + $0x40] sm:$0x1]  ;;  %v3091_v31 = vrot.slane %v404_v9, 7 }
  0x2c   : > { %1261 = vmatpush.bf16.msrb.mxu1 %v2738_v43  ;;  %1600 = vmatpush.bf16.msrb.mxu0 %v2714_v44  ;;  %268 = vst [vmem:[#allocation2 + $0x20] sm:$0x1] %v267_v59  ;;  %v279_v21 = vsel %vm2902_vm2, 0, %v278_v15  ;;  %v2703_v25 = vld [vmem:[%s3717_s1 + $0x20] sm:$0xff]  ;;  %v385_v28 = vor.u32 %v383_v0, %v3073_v11  ;;  %v407_v35 = vshll.u32 %v234_v62, 16  ;;  %v412_v36 = vshrl.u32 %v235_v1, 16 }
  0x2d   : > { %1310 = vmatpush.bf16.msrb.mxu2 %v2746_v33  ;;  %1551 = vmatpush.bf16.msrb.mxu3 %v2706_v34  ;;  %277 = vst [vmem:[#allocation2 + $0x38] sm:$0x1] %v276_v13  ;;  %v2735_v34 = vld [vmem:[%s3717_s1 + $0x120] sm:$0xff]  ;;  %v415_v37 = vshll.u32 %v235_v1, 16  ;;  %v238_v43 = vld [vmem:[%s2930_s27 + $0x28] sm:$0xf] }
  0x2e   : > { %280 = vst [vmem:[#allocation2 + $0x40] sm:$0x1] %v279_v21  ;;  %v2711_v42 = vld [vmem:[%s3717_s1 + $0x60] sm:$0xff]  ;;  %v3107_v44 = vld [vmem:[%s2930_s27 + $0x2c] sm:$0xf]  ;;  %v439_v60 = vshll.u32 %v238_v43, 16 }
  0x2f   : > { %v635_v10 = vld [vmem:[#allocation2 + $0x58] sm:$0xf]  ;;  %v616_v45 = vld [vmem:[#allocation2 + $0xc] sm:$0x1]  ;;  %v287_v49 = vld [vmem:[#allocation2 + $0x68] sm:$0x1] }
  0x30   : > { %v637_v16 = vld [vmem:[#allocation2 + $0x60] sm:$0xf]  ;;  %v3077_v17 = vunpack.c.l.b16 %v635_v10  ;;  %1262 = vmatpush.bf16.msrb.mxu1 %v2737_v50  ;;  %1601 = vmatpush.bf16.msrb.mxu0 %v2713_v51  ;;  %v529_v46 = vld [vmem:[#allocation2 + $0x18] sm:$0xf]  ;;  %v436_v50 = vshrl.u32 %v238_v43, 16  ;;  %v288_v55 = vsel %vm2902_vm2, 0, %v287_v49  ;;  %v688_v10 = vunpack.c.l.b16 %v616_v45 }
  0x31   : > { %1311 = vmatpush.bf16.msrb.mxu2 %v2745_v47  ;;  %1552 = vmatpush.bf16.msrb.mxu3 %v2705_v48  ;;  %v3084_v23 = vunpack.c.l.b16 %v637_v16  ;;  %v643_v24 = vld [vmem:[#allocation2 + $0x78] sm:$0xf]  ;;  %v409_v47 = vor.u32 %v407_v35, %v3091_v31  ;;  %v3110_v48 = vrot.slane %v412_v36, 7  ;;  %v618_v51 = vld [vmem:[#allocation2 + $0x14] sm:$0x1]  ;;  %v530_v53 = vsel %vm2945_vm6, %v377_v26, %v529_v46  ;;  %v2748_v2 = vld [vmem:[%s3717_s1 + $0x188] sm:$0xff] }
  0x32   : > { %v645_v32 = vld [vmem:[#allocation2 + $0x80] sm:$0xf]  ;;  %v3093_v33 = vunpack.c.l.b16 %v643_v24  ;;  %531 = vst [vmem:[#allocation2 + $0x18] sm:$0xf] %v530_v53  ;;  %v242_v61 = vld [vmem:[%s2930_s27 + $0x38] sm:$0xf] }
  0x33   : > { %v1032_v38 = vpack.c.b16 %v3084_v23, %v3077_v17  ;;  %v3100_v39 = vunpack.c.l.b16 %v645_v32  ;;  %v535_v54 = vld [vmem:[#allocation2 + $0x20] sm:$0xf]  ;;  %v417_v59 = vor.u32 %v415_v37, %v3110_v48  ;;  %v2702_v62 = vld [vmem:[%s3717_s1 + $0x18] sm:$0xff]  ;;  %v3128_v0 = vrot.slane %v436_v50, 7  ;;  %289 = vst [vmem:[#allocation2 + $0x68] sm:$0x1] %v288_v55 }
  0x34   : > { %1263 = vmatpush.bf16.msrb.mxu1 %v2736_v3  ;;  %1602 = vmatpush.bf16.msrb.mxu0 %v2712_v4  ;;  %v536_v58 = vsel %vm2945_vm6, %v385_v28, %v535_v54  ;;  %v553_v63 = vld [vmem:[#allocation2 + $0x38] sm:$0xf]  ;;  %v444_v1 = vshrl.u32 %v3107_v44, 16  ;;  %v468_v9 = vshrl.u32 %v242_v61, 16  ;;  %v447_v15 = vshll.u32 %v3107_v44, 16  ;;  %v2741_v45 = vld [vmem:[%s3717_s1 + $0x150] sm:$0xff] }
  0x35   : > { %1312 = vmatpush.bf16.msrb.mxu2 %v2744_v56  ;;  %1553 = vmatpush.bf16.msrb.mxu3 %v2704_v57  ;;  %v1038_v52 = vpack.c.b16 %v3100_v39, %v3093_v33  ;;  %v290_v56 = vld [vmem:[#allocation2 + $0x70] sm:$0x1]  ;;  %v2742_v57 = vld [vmem:[%s3717_s1 + $0x158] sm:$0xff]  ;;  %537 = vst [vmem:[#allocation2 + $0x20] sm:$0xf] %v536_v58  ;;  %v554_v3 = vsel %vm2945_vm6, %v409_v47, %v553_v63  ;;  %v471_v36 = vshll.u32 %v242_v61, 16 }
  0x36   : > { %1240 = vmatmul.bf16.vlgmr.msra.gmra.mxu2 %v1032_v38  ;;  %v559_v4 = vld [vmem:[#allocation2 + $0x40] sm:$0xf]  ;;  %v291_v8 = vsel %vm2902_vm2, 0, %v290_v56  ;;  %555 = vst [vmem:[#allocation2 + $0x38] sm:$0xf] %v554_v3  ;;  %v3140_v26 = vrot.slane %v444_v1, 7 }
  0x37   : > { %1250 = vmatmul.bf16.vlgmr.msra.gmra.mxu3 %v1038_v52  ;;  %v560_v13 = vsel %vm2945_vm6, %v417_v59, %v559_v4  ;;  %v243_v16 = vld [vmem:[%s2930_s27 + $0x3c] sm:$0xf]  ;;  %v299_v21 = vld [vmem:[#allocation2 + $0x88] sm:$0x1]  ;;  %v302_v24 = vld [vmem:[#allocation2 + $0x90] sm:$0x1] }
  0x38   : > { %1264 = vmatpush.bf16.msrb.mxu1 %v2735_v34  ;;  %1603 = vmatpush.bf16.msrb.mxu0 %v2711_v42  ;;  %561 = vst [vmem:[#allocation2 + $0x40] sm:$0xf] %v560_v13  ;;  %v300_v28 = vsel %vm2902_vm2, 0, %v299_v21  ;;  %v303_v32 = vsel %vm2902_vm2, 0, %v302_v24  ;;  %v2734_v34 = vld [vmem:[%s3717_s1 + $0x118] sm:$0xff]  ;;  %v3149_v35 = vrot.slane %v468_v9, 7  ;;  %v3152_v42 = vpack.c.b16 %v688_v10, %v2998_v19 }
  0x39   : > { %1313 = vmatpush.bf16.msrb.mxu2 %v2743_v18  ;;  %1554 = vmatpush.bf16.msrb.mxu3 %v2703_v25  ;;  %v690_v18 = vunpack.c.l.b16 %v618_v51  ;;  %292 = vst [vmem:[#allocation2 + $0x70] sm:$0x1] %v291_v8  ;;  %v441_v25 = vor.u32 %v439_v60, %v3128_v0  ;;  %v476_v37 = vshrl.u32 %v243_v16, 16  ;;  %v479_v38 = vshll.u32 %v243_v16, 16  ;;  %v619_v43 = vld [vmem:[#allocation2 + $0x18] sm:$0xf] }
  0x3a   : > { %301 = vst [vmem:[#allocation2 + $0x88] sm:$0x1] %v300_v28  ;;  %v2710_v44 = vld [vmem:[%s3717_s1 + $0x58] sm:$0xff]  ;;  %v3163_v49 = vunpack.c.l.b16 %v619_v43  ;;  %v2701_v51 = vld [vmem:[%s3717_s1 + $0x10] sm:$0xff]  ;;  %v449_v54 = vor.u32 %v447_v15, %v3140_v26  ;;  %v577_v55 = vld [vmem:[#allocation2 + $0x68] sm:$0xf]  ;;  %v473_v59 = vor.u32 %v471_v36, %v3149_v35 }
  0x3b   : > { %304 = vst [vmem:[#allocation2 + $0x90] sm:$0x1] %v303_v32  ;;  %v3161_v46 = vpack.c.b16 %v690_v18, %v3000_v20  ;;  %v3165_v50 = vrot.slane %v476_v37, 7  ;;  %v2733_v52 = vld [vmem:[%s3717_s1 + $0x110] sm:$0xff]  ;;  %v2740_v56 = vld [vmem:[%s3717_s1 + $0x148] sm:$0xff]  ;;  %v578_v58 = vsel %vm2945_vm6, %v441_v25, %v577_v55  ;;  %v743_v8 = vshll.u32 %v3152_v42, 16 }
  0x3c   : > { %1265 = vmatpush.bf16.msrb.mxu1 %v2734_v34  ;;  %v621_v47 = vld [vmem:[#allocation2 + $0x20] sm:$0xf]  ;;  %1604 = vmatpush.bf16.msrb.mxu0 %v2710_v44  ;;  %v2709_v60 = vld [vmem:[%s3717_s1 + $0x50] sm:$0xff]  ;;  %v2700_v61 = vld [vmem:[%s3717_s1 + $0x8] sm:$0xff]  ;;  %579 = vst [vmem:[#allocation2 + $0x68] sm:$0xf] %v578_v58 }
  0x3d   : > { %1314 = vmatpush.bf16.msrb.mxu2 %v2742_v57  ;;  %1555 = vmatpush.bf16.msrb.mxu3 %v2702_v62  ;;  %v3173_v53 = vunpack.c.l.b16 %v621_v47  ;;  %v627_v57 = vld [vmem:[#allocation2 + $0x38] sm:$0xf]  ;;  %v481_v3 = vor.u32 %v479_v38, %v3165_v50  ;;  %v2732_v4 = vld [vmem:[%s3717_s1 + $0x108] sm:$0xff]  ;;  %v750_v13 = vshll.u32 %v3161_v46, 16  ;;  %v2739_v21 = vld [vmem:[%s3717_s1 + $0x140] sm:$0xff]  ;;  %v741_v37 = vshrl.u32 %v3152_v42, 16 }
  0x3e   : > { %v3190_v1 = vunpack.c.l.b16 %v627_v57  ;;  %v2708_v18 = vld [vmem:[%s3717_s1 + $0x48] sm:$0xff]  ;;  %v2699_v32 = vld [vmem:[%s3717_s1] sm:$0xff]  ;;  %v745_v38 = vrot.slane %v743_v8, 1  ;;  %v2754_v43 = vld [vmem:[%s3717_s1 + $0x1b8] sm:$0xff]  ;;  %v748_v44 = vshrl.u32 %v3161_v46, 16  ;;  %s3732_s16 = smov (!%p219_p4, %s2891_s16), 3 }
  0x3f   : > { %v1023_v62 = vpack.c.b16 %v3173_v53, %v3163_v49  ;;  %v629_v63 = vld [vmem:[#allocation2 + $0x40] sm:$0xf]  ;;  %v2762_v29 = vld [vmem:[%s3717_s1 + $0x1f8] sm:$0xff]  ;;  %v322_v8 = vld [vmem:[#allocation2 + $0x34] sm:$0x1]  ;;  %s2309_s19 = sshll.u32 %s3732_s16, 3 }
  0x40   : > { %1266 = vmatpush.bf16.msrb.mxu1 %v2733_v52  ;;  %v3197_v9 = vunpack.c.l.b16 %v629_v63  ;;  %v583_v10 = vld [vmem:[#allocation2 + $0x70] sm:$0xf]  ;;  %1605 = vmatpush.bf16.msrb.mxu0 %v2709_v60  ;;  %v2731_v36 = vld [vmem:[%s3717_s1 + $0x100] sm:$0xff]  ;;  %v2722_v47 = vld [vmem:[%s3717_s1 + $0xb8] sm:$0xff]  ;;  %s222_s13 = scalar_lea.vmem %s3719_s3, %s2309_s19  ;;  %s226_s18 = scalar_lea.vmem %s3720_s4, %s2309_s19 }
  0x41   : > { %1315 = vmatpush.bf16.msrb.mxu2 %v2741_v45  ;;  %1556 = vmatpush.bf16.msrb.mxu3 %v2701_v51  ;;  %v584_v15 = vsel %vm2945_vm6, %v449_v54, %v583_v10  ;;  %v601_v16 = vld [vmem:[#allocation2 + $0x88] sm:$0xf]  ;;  %v752_v45 = vrot.slane %v750_v13, 1  ;;  %v2859_v51 = vmov 0   ;;  %v313_v52 = vld [vmem:[#allocation2 + $0x1c] sm:$0x1] }
  0x42   : > { %1225 = vmatmul.bf16.gmra.mxu0 %v1023_v62  ;;  %v1029_v24 = vpack.c.b16 %v3197_v9, %v3190_v1  ;;  %585 = vst [vmem:[#allocation2 + $0x70] sm:$0xf] %v584_v15  ;;  %v602_v25 = vsel %vm2945_vm6, %v473_v59, %v601_v16  ;;  %v607_v28 = vld [vmem:[#allocation2 + $0x90] sm:$0xf]  ;;  %v2707_v55 = vld [vmem:[%s3717_s1 + $0x40] sm:$0xff]  ;;  %v2770_v57 = vld [vmem:[%s3717_s1 + $0x238] sm:$0xff] }
  0x43   : > { %603 = vst [vmem:[#allocation2 + $0x88] sm:$0xf] %v602_v25  ;;  %v608_v34 = vsel %vm2945_vm6, %v481_v3, %v607_v28  ;;  %v639_v54 = vld [vmem:[#allocation2 + $0x68] sm:$0xf]  ;;  %v3241_v59 = vor.u32 %v752_v45, %v748_v44  ;;  %v314_v60 = vsel %vm2909_vm4, 0, %v313_v52  ;;  %v2721_v52 = vld [vmem:[%s3717_s1 + $0xb0] sm:$0xff] }
  0x44   : > { %1267 = vmatpush.bf16.msrb.mxu1 %v2732_v4  ;;  %609 = vst [vmem:[#allocation2 + $0x90] sm:$0xf] %v608_v34  ;;  %1606 = vmatpush.bf16.msrb.mxu0 %v2708_v18  ;;  %v3239_v58 = vunpack.c.l.b16 %v639_v54  ;;  %v319_v63 = vld [vmem:[#allocation2 + $0x2c] sm:$0x1]  ;;  %v328_v44 = vld [vmem:[#allocation2 + $0x44] sm:$0x1] }
  0x45   : > { %1316 = vmatpush.bf16.msrb.mxu2 %v2740_v56  ;;  %1557 = vmatpush.bf16.msrb.mxu3 %v2700_v61  ;;  %244 = vst [vmem:[#allocation2] sm:$0xf] %v2859_v51  ;;  %v3234_v56 = vor.u32 %v745_v38, %v741_v37  ;;  %v316_v61 = vld [vmem:[#allocation2 + $0x24] sm:$0x1]  ;;  %v320_v28 = vsel %vm2909_vm4, 0, %v319_v63  ;;  %v847_v63 = vrot.slane %v3161_v46, 1 }
  0x46   : > { %1235 = vmatmul.bf16.gmra.mxu1 %v1029_v24  ;;  %245 = vst [vmem:[#allocation2 + $0x4] sm:$0x1] %v2859_v51  ;;  %v317_v16 = vsel %vm2909_vm4, 0, %v316_v61  ;;  %v865_v24 = vunpack.c.l.b16 %v3241_v59  ;;  %v329_v61 = vsel %vm2909_vm4, 0, %v328_v44  ;;  %v418_v46 = vrot.slane %v3110_v48, 4 }
  0x47   : > { %246 = vst [vmem:[#allocation2 + $0x50] sm:$0xf] %v2859_v51  ;;  %v863_v15 = vunpack.c.l.b16 %v3234_v56  ;;  %v331_v56 = vld [vmem:[#allocation2 + $0x5c] sm:$0x1] }
  0x48   : > { %1268 = vmatpush.bf16.msrb.mxu1 %v2731_v36  ;;  %247 = vst [vmem:[#allocation2 + $0x54] sm:$0x1] %v2859_v51  ;;  %1607 = vmatpush.bf16.msrb.mxu0 %v2707_v55  ;;  %v323_v36 = vsel %vm2909_vm4, 0, %v322_v8  ;;  %v378_v55 = vrot.slane %v3071_v6, 4  ;;  %v394_v6 = vrot.slane %v2952_v40, 4 }
  0x49   : > { %1317 = vmatpush.bf16.msrb.mxu2 %v2739_v21  ;;  %1558 = vmatpush.bf16.msrb.mxu3 %v2699_v32  ;;  %v641_v62 = vld [vmem:[#allocation2 + $0x70] sm:$0xf]  ;;  %249 = vst [vmem:[#allocation2 + $0x48] sm:$0xf] %v2859_v51  ;;  %v1021_v45 = vpack.c.b16 %v865_v24, %v863_v15 }
  0x4a   : > { %v3245_v3 = vunpack.c.l.b16 %v641_v62  ;;  %v647_v4 = vld [vmem:[#allocation2 + $0x88] sm:$0xf]  ;;  %250 = vst [vmem:[#allocation2 + $0x4c] sm:$0x1] %v2859_v51  ;;  %v846_v62 = vrot.slane %v3152_v42, 1  ;;  %v410_v42 = vrot.slane %v3091_v31, 4 }
  0x4b   : > { %v649_v10 = vld [vmem:[#allocation2 + $0x90] sm:$0xf]  ;;  %v3247_v13 = vunpack.c.l.b16 %v647_v4  ;;  %251 = vst [vmem:[#allocation2 + $0x98] sm:$0xf] %v2859_v51 }
  0x4c   : > { %1649 = vmatpush.bf16.msra.mxu1 %v2722_v47  ;;  %2031 = vmatpush.bf16.msra.mxu0 %v2770_v57  ;;  %v1035_v18 = vpack.c.b16 %v3245_v3, %v3239_v58  ;;  %v3254_v21 = vunpack.c.l.b16 %v649_v10  ;;  %v3257_v25 = vld [vmem:[#allocation2] sm:$0xf]  ;;  %252 = vst [vmem:[#allocation2 + $0x9c] sm:$0x1] %v2859_v51  ;;  %v2753_v47 = vld [vmem:[%s3717_s1 + $0x1b0] sm:$0xff]  ;;  %v386_v57 = vrot.slane %v3073_v11, 4 }
  0x4d   : > { %1933 = vmatpush.bf16.msra.mxu2 %v2754_v43  ;;  %1982 = vmatpush.bf16.msra.mxu3 %v2762_v29  ;;  %v614_v32 = vld [vmem:[#allocation2 + $0x4] sm:$0x1]  ;;  %v685_v34 = vunpack.c.l.b16 %v3257_v25  ;;  %315 = vst [vmem:[#allocation2 + $0x1c] sm:$0x1] %v314_v60  ;;  %v325_v43 = vld [vmem:[#allocation2 + $0x3c] sm:$0x1] }
  0x4e   : > { %1245 = vmatmul.bf16.gmra.mxu2 %v1035_v18  ;;  %v1041_v37 = vpack.c.b16 %v3254_v21, %v3247_v13  ;;  %v686_v38 = vunpack.c.l.b16 %v614_v32  ;;  %318 = vst [vmem:[#allocation2 + $0x24] sm:$0x1] %v317_v16  ;;  %v2761_v51 = vld [vmem:[%s3717_s1 + $0x1f0] sm:$0xff]  ;;  %v326_v54 = vsel %vm2909_vm4, 0, %v325_v43  ;;  %v402_v11 = vrot.slane %v2954_v41, 4 }
  0x4f   : > { %321 = vst [vmem:[#allocation2 + $0x2c] sm:$0x1] %v320_v28  ;;  %v2769_v60 = vld [vmem:[%s3717_s1 + $0x230] sm:$0xff]  ;;  %v3300_v28 = vunpack.c.l.b16 %v846_v62  ;;  %v3302_v32 = vunpack.c.l.b16 %v847_v63 }
  0x50   : > { %1255 = vmatmul.bf16.gmra.mxu3 %v1041_v37  ;;  %v3270_v29 = vpack.c.b16 %v686_v38, %v685_v34  ;;  %324 = vst [vmem:[#allocation2 + $0x34] sm:$0x1] %v323_v36  ;;  %1650 = vmatpush.bf16.msra.mxu1 %v2721_v52 }
  0x51   : > { %327 = vst [vmem:[#allocation2 + $0x3c] sm:$0x1] %v326_v54  ;;  %1934 = vmatpush.bf16.msra.mxu2 %v2753_v47  ;;  %1983 = vmatpush.bf16.msra.mxu3 %v2761_v51  ;;  %v1022_v47 = vpack.c.b16 %v3302_v32, %v3300_v28  ;;  %v1359_v54 = vpack.c.b16 %v2998_v19, %v685_v34  ;;  %v2752_v19 = vld [vmem:[%s3717_s1 + $0x1a8] sm:$0xff] }
  0x52   : > { %v734_v4 = vshrl.u32 %v3270_v29, 16  ;;  %v736_v8 = vshll.u32 %v3270_v29, 16  ;;  %330 = vst [vmem:[#allocation2 + $0x44] sm:$0x1] %v329_v61  ;;  %2032 = vmatpush.bf16.msra.mxu0 %v2769_v60  ;;  %v3321_v61 = vpack.c.b16 %v3009_v27, %v3173_v53  ;;  %v2760_v34 = vld [vmem:[%s3717_s1 + $0x1e8] sm:$0xff] }
  0x54   : > { %v738_v10 = vrot.slane %v736_v8, 1  ;;  %v532_v16 = vld [vmem:[#allocation2 + $0x1c] sm:$0x1] }
  0x55   : > { %v533_v18 = vsel %vm2902_vm2, %v378_v55, %v532_v16  ;;  %v538_v25 = vld [vmem:[#allocation2 + $0x24] sm:$0x1]  ;;  %1935 = vmatpush.bf16.msra.mxu2 %v2752_v19  ;;  %1984 = vmatpush.bf16.msra.mxu3 %v2760_v34 }
  0x56   : > { %1269 = vmatmul.bf16.vlgmr.msrb.gmra.mxu1 %v1021_v45  ;;  %v739_v40 = vor.u32 %v738_v10, %v734_v4  ;;  %534 = vst [vmem:[#allocation2 + $0x1c] sm:$0x1] %v533_v18  ;;  %v539_v41 = vsel %vm2902_vm2, %v386_v57, %v538_v25  ;;  %v544_v36 = vld [vmem:[#allocation2 + $0x2c] sm:$0x1] }
  0x57   : > { %540 = vst [vmem:[#allocation2 + $0x24] sm:$0x1] %v539_v41  ;;  %v545_v31 = vsel %vm2902_vm2, %v394_v6, %v544_v36  ;;  %v550_v37 = vld [vmem:[#allocation2 + $0x34] sm:$0x1]  ;;  %v2768_v18 = vld [vmem:[%s3717_s1 + $0x228] sm:$0xff] }
  0x58   : > { %v861_v48 = vunpack.c.l.b16 %v739_v40  ;;  %546 = vst [vmem:[#allocation2 + $0x2c] sm:$0x1] %v545_v31  ;;  %v551_v38 = vsel %vm2902_vm2, %v402_v11, %v550_v37  ;;  %v556_v43 = vld [vmem:[#allocation2 + $0x3c] sm:$0x1]  ;;  %v332_v11 = vsel %vm2909_vm4, 0, %v331_v56  ;;  %2033 = vmatpush.bf16.msra.mxu0 %v2768_v18  ;;  %v434_v56 = vrot.slane %v2993_v12, 4 }
  0x59   : > { %552 = vst [vmem:[#allocation2 + $0x34] sm:$0x1] %v551_v38  ;;  %v557_v44 = vsel %vm2902_vm2, %v410_v42, %v556_v43  ;;  %v562_v45 = vld [vmem:[#allocation2 + $0x44] sm:$0x1] }
  0x5a   : > { %v1360_v51 = vpack.c.b16 %v863_v15, %v861_v48  ;;  %558 = vst [vmem:[#allocation2 + $0x3c] sm:$0x1] %v557_v44  ;;  %v563_v52 = vsel %vm2902_vm2, %v418_v46, %v562_v45  ;;  %v334_v15 = vld [vmem:[#allocation2 + $0x64] sm:$0x1]  ;;  %v2720_v46 = vld [vmem:[%s3717_s1 + $0xa8] sm:$0xff]  ;;  %v426_v45 = vrot.slane %v2987_v7, 4 }
  0x5b   : > { %564 = vst [vmem:[#allocation2 + $0x44] sm:$0x1] %v563_v52  ;;  %v335_v10 = vsel %vm2909_vm4, 0, %v334_v15  ;;  %1651 = vmatpush.bf16.msra.mxu1 %v2720_v46  ;;  %v2719_v46 = vld [vmem:[%s3717_s1 + $0xa0] sm:$0xff] }
  0x5c   : > { %1608 = vmatmul.bf16.vlgmr.msrb.gmra.mxu0 %v1360_v51  ;;  %333 = vst [vmem:[#allocation2 + $0x5c] sm:$0x1] %v332_v11 }
  0x5d   : > { %v620_v55 = vld [vmem:[#allocation2 + $0x1c] sm:$0x1]  ;;  %336 = vst [vmem:[#allocation2 + $0x64] sm:$0x1] %v335_v10 }
  0x5e   : > { %1318 = vmatmul.bf16.vlgmr.msrb.gmra.mxu2 %v1022_v47  ;;  %v622_v57 = vld [vmem:[#allocation2 + $0x24] sm:$0x1]  ;;  %v692_v60 = vunpack.c.l.b16 %v620_v55 }
  0x5f   : > { %v694_v62 = vunpack.c.l.b16 %v622_v57  ;;  %v624_v63 = vld [vmem:[#allocation2 + $0x2c] sm:$0x1]  ;;  %1652 = vmatpush.bf16.msra.mxu1 %v2719_v46  ;;  %v2750_v46 = vld [vmem:[%s3717_s1 + $0x198] sm:$0xff] }
  0x60   : > { %1559 = vmatmul.bf16.vlgmr.msrb.gmra.mxu3 %v1359_v54  ;;  %v720_v4 = vpack.c.b16 %v692_v60, %v3163_v49  ;;  %v626_v8 = vld [vmem:[#allocation2 + $0x34] sm:$0x1]  ;;  %v696_v6 = vunpack.c.l.b16 %v624_v63 }
  0x61   : > { %v721_v16 = vpack.c.b16 %v694_v62, %v3173_v53  ;;  %v698_v42 = vunpack.c.l.b16 %v626_v8  ;;  %v3359_v8 = vpack.c.b16 %v3163_v49, %v3000_v20  ;;  %v628_v19 = vld [vmem:[#allocation2 + $0x3c] sm:$0x1]  ;;  %v2751_v49 = vld [vmem:[%s3717_s1 + $0x1a0] sm:$0xff] }
  0x62   : > { %v755_v25 = vshrl.u32 %v720_v4, 16  ;;  %v757_v40 = vshll.u32 %v720_v4, 16  ;;  %v848_v41 = vrot.slane %v720_v4, 1  ;;  %v722_v38 = vpack.c.b16 %v696_v6, %v3009_v27  ;;  %1936 = vmatpush.bf16.msra.mxu2 %v2751_v49 }
  0x63   : > { %v762_v36 = vshrl.u32 %v721_v16, 16  ;;  %v764_v31 = vshll.u32 %v721_v16, 16  ;;  %v849_v37 = vrot.slane %v721_v16, 1  ;;  %v723_v44 = vpack.c.b16 %v698_v42, %v3012_v30  ;;  %v568_v60 = vld [vmem:[#allocation2 + $0x5c] sm:$0x1]  ;;  %v2759_v42 = vld [vmem:[%s3717_s1 + $0x1e0] sm:$0xff] }
  0x64   : > { %v759_v53 = vrot.slane %v757_v40, 1  ;;  %v868_v48 = vunpack.c.l.b16 %v848_v41  ;;  %v771_v57 = vshll.u32 %v722_v38, 16  ;;  %v569_v7 = vsel %vm2902_vm2, %v426_v45, %v568_v60  ;;  %v337_v16 = vld [vmem:[#allocation2 + $0x6c] sm:$0x1]  ;;  %v2767_v41 = vld [vmem:[%s3717_s1 + $0x220] sm:$0xff]  ;;  %1985 = vmatpush.bf16.msra.mxu3 %v2759_v42 }
  0x65   : > { %v766_v43 = vrot.slane %v764_v31, 1  ;;  %v3344_v51 = vunpack.c.l.b16 %v849_v37  ;;  %v778_v63 = vshll.u32 %v723_v44, 16  ;;  %570 = vst [vmem:[#allocation2 + $0x5c] sm:$0x1] %v569_v7  ;;  %v769_v6 = vshrl.u32 %v722_v38, 16  ;;  %2034 = vmatpush.bf16.msra.mxu0 %v2767_v41 }
  0x66   : > { %v760_v47 = vor.u32 %v759_v53, %v755_v25  ;;  %v3347_v52 = vpack.c.b16 %v868_v48, %v3302_v32  ;;  %v574_v32 = vld [vmem:[#allocation2 + $0x64] sm:$0x1]  ;;  %v773_v12 = vrot.slane %v771_v57, 1  ;;  %v776_v34 = vshrl.u32 %v723_v44, 16  ;;  %v340_v37 = vld [vmem:[#allocation2 + $0x74] sm:$0x1]  ;;  %1937 = vmatpush.bf16.msra.mxu2 %v2750_v46 }
  0x67   : > { %v767_v54 = vor.u32 %v766_v43, %v762_v36  ;;  %v1025_v27 = vpack.c.b16 %v3344_v51, %v868_v48  ;;  %v780_v59 = vrot.slane %v778_v63, 1  ;;  %v575_v11 = vsel %vm2902_vm2, %v434_v56, %v574_v32 }
  0x68   : > { %v867_v55 = vunpack.c.l.b16 %v760_v47  ;;  %v700_v10 = vunpack.c.l.b16 %v628_v19  ;;  %576 = vst [vmem:[#allocation2 + $0x64] sm:$0x1] %v575_v11  ;;  %v774_v20 = vor.u32 %v773_v12, %v769_v6  ;;  %v338_v18 = vsel %vm2909_vm4, 0, %v337_v16  ;;  %v3403_v6 = vld [vmem:[#allocation2 + $0x50] sm:$0xf] }
  0x69   : > { %v869_v62 = vunpack.c.l.b16 %v767_v54  ;;  %v3376_v25 = vor.u32 %v780_v59, %v776_v34  ;;  %v850_v36 = vrot.slane %v722_v38, 1  ;;  %v851_v31 = vrot.slane %v723_v44, 1  ;;  %339 = vst [vmem:[#allocation2 + $0x6c] sm:$0x1] %v338_v18  ;;  %v343_v16 = vld [vmem:[#allocation2 + $0x7c] sm:$0x1] }
  0x6a   : > { %v3353_v15 = vpack.c.b16 %v867_v55, %v865_v24  ;;  %v630_v24 = vld [vmem:[#allocation2 + $0x44] sm:$0x1]  ;;  %v3382_v53 = vpack.c.b16 %v700_v10, %v3190_v1  ;;  %v341_v48 = vsel %vm2909_vm4, 0, %v340_v37  ;;  %v871_v43 = vunpack.c.l.b16 %v774_v20  ;;  %v2758_v18 = vld [vmem:[%s3717_s1 + $0x1d8] sm:$0xff] }
  0x6b   : > { %v1024_v4 = vpack.c.b16 %v869_v62, %v867_v55  ;;  %v946_v40 = vunpack.c.l.b16 %v630_v24  ;;  %342 = vst [vmem:[#allocation2 + $0x74] sm:$0x1] %v341_v48  ;;  %v873_v45 = vunpack.c.l.b16 %v3376_v25  ;;  %v442_v38 = vrot.slane %v3128_v0, 4  ;;  %v346_v20 = vld [vmem:[#allocation2 + $0x84] sm:$0x1]  ;;  %v2718_v25 = vld [vmem:[%s3717_s1 + $0x98] sm:$0xff]  ;;  %1986 = vmatpush.bf16.msra.mxu3 %v2758_v18 }
  0x6c   : > { %1613 = vmatmul.bf16.gmra.mxu0 %v3353_v15  ;;  %v3389_v44 = vunpack.c.l.b16 %v850_v36  ;;  %v3391_v54 = vunpack.c.l.b16 %v851_v31  ;;  %v785_v55 = vshll.u32 %v3382_v53, 16  ;;  %v3394_v57 = vpack.c.b16 %v871_v43, %v869_v62  ;;  %v634_v62 = vld [vmem:[#allocation2 + $0x54] sm:$0x1]  ;;  %v636_v34 = vld [vmem:[#allocation2 + $0x5c] sm:$0x1]  ;;  %1653 = vmatpush.bf16.msra.mxu1 %v2718_v25 }
  0x6d   : > { %1274 = vmatmul.bf16.gmra.mxu1 %v1024_v4  ;;  %v949_v47 = vpack.c.b16 %v946_v40, %v3197_v9  ;;  %v450_v60 = vrot.slane %v3140_v26, 4  ;;  %v1027_v63 = vpack.c.b16 %v873_v45, %v871_v43  ;;  %v783_v0 = vshrl.u32 %v3382_v53, 16  ;;  %v2766_v37 = vld [vmem:[%s3717_s1 + $0x218] sm:$0xff]  ;;  %v349_v25 = vld [vmem:[#allocation2 + $0x8c] sm:$0x1] }
  0x6e   : > { %1323 = vmatmul.bf16.gmra.mxu2 %v1025_v27  ;;  %v1028_v7 = vpack.c.b16 %v3391_v54, %v3389_v44  ;;  %v787_v32 = vrot.slane %v785_v55, 1  ;;  %v701_v11 = vunpack.c.l.b16 %v3403_v6  ;;  %v702_v10 = vunpack.c.l.b16 %v634_v62  ;;  %2035 = vmatpush.bf16.msra.mxu0 %v2766_v37  ;;  %v2717_v37 = vld [vmem:[%s3717_s1 + $0x90] sm:$0xff]  ;;  %v2716_v6 = vld [vmem:[%s3717_s1 + $0x88] sm:$0xff] }
  0x6f   : > { %v954_v56 = vshll.u32 %v949_v47, 16  ;;  %v952_v26 = vshrl.u32 %v949_v47, 16  ;;  %v638_v24 = vld [vmem:[#allocation2 + $0x64] sm:$0x1]  ;;  %v704_v42 = vunpack.c.l.b16 %v636_v34  ;;  %v344_v40 = vsel %vm2909_vm4, 0, %v343_v16 }
  0x70   : > { %1564 = vmatmul.bf16.gmra.mxu3 %v3359_v8  ;;  %v580_v27 = vld [vmem:[#allocation2 + $0x6c] sm:$0x1]  ;;  %v788_v49 = vor.u32 %v787_v32, %v783_v0  ;;  %v347_v41 = vsel %vm2909_vm4, 0, %v346_v20  ;;  %v706_v31 = vunpack.c.l.b16 %v638_v24  ;;  %345 = vst [vmem:[#allocation2 + $0x7c] sm:$0x1] %v344_v40  ;;  %v852_v48 = vrot.slane %v3382_v53, 1  ;;  %1654 = vmatpush.bf16.msra.mxu1 %v2717_v37 }
  0x71   : > { %v581_v4 = vsel %vm2902_vm2, %v442_v38, %v580_v27  ;;  %v956_v19 = vrot.slane %v954_v56, 1  ;;  %v965_v43 = vrot.slane %v949_v47, 1  ;;  %348 = vst [vmem:[#allocation2 + $0x84] sm:$0x1] %v347_v41  ;;  %v3430_v38 = vpack.c.b16 %v702_v10, %v701_v11  ;;  %v352_v40 = vld [vmem:[#allocation2 + $0x94] sm:$0x1] }
  0x72   : > { %582 = vst [vmem:[#allocation2 + $0x6c] sm:$0x1] %v581_v4  ;;  %v586_v12 = vld [vmem:[#allocation2 + $0x74] sm:$0x1]  ;;  %v875_v55 = vunpack.c.l.b16 %v788_v49  ;;  %v727_v27 = vpack.c.b16 %v706_v31, %v3084_v23  ;;  %v3436_v53 = vunpack.c.l.b16 %v852_v48  ;;  %v3455_v24 = vpack.c.b16 %v3190_v1, %v3012_v30 }
  0x73   : > { %v587_v59 = vsel %vm2902_vm2, %v450_v60, %v586_v12  ;;  %v3422_v36 = vor.u32 %v956_v19, %v952_v26  ;;  %v726_v60 = vpack.c.b16 %v704_v42, %v3077_v17  ;;  %v3438_v47 = vunpack.c.l.b16 %v965_v43  ;;  %v2749_v30 = vld [vmem:[%s3717_s1 + $0x190] sm:$0xff] }
  0x74   : > { %588 = vst [vmem:[#allocation2 + $0x74] sm:$0x1] %v587_v59  ;;  %v792_v4 = vshll.u32 %v3430_v38, 16  ;;  %v3442_v0 = vpack.c.b16 %v875_v55, %v873_v45  ;;  %v804_v20 = vshrl.u32 %v727_v27, 16  ;;  %v2757_v1 = vld [vmem:[%s3717_s1 + $0x1d0] sm:$0xff]  ;;  %v350_v48 = vsel %vm2909_vm4, 0, %v349_v25  ;;  %1938 = vmatpush.bf16.msra.mxu2 %v2749_v30  ;;  %1655 = vmatpush.bf16.msra.mxu1 %v2716_v6 }
  0x75   : > { %v967_v56 = vunpack.c.l.b16 %v3422_v36  ;;  %v799_v32 = vshll.u32 %v726_v60, 16  ;;  %v1031_v34 = vpack.c.b16 %v3438_v47, %v3436_v53  ;;  %v797_v10 = vshrl.u32 %v726_v60, 16  ;;  %351 = vst [vmem:[#allocation2 + $0x8c] sm:$0x1] %v350_v48  ;;  %1987 = vmatpush.bf16.msra.mxu3 %v2757_v1  ;;  %v2764_v48 = vld [vmem:[%s3717_s1 + $0x208] sm:$0xff] }
  0x76   : > { %v794_v59 = vrot.slane %v792_v4, 1  ;;  %v353_v43 = vsel %vm2909_vm4, 0, %v352_v40  ;;  %v854_v4 = vrot.slane %v726_v60, 1  ;;  %v482_v60 = vrot.slane %v3165_v50, 4 }
  0x77   : > { %v592_v62 = vld [vmem:[#allocation2 + $0x7c] sm:$0x1]  ;;  %v1030_v12 = vpack.c.b16 %v967_v56, %v875_v55  ;;  %v801_v16 = vrot.slane %v799_v32, 1  ;;  %v855_v32 = vrot.slane %v727_v27, 1  ;;  %354 = vst [vmem:[#allocation2 + $0x94] sm:$0x1] %v353_v43  ;;  %v1371_v50 = vpack.c.b16 %v3077_v17, %v701_v11 }
  0x78   : > { %v598_v19 = vld [vmem:[#allocation2 + $0x84] sm:$0x1]  ;;  %v2756_v17 = vld [vmem:[%s3717_s1 + $0x1c8] sm:$0xff]  ;;  %1939 = vmatpush.bf16.msra.mxu2 %v2748_v2 }
  0x79   : > { %v640_v42 = vld [vmem:[#allocation2 + $0x6c] sm:$0x1]  ;;  %v802_v41 = vor.u32 %v801_v16, %v797_v10  ;;  %1988 = vmatpush.bf16.msra.mxu3 %v2756_v17 }
  0x7a   : > { %v708_v31 = vunpack.c.l.b16 %v640_v42 }
  0x7b   : > { %v642_v46 = vld [vmem:[#allocation2 + $0x74] sm:$0x1] }
  0x7c   : > { %1618 = vmatmul.bf16.gmra.mxu0 %v3394_v57  ;;  %v728_v5 = vpack.c.b16 %v708_v31, %v3239_v58 }
  0x7d   : > { %1279 = vmatmul.bf16.gmra.mxu1 %v1027_v63  ;;  %v458_v63 = vrot.slane %v2996_v14, 4  ;;  %v806_v14 = vshll.u32 %v727_v27, 16 }
  0x7e   : > { %1328 = vmatmul.bf16.gmra.mxu2 %v1028_v7  ;;  %v466_v7 = vrot.slane %v3003_v22, 4  ;;  %v790_v22 = vshrl.u32 %v3430_v38, 16  ;;  %v856_v43 = vrot.slane %v728_v5, 1 }
  0x7f   : > { %v593_v26 = vsel %vm2902_vm2, %v458_v63, %v592_v62  ;;  %v808_v49 = vrot.slane %v806_v14, 1  ;;  %v710_v63 = vunpack.c.l.b16 %v642_v46  ;;  %v879_v62 = vunpack.c.l.b16 %v802_v41 }
  0x80   : > { %1569 = vmatmul.bf16.gmra.mxu3 %v3321_v61  ;;  %594 = vst [vmem:[#allocation2 + $0x7c] sm:$0x1] %v593_v26  ;;  %v599_v45 = vsel %vm2902_vm2, %v466_v7, %v598_v19  ;;  %v795_v18 = vor.u32 %v794_v59, %v790_v22  ;;  %v2765_v7 = vld [vmem:[%s3717_s1 + $0x210] sm:$0xff]  ;;  %v474_v14 = vrot.slane %v3149_v35, 4  ;;  %v3483_v22 = vunpack.c.l.b16 %v855_v32 }
  0x81   : > { %600 = vst [vmem:[#allocation2 + $0x84] sm:$0x1] %v599_v45  ;;  %v3472_v55 = vor.u32 %v808_v49, %v804_v20  ;;  %2036 = vmatpush.bf16.msra.mxu0 %v2765_v7  ;;  %v729_v19 = vpack.c.b16 %v710_v63, %v3245_v3  ;;  %v813_v59 = vshll.u32 %v728_v5, 16  ;;  %v604_v45 = vld [vmem:[#allocation2 + $0x8c] sm:$0x1]  ;;  %v811_v46 = vshrl.u32 %v728_v5, 16 }
  0x82   : > { %v605_v20 = vsel %vm2902_vm2, %v474_v14, %v604_v45  ;;  %v610_v49 = vld [vmem:[#allocation2 + $0x94] sm:$0x1] }
  0x83   : > { %v881_v26 = vunpack.c.l.b16 %v3472_v55  ;;  %v820_v16 = vshll.u32 %v729_v19, 16  ;;  %606 = vst [vmem:[#allocation2 + $0x8c] sm:$0x1] %v605_v20  ;;  %v611_v42 = vsel %vm2902_vm2, %v482_v60, %v610_v49  ;;  %v818_v25 = vshrl.u32 %v729_v19, 16 }
  0x84   : > { %612 = vst [vmem:[#allocation2 + $0x94] sm:$0x1] %v611_v42  ;;  %v857_v55 = vrot.slane %v729_v19, 1 }
  0x85   : > { %v1033_v10 = vpack.c.b16 %v881_v26, %v879_v62  ;;  %v822_v40 = vrot.slane %v820_v16, 1  ;;  %2037 = vmatpush.bf16.msra.mxu0 %v2764_v48 }
  0x87   : > { %v644_v41 = vld [vmem:[#allocation2 + $0x7c] sm:$0x1]  ;;  %v823_v11 = vor.u32 %v822_v40, %v818_v25 }
  0x88   : > { %v646_v31 = vld [vmem:[#allocation2 + $0x84] sm:$0x1]  ;;  %v712_v1 = vunpack.c.l.b16 %v644_v41 }
  0x89   : > { %v714_v37 = vunpack.c.l.b16 %v646_v31  ;;  %v2715_v31 = vld [vmem:[%s3717_s1 + $0x80] sm:$0xff] }
  0x8a   : > { %v730_v7 = vpack.c.b16 %v712_v1, %v3093_v33  ;;  %v648_v49 = vld [vmem:[#allocation2 + $0x8c] sm:$0x1]  ;;  %1656 = vmatpush.bf16.msra.mxu1 %v2715_v31 }
  0x8b   : > { %v731_v32 = vpack.c.b16 %v714_v37, %v3100_v39 }
  0x8c   : > { %1623 = vmatmul.bf16.gmra.mxu0 %v3442_v0  ;;  %v827_v60 = vshll.u32 %v730_v7, 16  ;;  %v825_v45 = vshrl.u32 %v730_v7, 16  ;;  %v858_v40 = vrot.slane %v730_v7, 1 }
  0x8d   : > { %1284 = vmatmul.bf16.gmra.mxu1 %v1030_v12  ;;  %v877_v12 = vunpack.c.l.b16 %v795_v18  ;;  %v815_v18 = vrot.slane %v813_v59, 1  ;;  %v834_v5 = vshll.u32 %v731_v32, 16  ;;  %v3519_v59 = vpack.c.b16 %v3239_v58, %v3084_v23  ;;  %v2747_v23 = vld [vmem:[%s3717_s1 + $0x180] sm:$0xff] }
  0x8e   : > { %1333 = vmatmul.bf16.gmra.mxu2 %v1031_v34  ;;  %v3481_v34 = vunpack.c.l.b16 %v854_v4  ;;  %v885_v4 = vunpack.c.l.b16 %v823_v11  ;;  %v832_v20 = vshrl.u32 %v731_v32, 16  ;;  %v2755_v58 = vld [vmem:[%s3717_s1 + $0x1c0] sm:$0xff]  ;;  %v859_v41 = vrot.slane %v731_v32, 1 }
  0x8f   : > { %v1372_v27 = vpack.c.b16 %v879_v62, %v877_v12  ;;  %v816_v30 = vor.u32 %v815_v18, %v811_v46  ;;  %v3509_v62 = vunpack.c.l.b16 %v856_v43  ;;  %v3511_v12 = vunpack.c.l.b16 %v857_v55  ;;  %1940 = vmatpush.bf16.msra.mxu2 %v2747_v23  ;;  %1989 = vmatpush.bf16.msra.mxu3 %v2755_v58 }
  0x90   : > { %1574 = vmatmul.bf16.gmra.mxu3 %v3455_v24  ;;  %v1034_v35 = vpack.c.b16 %v3483_v22, %v3481_v34  ;;  %v3539_v11 = vunpack.c.l.b16 %v858_v40  ;;  %v3541_v37 = vunpack.c.l.b16 %v859_v41 }
  0x91   : > { %v883_v63 = vunpack.c.l.b16 %v816_v30  ;;  %v1037_v19 = vpack.c.b16 %v3511_v12, %v3509_v62  ;;  %v2763_v30 = vld [vmem:[%s3717_s1 + $0x200] sm:$0xff] }
  0x92   : > { %2038 = vmatpush.bf16.msra.mxu0 %v2763_v30  ;;  %v1040_v32 = vpack.c.b16 %v3541_v37, %v3539_v11 }
  0x93   : > { %v3513_v14 = vpack.c.b16 %v883_v63, %v881_v26  ;;  %v836_v26 = vrot.slane %v834_v5, 1 }
  0x95   : > { %v837_v18 = vor.u32 %v836_v26, %v832_v20 }
  0x97   : > { %v889_v17 = vunpack.c.l.b16 %v837_v18 }
  0x9c   : > { %1628 = vmatmul.bf16.gmra.mxu0 %v1372_v27  ;;  %v1036_v27 = vpack.c.b16 %v885_v4, %v883_v63 }
  0x9d   : > { %1289 = vmatmul.bf16.gmra.mxu1 %v1033_v10  ;;  %v829_v10 = vrot.slane %v827_v60, 1 }
  0x9e   : > { %1338 = vmatmul.bf16.gmra.mxu2 %v1034_v35  ;;  %v650_v35 = vld [vmem:[#allocation2 + $0x94] sm:$0x1] }
  0x9f   : > { %v830_v42 = vor.u32 %v829_v10, %v825_v45  ;;  %v948_v25 = vunpack.c.l.b16 %v650_v35 }
  0xa0   : > { %1579 = vmatmul.bf16.gmra.mxu3 %v1371_v50  ;;  %v716_v50 = vunpack.c.l.b16 %v648_v49 }
  0xa1   : > { %v887_v1 = vunpack.c.l.b16 %v830_v42  ;;  %v950_v6 = vpack.c.b16 %v948_v25, %v3254_v21 }
  0xa2   : > { %v732_v2 = vpack.c.b16 %v716_v50, %v3247_v13 }
  0xa3   : > { %v3545_v43 = vpack.c.b16 %v887_v1, %v885_v4  ;;  %v1039_v63 = vpack.c.b16 %v889_v17, %v887_v1  ;;  %v961_v7 = vshll.u32 %v950_v6, 16  ;;  %v959_v4 = vshrl.u32 %v950_v6, 16 }
  0xa4   : > { %v841_v55 = vshll.u32 %v732_v2, 16  ;;  %v839_v5 = vshrl.u32 %v732_v2, 16 }
  0xa5   : > { %v963_v10 = vrot.slane %v961_v7, 1 }
  0xa7   : > { %v3561_v35 = vor.u32 %v963_v10, %v959_v4 }
  0xa8   : > { %v3522_v16 = vpop.f32.mrf.mxu1  ;;  %v1221_v46 = vpop.f32.mrf.mxu0 }
  0xa9   : > { %v3721_v23 = vunpack.c.l.b16 %v3561_v35 }
  0xac   : > { %1633 = vmatmul.bf16.gmra.mxu0 %v3513_v14 }
  0xad   : > { %1294 = vmatmul.bf16.gmra.mxu1 %v1036_v27  ;;  %v3551_v27 = vpack.c.b16 %v3093_v33, %v3245_v3  ;;  %v860_v33 = vrot.slane %v732_v2, 1  ;;  %v966_v3 = vrot.slane %v950_v6, 1  ;;  %v3582_v2 = vpack.c.b16 %v3247_v13, %v3100_v39 }
  0xae   : > { %1343 = vmatmul.bf16.gmra.mxu2 %v1037_v19  ;;  %v843_v19 = vrot.slane %v841_v55, 1 }
  0xaf   : > { %v3564_v58 = vunpack.c.l.b16 %v860_v33  ;;  %v3566_v18 = vunpack.c.l.b16 %v966_v3 }
  0xb0   : > { %1584 = vmatmul.bf16.gmra.mxu3 %v3519_v59  ;;  %v3543_v48 = vpop.f32.mrf.mxu1  ;;  %v1223_v60 = vpop.f32.mrf.mxu0  ;;  %v844_v26 = vor.u32 %v843_v19, %v839_v5 }
  0xb1   : > { %v1043_v1 = vpack.c.b16 %v3566_v18, %v3564_v58 }
  0xb2   : > { %v891_v42 = vunpack.c.l.b16 %v844_v26 }
  0xb4   : > { %v3570_v40 = vpack.c.b16 %v891_v42, %v889_v17  ;;  %v1042_v31 = vpack.c.b16 %v3721_v23, %v891_v42 }
  0xb9   : > { %v3554_v45 = vpop.f32.mrf.mxu2 }
  0xba   : > { %v3556_v20 = vpop.f32.mrf.mxu3 }
  0xbc   : > { %1638 = vmatmul.bf16.gmra.mxu0 %v3545_v43 }
  0xbd   : > { %1299 = vmatmul.bf16.gmra.mxu1 %v1039_v63  ;;  %v845_v63 = vrot.slane %v3270_v29, 1 }
  0xbe   : > { %1348 = vmatmul.bf16.gmra.mxu2 %v1040_v32 }
  0xbf   : > { %v1226_v50 = vpop.f32.mrf.mxu0  ;;  %v862_v5 = vunpack.c.l.b16 %v845_v63 }
  0xc0   : > { %1589 = vmatmul.bf16.gmra.mxu3 %v3551_v27 }
  0xc1   : > { %v3568_v25 = vpop.f32.mrf.mxu2  ;;  %v1361_v13 = vpack.c.b16 %v3300_v28, %v862_v5  ;;  %v1367_v28 = vpack.c.b16 %v3389_v44, %v3344_v51  ;;  %v632_v51 = vld [vmem:[#allocation2 + $0x4c] sm:$0x1] }
  0xc2   : > { %v3572_v41 = vpop.f32.mrf.mxu3 }
  0xc3   : > { %v3559_v49 = vpop.f32.mrf.mxu1 }
  0xc7   : > { %v1228_v17 = vpop.f32.mrf.mxu0 }
  0xcb   : > { %v3576_v30 = vpop.f32.mrf.mxu1 }
  0xcc   : > { %1643 = vmatmul.bf16.gmra.mxu0 %v3570_v40 }
  0xcd   : > { %1304 = vmatmul.bf16.gmra.mxu1 %v1042_v31 }
  0xce   : > { %1353 = vmatmul.bf16.gmra.mxu2 %v1043_v1 }
  0xd0   : > { %1594 = vmatmul.bf16.gmra.mxu3 %v3582_v2 }
  0xd1   : > { %v3586_v6 = vpop.f32.mrf.mxu2 }
  0xd3   : > { %v1270_v55 = vpop.f32.mrf.mxu1  ;;  %v3589_v32 = vpop.f32.mrf.mxu3 }
  0xd4   : > { %v1271_v7 = vadd.f32 %v1270_v55, %v1221_v46 }
  0xd9   : > { %v3591_v19 = vpop.f32.mrf.mxu2  ;;  %v1609_v39 = vpop.f32.mrf.mxu0 }
  0xdb   : > { %v3594_v4 = vpop.f32.mrf.mxu3  ;;  %v1272_v10 = vpop.f32.mrf.mxu1 }
  0xdc   : > { %2039 = vmatmul.bf16.vlgmr.msra.gmra.mxu0 %v3347_v52  ;;  %v1273_v31 = vadd.f32 %v1272_v10, %v1223_v60 }
  0xdd   : > { %1657 = vmatmul.bf16.vlgmr.msra.gmra.mxu1 %v1361_v13 }
  0xde   : > { %1941 = vmatmul.bf16.vlgmr.msra.gmra.mxu2 %v3359_v8 }
  0xe0   : > { %1990 = vmatmul.bf16.vlgmr.msra.gmra.mxu3 %v3353_v15 }
  0xe1   : > { %v1319_v29 = vpop.f32.mrf.mxu2  ;;  %v1611_v46 = vpop.f32.mrf.mxu0 }
  0xe2   : > { %v1320_v26 = vadd.f32 %v1319_v29, %v1271_v7 }
  0xe3   : > { %v1560_v33 = vpop.f32.mrf.mxu3 }
  0xe4   : > { %v1561_v3 = vadd.f32 %v1560_v33, %v1320_v26 }
  0xe6   : > { %v3599_v42 = vadd.f32 %v1609_v39, %v1561_v3  ;;  %v631_v39 = vld [vmem:[#allocation2 + $0x48] sm:$0xf]  ;;  %v1703_v3 = vunpack.c.l.b16 %v632_v51 }
  0xe9   : > { %v1321_v1 = vpop.f32.mrf.mxu2  ;;  %v1614_v55 = vpop.f32.mrf.mxu0 }
  0xea   : > { %v1322_v63 = vadd.f32 %v1321_v1, %v1273_v31  ;;  %v1275_v5 = vpop.f32.mrf.mxu1 }
  0xeb   : > { %v1562_v13 = vpop.f32.mrf.mxu3  ;;  %v1276_v8 = vadd.f32 %v1275_v5, %v1226_v50  ;;  %v1702_v50 = vunpack.c.l.b16 %v631_v39 }
  0xec   : > { %v1563_v23 = vadd.f32 %v1562_v13, %v1322_v63  ;;  %2044 = vmatmul.bf16.gmra.mxu0 %v1367_v28 }
  0xed   : > { %1662 = vmatmul.bf16.gmra.mxu1 %v3347_v52  ;;  %v1706_v52 = vpack.c.b16 %v1703_v3, %v1702_v50 }
  0xee   : > { %1946 = vmatmul.bf16.gmra.mxu2 %v3321_v61  ;;  %v3605_v15 = vadd.f32 %v1611_v46, %v1563_v23  ;;  %v1370_v61 = vpack.c.b16 %v3436_v53, %v3391_v54 }
  0xef   : > { %v1711_v13 = vshll.u32 %v1706_v52, 16  ;;  %v1722_v53 = vrot.slane %v1706_v52, 1 }
  0xf0   : > { %1995 = vmatmul.bf16.gmra.mxu3 %v3394_v57 }
  0xf1   : > { %v1324_v60 = vpop.f32.mrf.mxu2  ;;  %v1616_v7 = vpop.f32.mrf.mxu0  ;;  %v1713_v54 = vrot.slane %v1711_v13, 1 }
  0xf2   : > { %v1325_v44 = vadd.f32 %v1324_v60, %v1276_v8  ;;  %v1277_v10 = vpop.f32.mrf.mxu1  ;;  %v1709_v8 = vshrl.u32 %v1706_v52, 16  ;;  %v1777_v52 = vpack.c.b16 %v1702_v50, %v3197_v9 }
  0xf3   : > { %v1565_v29 = vpop.f32.mrf.mxu3  ;;  %v1278_v26 = vadd.f32 %v1277_v10, %v1228_v17 }
  0xf4   : > { %v1566_v33 = vadd.f32 %v1565_v29, %v1325_v44 }
  0xf6   : > { %v3608_v31 = vadd.f32 %v1614_v55, %v1566_v33  ;;  %v1725_v33 = vunpack.c.l.b16 %v1722_v53 }
  0xf9   : > { %v1326_v23 = vpop.f32.mrf.mxu2  ;;  %v1619_v46 = vpop.f32.mrf.mxu0 }
  0xfa   : > { %v1327_v57 = vadd.f32 %v1326_v23, %v1278_v26  ;;  %v1280_v1 = vpop.f32.mrf.mxu1  ;;  %v1714_v26 = vor.u32 %v1713_v54, %v1709_v8 }
  0xfb   : > { %v1567_v63 = vpop.f32.mrf.mxu3  ;;  %v1281_v55 = vadd.f32 %v1280_v1, %v3522_v16  ;;  %v1779_v16 = vpack.c.b16 %v1725_v33, %v3438_v47 }
  0xfc   : > { %v1568_v5 = vadd.f32 %v1567_v63, %v1327_v57  ;;  %2049 = vmatmul.bf16.gmra.mxu0 %v1370_v61 }
  0xfd   : > { %1667 = vmatmul.bf16.gmra.mxu1 %v1367_v28 }
  0xfe   : > { %1951 = vmatmul.bf16.gmra.mxu2 %v3455_v24  ;;  %v3613_v17 = vadd.f32 %v1616_v7, %v1568_v5  ;;  %v1724_v7 = vunpack.c.l.b16 %v1714_v26 }
 0x100   : > { %2000 = vmatmul.bf16.gmra.mxu3 %v3442_v0  ;;  %v1778_v5 = vpack.c.b16 %v1724_v7, %v967_v56  ;;  %v1376_v56 = vpack.c.b16 %v3509_v62, %v3483_v22 }
 0x101   : > { %v1329_v60 = vpop.f32.mrf.mxu2  ;;  %v1621_v39 = vpop.f32.mrf.mxu0 }
 0x102   : > { %v1330_v51 = vadd.f32 %v1329_v60, %v1281_v55  ;;  %v1282_v44 = vpop.f32.mrf.mxu1  ;;  %v853_v55 = vrot.slane %v3430_v38, 1 }
 0x103   : > { %v1570_v10 = vpop.f32.mrf.mxu3  ;;  %v1283_v24 = vadd.f32 %v1282_v44, %v3543_v48 }
 0x104   : > { %v1571_v29 = vadd.f32 %v1570_v10, %v1330_v51  ;;  %v878_v53 = vunpack.c.l.b16 %v853_v55 }
 0x106   : > { %v3617_v28 = vadd.f32 %v1619_v46, %v1571_v29 }
 0x109   : > { %v1331_v3 = vpop.f32.mrf.mxu2  ;;  %v1624_v0 = vpop.f32.mrf.mxu0 }
 0x10a   : > { %v1332_v23 = vadd.f32 %v1331_v3, %v1283_v24  ;;  %v1285_v57 = vpop.f32.mrf.mxu1  ;;  %v1379_v3 = vpack.c.b16 %v3539_v11, %v3511_v12  ;;  %v652_v12 = vld [vmem:[#allocation2 + $0x9c] sm:$0x1] }
 0x10b   : > { %v1572_v1 = vpop.f32.mrf.mxu3  ;;  %v1286_v48 = vadd.f32 %v1285_v57, %v3559_v49  ;;  %v1373_v49 = vpack.c.b16 %v3481_v34, %v878_v53 }
 0x10c   : > { %v1573_v63 = vadd.f32 %v1572_v1, %v1332_v23  ;;  %2054 = vmatmul.bf16.gmra.mxu0 %v1779_v16 }
 0x10d   : > { %1672 = vmatmul.bf16.gmra.mxu1 %v1370_v61 }
 0x10e   : > { %1956 = vmatmul.bf16.gmra.mxu2 %v1777_v52  ;;  %v3624_v46 = vadd.f32 %v1621_v39, %v1573_v63 }
 0x110   : > { %2005 = vmatmul.bf16.gmra.mxu3 %v1778_v5  ;;  %v651_v5 = vld [vmem:[#allocation2 + $0x98] sm:$0xf] }
 0x111   : > { %v1334_v47 = vpop.f32.mrf.mxu2  ;;  %v1626_v13 = vpop.f32.mrf.mxu0  ;;  %v1704_v55 = vunpack.c.l.b16 %v651_v5 }
 0x112   : > { %v1335_v8 = vadd.f32 %v1334_v47, %v1286_v48  ;;  %v1287_v54 = vpop.f32.mrf.mxu1 }
 0x113   : > { %v1575_v9 = vpop.f32.mrf.mxu3  ;;  %v1288_v36 = vadd.f32 %v1287_v54, %v3576_v30 }
 0x114   : > { %v1576_v50 = vadd.f32 %v1575_v9, %v1335_v8  ;;  %v1705_v8 = vunpack.c.l.b16 %v652_v12  ;;  %v1382_v9 = vpack.c.b16 %v3564_v58, %v3541_v37 }
 0x116   : > { %v3628_v60 = vadd.f32 %v1624_v0, %v1576_v50 }
 0x119   : > { %v1336_v61 = vpop.f32.mrf.mxu2  ;;  %v1629_v39 = vpop.f32.mrf.mxu0 }
 0x11a   : > { %v1337_v51 = vadd.f32 %v1336_v61, %v1288_v36  ;;  %v1290_v44 = vpop.f32.mrf.mxu1 }
 0x11b   : > { %v1577_v10 = vpop.f32.mrf.mxu3  ;;  %v1291_v26 = vadd.f32 %v1290_v44, %v3554_v45 }
 0x11c   : > { %v1578_v38 = vadd.f32 %v1577_v10, %v1337_v51  ;;  %2059 = vmatmul.bf16.gmra.mxu0 %v1376_v56 }
 0x11d   : > { %1677 = vmatmul.bf16.gmra.mxu1 %v1373_v49 }
 0x11e   : > { %1961 = vmatmul.bf16.gmra.mxu2 %v3519_v59  ;;  %v3635_v29 = vadd.f32 %v1626_v13, %v1578_v38 }
 0x120   : > { %2010 = vmatmul.bf16.gmra.mxu3 %v3513_v14 }
 0x121   : > { %v1339_v30 = vpop.f32.mrf.mxu2  ;;  %v1631_v22 = vpop.f32.mrf.mxu0 }
 0x122   : > { %v1340_v62 = vadd.f32 %v1339_v30, %v1291_v26  ;;  %v1292_v33 = vpop.f32.mrf.mxu1 }
 0x123   : > { %v1580_v24 = vpop.f32.mrf.mxu3  ;;  %v1293_v16 = vadd.f32 %v1292_v33, %v3568_v25 }
 0x124   : > { %v1581_v34 = vadd.f32 %v1580_v24, %v1340_v62 }
 0x126   : > { %v3639_v7 = vadd.f32 %v1629_v39, %v1581_v34 }
 0x129   : > { %v1341_v59 = vpop.f32.mrf.mxu2  ;;  %v1634_v0 = vpop.f32.mrf.mxu0 }
 0x12a   : > { %v1342_v23 = vadd.f32 %v1341_v59, %v1293_v16  ;;  %v1295_v57 = vpop.f32.mrf.mxu1 }
 0x12b   : > { %v1582_v45 = vpop.f32.mrf.mxu3  ;;  %v1296_v1 = vadd.f32 %v1295_v57, %v3586_v6  ;;  %v1707_v6 = vpack.c.b16 %v1705_v8, %v1704_v55 }
 0x12c   : > { %v1583_v52 = vadd.f32 %v1582_v45, %v1342_v23  ;;  %2064 = vmatmul.bf16.gmra.mxu0 %v1379_v3  ;;  %v3728_v45 = vunpack.c.l.b16 %v3561_v35 }
 0x12d   : > { %1682 = vmatmul.bf16.gmra.mxu1 %v1376_v56  ;;  %v1718_v39 = vshll.u32 %v1707_v6, 16  ;;  %v1723_v58 = vrot.slane %v1707_v6, 1 }
 0x12e   : > { %1966 = vmatmul.bf16.gmra.mxu2 %v3551_v27  ;;  %v3645_v14 = vadd.f32 %v1631_v22, %v1583_v52 }
 0x12f   : > { %v1720_v37 = vrot.slane %v1718_v39, 1  ;;  %v1727_v33 = vunpack.c.l.b16 %v1723_v58 }
 0x130   : > { %2015 = vmatmul.bf16.gmra.mxu3 %v3545_v43 }
 0x131   : > { %v1344_v25 = vpop.f32.mrf.mxu2  ;;  %v1636_v63 = vpop.f32.mrf.mxu0 }
 0x132   : > { %v1345_v11 = vadd.f32 %v1344_v25, %v1296_v1  ;;  %v1297_v48 = vpop.f32.mrf.mxu1 }
 0x133   : > { %v1585_v47 = vpop.f32.mrf.mxu3  ;;  %v1298_v27 = vadd.f32 %v1297_v48, %v3591_v19  ;;  %v1716_v19 = vshrl.u32 %v1707_v6, 16 }
 0x134   : > { %v1586_v13 = vadd.f32 %v1585_v47, %v1345_v11 }
 0x135   : > { %v1721_v62 = vor.u32 %v1720_v37, %v1716_v19 }
 0x136   : > { %v3649_v54 = vadd.f32 %v1634_v0, %v1586_v13  ;;  %v1780_v0 = vpack.c.b16 %v1704_v55, %v3254_v21 }
 0x137   : > { %v1726_v34 = vunpack.c.l.b16 %v1721_v62 }
 0x139   : > { %v1346_v50 = vpop.f32.mrf.mxu2  ;;  %v1639_v43 = vpop.f32.mrf.mxu0  ;;  %v1781_v52 = vpack.c.b16 %v1726_v34, %v3728_v45 }
 0x13a   : > { %v1347_v53 = vadd.f32 %v1346_v50, %v1298_v27  ;;  %v1300_v36 = vpop.f32.mrf.mxu1 }
 0x13b   : > { %v1587_v56 = vpop.f32.mrf.mxu3  ;;  %v1301_v51 = vadd.f32 %v1300_v36, %v3556_v20  ;;  %v1782_v20 = vpack.c.b16 %v1727_v33, %v3566_v18 }
 0x13c   : > { %v1588_v61 = vadd.f32 %v1587_v56, %v1347_v53  ;;  %2069 = vmatmul.bf16.gmra.mxu0 %v1382_v9 }
 0x13d   : > { %1687 = vmatmul.bf16.gmra.mxu1 %v1379_v3 }
 0x13e   : > { %1971 = vmatmul.bf16.gmra.mxu2 %v3582_v2  ;;  %v3655_v49 = vadd.f32 %v1636_v63, %v1588_v61 }
 0x140   : > { %2020 = vmatmul.bf16.gmra.mxu3 %v3570_v40 }
 0x141   : > { %v1349_v44 = vpop.f32.mrf.mxu2  ;;  %v1641_v10 = vpop.f32.mrf.mxu0 }
 0x142   : > { %v1350_v38 = vadd.f32 %v1349_v44, %v1301_v51  ;;  %v1302_v26 = vpop.f32.mrf.mxu1 }
 0x143   : > { %v1590_v30 = vpop.f32.mrf.mxu3  ;;  %v1303_v2 = vadd.f32 %v1302_v26, %v3572_v41 }
 0x144   : > { %v1591_v22 = vadd.f32 %v1590_v30, %v1350_v38 }
 0x146   : > { %v3659_v24 = vadd.f32 %v1639_v43, %v1591_v22 }
 0x149   : > { %v1351_v16 = vpop.f32.mrf.mxu2  ;;  %v1644_v40 = vpop.f32.mrf.mxu0 }
 0x14a   : > { %v1352_v3 = vadd.f32 %v1351_v16, %v1303_v2  ;;  %v1305_v59 = vpop.f32.mrf.mxu1 }
 0x14b   : > { %v1592_v23 = vpop.f32.mrf.mxu3  ;;  %v1306_v41 = vadd.f32 %v1305_v59, %v3589_v32 }
 0x14c   : > { %v1593_v57 = vadd.f32 %v1592_v23, %v1352_v3  ;;  %2074 = vmatmul.bf16.gmra.mxu0 %v1782_v20 }
 0x14d   : > { %1692 = vmatmul.bf16.gmra.mxu1 %v1382_v9 }
 0x14e   : > { %1976 = vmatmul.bf16.gmra.mxu2 %v1780_v0  ;;  %v3666_v1 = vadd.f32 %v1641_v10, %v1593_v57 }
 0x150   : > { %2025 = vmatmul.bf16.gmra.mxu3 %v1781_v52 }
 0x151   : > { %v1354_v18 = vpop.f32.mrf.mxu2  ;;  %v1646_v25 = vpop.f32.mrf.mxu0 }
 0x152   : > { %v1355_v63 = vadd.f32 %v1354_v18, %v1306_v41  ;;  %v1307_v5 = vpop.f32.mrf.mxu1 }
 0x153   : > { %v1595_v12 = vpop.f32.mrf.mxu3  ;;  %v1308_v48 = vadd.f32 %v1307_v5, %v3594_v4 }
 0x154   : > { %v1596_v11 = vadd.f32 %v1595_v12, %v1355_v63 }
 0x156   : > { %v3669_v21 = vadd.f32 %v1644_v40, %v1596_v11 }
 0x159   : > { %v1356_v35 = vpop.f32.mrf.mxu2  ;;  %v2040_v47 = vpop.f32.mrf.mxu0 }
 0x15a   : > { %v1357_v13 = vadd.f32 %v1356_v35, %v1308_v48  ;;  %v1658_v55 = vpop.f32.mrf.mxu1 }
 0x15b   : > { %v1597_v8 = vpop.f32.mrf.mxu3  ;;  %v1659_v4 = vadd.f32 %v1658_v55, %v3599_v42 }
 0x15c   : > { %v1598_v27 = vadd.f32 %v1597_v8, %v1357_v13 }
 0x15e   : > { %v3672_v9 = vadd.f32 %v1646_v25, %v1598_v27 }
 0x161   : > { %v1942_v32 = vpop.f32.mrf.mxu2  ;;  %v2042_v6 = vpop.f32.mrf.mxu0 }
 0x162   : > { %v1660_v50 = vpop.f32.mrf.mxu1 }
 0x163   : > { %v1991_v43 = vpop.f32.mrf.mxu3  ;;  %v1661_v58 = vadd.f32 %v1660_v50, %v3605_v15 }
 0x164   : > { %v1992_v53 = vadd.f32 %v1991_v43, %v1942_v32 }
 0x166   : > { %v2041_v61 = vadd.f32 %v2040_v47, %v1992_v53 }
 0x168   : > { %v2080_v37 = vadd.f32 %v2041_v61, %v1659_v4 }
 0x169   : > { %v1944_v36 = vpop.f32.mrf.mxu2  ;;  %v2045_v56 = vpop.f32.mrf.mxu0 }
 0x16a   : > { %v1663_v39 = vpop.f32.mrf.mxu1  ;;  %v2132_v30 = vmul.f32 %v2080_v37, %v2080_v37 }
 0x16b   : > { %v1993_v51 = vpop.f32.mrf.mxu3  ;;  %v1664_v20 = vadd.f32 %v1663_v39, %v3608_v31 }
 0x16c   : > { %v1994_v19 = vadd.f32 %v1993_v51, %v1944_v36 }
 0x16e   : > { %v2043_v44 = vadd.f32 %v2042_v6, %v1994_v19 }
 0x170   : > { %v2081_v10 = vadd.f32 %v2043_v44, %v1661_v58 }
 0x171   : > { %v1947_v38 = vpop.f32.mrf.mxu2  ;;  %v2047_v26 = vpop.f32.mrf.mxu0 }
 0x172   : > { %v2774_v22 = vpack.c.bf16 %v2081_v10, %v2080_v37  ;;  %v2128_v62 = vadd.f32 %v2081_v10, %v2080_v37  ;;  %v2133_v33 = vmul.f32 %v2081_v10, %v2081_v10  ;;  %v1665_v42 = vpop.f32.mrf.mxu1 }
 0x173   : > { %v1996_v2 = vpop.f32.mrf.mxu3  ;;  %v1666_v18 = vadd.f32 %v1665_v42, %v3613_v17 }
 0x174   : > { %2775 = vst [vmem:[%s3681_s11] sm:$0xff] %v2774_v22   ;;  %v2136_v34 = vadd.f32 %v2133_v33, %v2132_v30  ;;  %v1997_v15 = vadd.f32 %v1996_v2, %v1947_v38 }
 0x176   : > { %v2046_v16 = vadd.f32 %v2045_v56, %v1997_v15 }
 0x178   : > { %v2082_v40 = vadd.f32 %v2046_v16, %v1664_v20 }
 0x179   : > { %v1949_v3 = vpop.f32.mrf.mxu2  ;;  %v2050_v59 = vpop.f32.mrf.mxu0 }
 0x17a   : > { %v2129_v0 = vadd.f32 %v2128_v62, %v2082_v40  ;;  %v2134_v23 = vmul.f32 %v2082_v40, %v2082_v40  ;;  %v1668_v57 = vpop.f32.mrf.mxu1 }
 0x17b   : > { %v1998_v45 = vpop.f32.mrf.mxu3  ;;  %v1669_v17 = vadd.f32 %v1668_v57, %v3617_v28 }
 0x17c   : > { %v2137_v52 = vadd.f32 %v2136_v34, %v2134_v23  ;;  %v1999_v41 = vadd.f32 %v1998_v45, %v1949_v3 }
 0x17e   : > { %v2048_v25 = vadd.f32 %v2047_v26, %v1999_v41 }
 0x180   : > { %v2083_v63 = vadd.f32 %v2048_v25, %v1666_v18 }
 0x181   : > { %v1952_v5 = vpop.f32.mrf.mxu2  ;;  %v2052_v12 = vpop.f32.mrf.mxu0 }
 0x182   : > { %v2779_v11 = vpack.c.bf16 %v2083_v63, %v2082_v40  ;;  %v2130_v48 = vadd.f32 %v2129_v0, %v2083_v63  ;;  %v2135_v31 = vmul.f32 %v2083_v63, %v2083_v63  ;;  %v1670_v35 = vpop.f32.mrf.mxu1 }
 0x183   : > { %v2001_v47 = vpop.f32.mrf.mxu3  ;;  %v1671_v36 = vadd.f32 %v1670_v35, %v3624_v46 }
 0x184   : > { %2811 = vst [vmem:[%s3681_s11 + $0x8] sm:$0xff] %v2779_v11   ;;  %v2138_v13 = vadd.f32 %v2137_v52, %v2135_v31  ;;  %v2002_v55 = vadd.f32 %v2001_v47, %v1952_v5 }
 0x186   : > { %v2051_v32 = vadd.f32 %v2050_v59, %v2002_v55 }
 0x188   : > { %v2084_v53 = vadd.f32 %v2051_v32, %v1669_v17 }
 0x189   : > { %v1954_v8 = vpop.f32.mrf.mxu2  ;;  %v2055_v27 = vpop.f32.mrf.mxu0 }
 0x18a   : > { %v1673_v6 = vpop.f32.mrf.mxu1  ;;  %v2144_v4 = vmul.f32 %v2084_v53, %v2084_v53 }
 0x18b   : > { %v2003_v50 = vpop.f32.mrf.mxu3  ;;  %v1674_v30 = vadd.f32 %v1673_v6, %v3628_v60 }
 0x18c   : > { %v2004_v43 = vadd.f32 %v2003_v50, %v1954_v8 }
 0x18e   : > { %v2053_v56 = vadd.f32 %v2052_v12, %v2004_v43 }
 0x190   : > { %v2085_v61 = vadd.f32 %v2053_v56, %v1671_v36 }
 0x191   : > { %v1957_v39 = vpop.f32.mrf.mxu2  ;;  %v2057_v51 = vpop.f32.mrf.mxu0 }
 0x192   : > { %v2784_v19 = vpack.c.bf16 %v2085_v61, %v2084_v53  ;;  %v2140_v37 = vadd.f32 %v2085_v61, %v2084_v53  ;;  %v2145_v58 = vmul.f32 %v2085_v61, %v2085_v61  ;;  %v1675_v44 = vpop.f32.mrf.mxu1 }
 0x193   : > { %v2006_v10 = vpop.f32.mrf.mxu3  ;;  %v1676_v16 = vadd.f32 %v1675_v44, %v3635_v29 }
 0x194   : > { %2812 = vst [vmem:[%s3681_s11 + $0x10] sm:$0xff] %v2784_v19   ;;  %v2148_v38 = vadd.f32 %v2145_v58, %v2144_v4  ;;  %v2007_v26 = vadd.f32 %v2006_v10, %v1957_v39 }
 0x196   : > { %v2056_v28 = vadd.f32 %v2055_v27, %v2007_v26 }
 0x198   : > { %v2086_v22 = vadd.f32 %v2056_v28, %v1674_v30 }
 0x199   : > { %v1959_v62 = vpop.f32.mrf.mxu2  ;;  %v2060_v33 = vpop.f32.mrf.mxu0 }
 0x19a   : > { %v2141_v46 = vadd.f32 %v2140_v37, %v2086_v22  ;;  %v2146_v42 = vmul.f32 %v2086_v22, %v2086_v22  ;;  %v1678_v2 = vpop.f32.mrf.mxu1 }
 0x19b   : > { %v2008_v34 = vpop.f32.mrf.mxu3  ;;  %v1679_v35 = vadd.f32 %v1678_v2, %v3639_v7 }
 0x19c   : > { %v2149_v15 = vadd.f32 %v2148_v38, %v2146_v42  ;;  %v2009_v20 = vadd.f32 %v2008_v34, %v1959_v62 }
 0x19e   : > { %v2058_v40 = vadd.f32 %v2057_v51, %v2009_v20 }
 0x1a0   : > { %v2087_v3 = vadd.f32 %v2058_v40, %v1676_v16 }
 0x1a1   : > { %v1962_v59 = vpop.f32.mrf.mxu2  ;;  %v2062_v0 = vpop.f32.mrf.mxu0 }
 0x1a2   : > { %v2789_v23 = vpack.c.bf16 %v2087_v3, %v2086_v22  ;;  %v2142_v57 = vadd.f32 %v2141_v46, %v2087_v3  ;;  %v2147_v60 = vmul.f32 %v2087_v3, %v2087_v3  ;;  %v1680_v45 = vpop.f32.mrf.mxu1 }
 0x1a3   : > { %v2011_v52 = vpop.f32.mrf.mxu3  ;;  %v1681_v8 = vadd.f32 %v1680_v45, %v3645_v14 }
 0x1a4   : > { %2813 = vst [vmem:[%s3681_s11 + $0x18] sm:$0xff] %v2789_v23   ;;  %v2143_v41 = vadd.f32 %v2142_v57, %v2130_v48  ;;  %v2150_v18 = vadd.f32 %v2149_v15, %v2147_v60  ;;  %v2012_v63 = vadd.f32 %v2011_v52, %v1962_v59 }
 0x1a6   : > { %v2151_v25 = vadd.f32 %v2150_v18, %v2138_v13  ;;  %v2061_v12 = vadd.f32 %v2060_v33, %v2012_v63 }
 0x1a8   : > { %v2088_v55 = vadd.f32 %v2061_v12, %v1679_v35 }
 0x1a9   : > { %v1964_v5 = vpop.f32.mrf.mxu2  ;;  %v2065_v29 = vpop.f32.mrf.mxu0 }
 0x1aa   : > { %v1683_v11 = vpop.f32.mrf.mxu1  ;;  %v2156_v50 = vmul.f32 %v2088_v55, %v2088_v55 }
 0x1ab   : > { %v2013_v31 = vpop.f32.mrf.mxu3  ;;  %v1684_v39 = vadd.f32 %v1683_v11, %v3649_v54 }
 0x1ac   : > { %v2014_v47 = vadd.f32 %v2013_v31, %v1964_v5 }
 0x1ae   : > { %v2063_v27 = vadd.f32 %v2062_v0, %v2014_v47 }
 0x1b0   : > { %v2089_v32 = vadd.f32 %v2063_v27, %v1681_v8 }
 0x1b1   : > { %v1967_v6 = vpop.f32.mrf.mxu2  ;;  %v2067_v61 = vpop.f32.mrf.mxu0 }
 0x1b2   : > { %v2794_v48 = vpack.c.bf16 %v2089_v32, %v2088_v55  ;;  %v2152_v17 = vadd.f32 %v2089_v32, %v2088_v55  ;;  %v2157_v13 = vmul.f32 %v2089_v32, %v2089_v32  ;;  %v1685_v53 = vpop.f32.mrf.mxu1 }
 0x1b3   : > { %v2016_v43 = vpop.f32.mrf.mxu3  ;;  %v1686_v38 = vadd.f32 %v1685_v53, %v3655_v49 }
 0x1b4   : > { %2814 = vst [vmem:[%s3681_s11 + $0x20] sm:$0xff] %v2794_v48   ;;  %v2160_v36 = vadd.f32 %v2157_v13, %v2156_v50  ;;  %v2017_v56 = vadd.f32 %v2016_v43, %v1967_v6 }
 0x1b6   : > { %v2066_v7 = vadd.f32 %v2065_v29, %v2017_v56 }
 0x1b8   : > { %v2090_v51 = vadd.f32 %v2066_v7, %v1684_v39 }
 0x1b9   : > { %v1969_v4 = vpop.f32.mrf.mxu2  ;;  %v2070_v30 = vpop.f32.mrf.mxu0 }
 0x1ba   : > { %v2153_v14 = vadd.f32 %v2152_v17, %v2090_v51  ;;  %v2158_v19 = vmul.f32 %v2090_v51, %v2090_v51  ;;  %v1688_v10 = vpop.f32.mrf.mxu1 }
 0x1bb   : > { %v2018_v37 = vpop.f32.mrf.mxu3  ;;  %v1689_v49 = vadd.f32 %v1688_v10, %v3659_v24 }
 0x1bc   : > { %v2161_v58 = vadd.f32 %v2160_v36, %v2158_v19  ;;  %v2019_v44 = vadd.f32 %v2018_v37, %v1969_v4 }
 0x1be   : > { %v2068_v26 = vadd.f32 %v2067_v61, %v2019_v44 }
 0x1c0   : > { %v2091_v28 = vadd.f32 %v2068_v26, %v1686_v38 }
 0x1c1   : > { %v1972_v22 = vpop.f32.mrf.mxu2  ;;  %v2072_v16 = vpop.f32.mrf.mxu0 }
 0x1c2   : > { %v2799_v62 = vpack.c.bf16 %v2091_v28, %v2090_v51  ;;  %v2154_v33 = vadd.f32 %v2153_v14, %v2091_v28  ;;  %v2159_v46 = vmul.f32 %v2091_v28, %v2091_v28  ;;  %v1690_v20 = vpop.f32.mrf.mxu1 }
 0x1c3   : > { %v2021_v54 = vpop.f32.mrf.mxu3  ;;  %v1691_v57 = vadd.f32 %v1690_v20, %v3666_v1 }
 0x1c4   : > { %2815 = vst [vmem:[%s3681_s11 + $0x28] sm:$0xff] %v2799_v62   ;;  %v2155_v42 = vadd.f32 %v2154_v33, %v2143_v41  ;;  %v2162_v2 = vadd.f32 %v2161_v58, %v2159_v46  ;;  %v2022_v15 = vadd.f32 %v2021_v54, %v1972_v22 }
 0x1c6   : > { %v2163_v34 = vadd.f32 %v2162_v2, %v2151_v25  ;;  %v2071_v3 = vadd.f32 %v2070_v30, %v2022_v15 }
 0x1c8   : > { %v2092_v23 = vadd.f32 %v2071_v3, %v1689_v49 }
 0x1c9   : > { %v1974_v40 = vpop.f32.mrf.mxu2  ;;  %v2075_v12 = vpop.f32.mrf.mxu0 }
 0x1ca   : > { %v1693_v52 = vpop.f32.mrf.mxu1  ;;  %v2168_v18 = vmul.f32 %v2092_v23, %v2092_v23 }
 0x1cb   : > { %v2023_v59 = vpop.f32.mrf.mxu3  ;;  %v1694_v24 = vadd.f32 %v1693_v52, %v3669_v21 }
 0x1cc   : > { %v2024_v0 = vadd.f32 %v2023_v59, %v1974_v40 }
 0x1ce   : > { %v2073_v60 = vadd.f32 %v2072_v16, %v2024_v0 }
 0x1d0   : > { %v2093_v45 = vadd.f32 %v2073_v60, %v1691_v57 }
 0x1d1   : > { %v1977_v41 = vpop.f32.mrf.mxu2  ;;  %v2077_v48 = vpop.f32.mrf.mxu0 }
 0x1d2   : > { %v2804_v25 = vpack.c.bf16 %v2093_v45, %v2092_v23  ;;  %v2164_v63 = vadd.f32 %v2093_v45, %v2092_v23  ;;  %v2169_v5 = vmul.f32 %v2093_v45, %v2093_v45  ;;  %v1695_v27 = vpop.f32.mrf.mxu1 }
 0x1d3   : > { %v2026_v11 = vpop.f32.mrf.mxu3  ;;  %v1696_v17 = vadd.f32 %v1695_v27, %v3672_v9 }
 0x1d4   : > { %2816 = vst [vmem:[%s3681_s11 + $0x30] sm:$0xff] %v2804_v25   ;;  %v2172_v31 = vadd.f32 %v2169_v5, %v2168_v18  ;;  %v2027_v29 = vadd.f32 %v2026_v11, %v1977_v41 }
 0x1d6   : > { %v2076_v35 = vadd.f32 %v2075_v12, %v2027_v29 }
 0x1d8   : > { %v2094_v47 = vadd.f32 %v2076_v35, %v1694_v24 }
 0x1d9   : > { %v1979_v1 = vpop.f32.mrf.mxu2 }
 0x1da   : > { %v2165_v55 = vadd.f32 %v2164_v63, %v2094_v47  ;;  %v2170_v8 = vmul.f32 %v2094_v47, %v2094_v47 }
 0x1db   : > { %v2028_v32 = vpop.f32.mrf.mxu3 }
 0x1dc   : > { %v2173_v6 = vadd.f32 %v2172_v31, %v2170_v8  ;;  %v2029_v50 = vadd.f32 %v2028_v32, %v1979_v1 }
 0x1de   : > { %v2078_v13 = vadd.f32 %v2077_v48, %v2029_v50 }
 0x1e0   : > { %v2095_v43 = vadd.f32 %v2078_v13, %v1696_v17 }
 0x1e2   : > { %v2809_v53 = vpack.c.bf16 %v2095_v43, %v2094_v47  ;;  %v2166_v21 = vadd.f32 %v2165_v55, %v2095_v43  ;;  %v2171_v36 = vmul.f32 %v2095_v43, %v2095_v43 }
 0x1e4   : > { %2817 = vst [vmem:[%s3681_s11 + $0x38] sm:$0xff] %v2809_v53   ;;  %v2167_v56 = vadd.f32 %v2166_v21, %v2155_v42  ;;  %v2174_v61 = vadd.f32 %v2173_v6, %v2171_v36 }
 0x1e6   : > { %v2175_v39 = vadd.f32 %v2174_v61, %v2163_v34  ;;  %2176 = vst [vmem:[%s222_s13] sm:$0xff] %v2167_v56 }
 0x1e8   : > { %2177 = vst [vmem:[%s226_s18] sm:$0xff] %v2175_v39 }
 0x1e9 PF: > { %s15_s15 = sadd.s32 1, %s2857_s15  }
 0x1ea   : > { %p12_p5 = scmp.ge.s32.totalorder %s15_s15, 6  }
 0x1ec   :  { %14 = sbr.rel (!%p12_p5) target bundleno = 1 (0x1), region = 86 }

// kernel: basic_block_forward.4
= control target key start
LH: loop header
LB: loop body
LE: loop exit
PB: predicated region body
PF: predicated region fallthrough
CT: control target
= control target key end

     0   :  { %s3078_s21 = smov 0   ;;  %s3966_s0 = inlined_call_operand.vmem [shape: bf16[8,8,8,128], index: 0, kind: input, shape index: {}]   ;;  %s3967_s1 = inlined_call_operand.vmem [shape: f32[1,128], index: 1, kind: input, shape index: {}]   ;;  %s3968_s2 = inlined_call_operand.vmem [shape: f32[1,128], index: 2, kind: input, shape index: {}]   ;;  %s3969_s3 = inlined_call_operand.vmem [shape: bf16[3,384,128], index: 3, kind: input, shape index: {}]   ;;  %s3970_s4 = inlined_call_operand.vmem [shape: bf16[8,8,8,128], index: 4, kind: output, shape index: {0}]   ;;  %s3971_s5 = inlined_call_operand.vmem [shape: f32[4,8,128], index: 5, kind: output, shape index: {1}]   ;;  %s3972_s6 = inlined_call_operand.vmem [shape: f32[4,8,128], index: 6, kind: output, shape index: {2}]  }
   0x1 LB: > { %s3084_s22 = sadd.s32 4294967295, %s3040_s21   ;;  %p2444_p0 = scmp.ge.s32.totalorder %s3040_s21, 1  ;;  %s3040_s21 = sphi %s3078_s21, %s17_s21  }
   0x2   : > { %p219_p1 = scmp.lt.s32.totalorder %s3040_s21, 5 }
   0x4   : > { %p220_p2 = pnand %p2444_p0, %p219_p1 }
   0x5   : > { %s2445_s25 = sshll.u32 (!%p220_p2), %s3084_s22, 1  ;;  %p273_p4 = scmp.lt.s32.totalorder (!%p220_p2), %s3084_s22, 3 }
   0x6   : > { %223 = sbr.rel (%p220_p2) target bundleno = 495 (0x1ef), region = 36  ;;  %p260_p3 = scmp.lt.s32.totalorder (!%p220_p2), %s2445_s25, 7 }
   0xb   : > { %v2872_v0 = vld [vmem:[%s3969_s3 + $0xf8] sm:$0xff]  ;;  %vm380_vm0 = vcmask 1040384   ;;  %vm381_vm1 = vsmask.f32 256  ;;  %v2871_v1 = vld [vmem:[%s3969_s3 + $0xf0] sm:$0xff]  ;;  %s3980_s25 = smov (!%p260_p3, %s2445_s25), 7 }
   0xc   : > { %1354 = vmatpush.bf16.msra.mxu0 %v2872_v0  ;;  %2999 = vmatpush.bf16.msra.mxu1 %v2872_v0  ;;  %vm3098_vm2 = vmand %vm380_vm0, %vm381_vm1  ;;  %vm431_vm3 = vsmask.f32 7938  ;;  %v3105_v3 = vld [vmem:[%s3967_s1] ss:$0 sm:$0xff]  ;;  %v383_v4 = vld [vmem:[#allocation2 + $0x8] sm:$0x1] }
   0xd   : > { %3000 = vmatpush.bf16.msra.mxu2 %v2872_v0  ;;  %3001 = vmatpush.bf16.msra.mxu3 %v2872_v0  ;;  %v386_v5 = vld [vmem:[#allocation2 + $0x10] sm:$0x1]  ;;  %s2839_s30 = sshll.u32 %s3980_s25, 5  ;;  %v384_v6 = vsel %vm3098_vm2, 0, %v383_v4  ;;  %vm3114_vm4 = vmand %vm380_vm0, %vm431_vm3  ;;  %v433_v9 = vld [vmem:[#allocation2 + $0xc] sm:$0x1] }
   0xe   : > { %v387_v7 = vsel %vm3098_vm2, 0, %v386_v5  ;;  %v2870_v10 = vld [vmem:[%s3969_s3 + $0xe8] sm:$0xff]  ;;  %s3126_s11 = scalar_lea.vmem %s3966_s0, %s2839_s30  ;;  %v3131_v11 = vld [vmem:[%s3968_s2] ss:$0 sm:$0xff]  ;;  %385 = vst [vmem:[#allocation2 + $0x8] sm:$0x1] %v384_v6  ;;  %s3931_s16 = scalar_lea.vmem %s3970_s4, %s2839_s30 }
   0xf   : > { %v434_v12 = vsel %vm3114_vm4, 0, %v433_v9  ;;  %v436_v13 = vld [vmem:[#allocation2 + $0x14] sm:$0x1]  ;;  %v2914_v14 = vld [vmem:[%s3126_s11] sm:$0xff]   ;;  %388 = vst [vmem:[#allocation2 + $0x10] sm:$0x1] %v387_v7 }
  0x10   : > { %1355 = vmatpush.bf16.msra.mxu0 %v2871_v1  ;;  %3002 = vmatpush.bf16.msra.mxu1 %v2871_v1  ;;  %v437_v15 = vsel %vm3114_vm4, 0, %v436_v13  ;;  %v2986_v16 = vld [vmem:[%s3126_s11 + $0x10] sm:$0xff]   ;;  %v2988_v17 = vld [vmem:[%s3126_s11 + $0x20] sm:$0xff]   ;;  %v2915_v18 = vunpack.c.l.bf16 %v2914_v14  ;;  %v2916_v19 = vunpack.c.h.bf16 %v2914_v14  ;;  %435 = vst [vmem:[#allocation2 + $0xc] sm:$0x1] %v434_v12  ;;  %v2868_v46 = vld [vmem:[%s3969_s3 + $0xd8] sm:$0xff] }
  0x11   : > { %3003 = vmatpush.bf16.msra.mxu2 %v2871_v1  ;;  %3004 = vmatpush.bf16.msra.mxu3 %v2871_v1  ;;  %v2923_v20 = vunpack.c.l.bf16 %v2986_v16  ;;  %v2924_v21 = vunpack.c.h.bf16 %v2986_v16  ;;  %v395_v22 = vld [vmem:[#allocation2 + $0x28] sm:$0x1]  ;;  %v398_v23 = vld [vmem:[#allocation2 + $0x30] sm:$0x1]  ;;  %438 = vst [vmem:[#allocation2 + $0x14] sm:$0x1] %v437_v15  ;;  %v2931_v26 = vunpack.c.l.bf16 %v2988_v17  ;;  %v2932_v27 = vunpack.c.h.bf16 %v2988_v17 }
  0x12   : > { %v396_v24 = vsel %vm3098_vm2, 0, %v395_v22  ;;  %v399_v25 = vsel %vm3098_vm2, 0, %v398_v23  ;;  %v407_v28 = vld [vmem:[#allocation2 + $0x58] sm:$0x1]  ;;  %v2869_v29 = vld [vmem:[%s3969_s3 + $0xe0] sm:$0xff]  ;;  %v319_v30 = vmul.f32 %v3105_v3, %v2915_v18  ;;  %v320_v31 = vmul.f32 %v3105_v3, %v2916_v19  ;;  %v2990_v41 = vld [vmem:[%s3126_s11 + $0x30] sm:$0xff]  }
  0x13   : > { %v323_v32 = vmul.f32 %v3105_v3, %v2923_v20  ;;  %397 = vst [vmem:[#allocation2 + $0x28] sm:$0x1] %v396_v24  ;;  %v410_v33 = vld [vmem:[#allocation2 + $0x60] sm:$0x1]  ;;  %v324_v34 = vmul.f32 %v3105_v3, %v2924_v21  ;;  %v327_v35 = vmul.f32 %v3105_v3, %v2931_v26  ;;  %v328_v36 = vmul.f32 %v3105_v3, %v2932_v27  ;;  %v2867_v61 = vld [vmem:[%s3969_s3 + $0xd0] sm:$0xff]  ;;  %v2866_v9 = vld [vmem:[%s3969_s3 + $0xc8] sm:$0xff] }
  0x14   : > { %1356 = vmatpush.bf16.msra.mxu0 %v2870_v10  ;;  %3005 = vmatpush.bf16.msra.mxu1 %v2870_v10  ;;  %400 = vst [vmem:[#allocation2 + $0x30] sm:$0x1] %v399_v25  ;;  %v338_v37 = vadd.f32 %v3131_v11, %v319_v30  ;;  %v339_v38 = vadd.f32 %v3131_v11, %v320_v31  ;;  %v408_v40 = vsel %vm3098_vm2, 0, %v407_v28  ;;  %v411_v45 = vsel %vm3098_vm2, 0, %v410_v33  ;;  %v439_v17 = vld [vmem:[#allocation2 + $0x1c] sm:$0x1] }
  0x15   : > { %3006 = vmatpush.bf16.msra.mxu2 %v2870_v10  ;;  %3007 = vmatpush.bf16.msra.mxu3 %v2870_v10  ;;  %v342_v39 = vadd.f32 %v3131_v11, %v323_v32  ;;  %v343_v42 = vadd.f32 %v3131_v11, %v324_v34  ;;  %v346_v43 = vadd.f32 %v3131_v11, %v327_v35  ;;  %v2939_v53 = vunpack.c.l.bf16 %v2990_v41  ;;  %v659_v13 = vld [vmem:[#allocation2 + $0x8] sm:$0xf]  ;;  %v2865_v35 = vld [vmem:[%s3969_s3 + $0xc0] sm:$0xff]  ;;  %s3982_s22 = smov (!%p273_p4, %s3084_s22), 3 }
  0x16   : > { %v347_v44 = vadd.f32 %v3131_v11, %v328_v36  ;;  %409 = vst [vmem:[#allocation2 + $0x58] sm:$0x1] %v408_v40  ;;  %v354_v47 = vmax.f32 %v338_v37, 0.0  ;;  %v355_v48 = vmax.f32 %v339_v38, 0.0  ;;  %v2940_v57 = vunpack.c.h.bf16 %v2990_v41  ;;  %v665_v14 = vld [vmem:[#allocation2 + $0x10] sm:$0xf] }
  0x17   : > { %v358_v49 = vmax.f32 %v342_v39, 0.0  ;;  %v359_v50 = vmax.f32 %v343_v42, 0.0  ;;  %v362_v51 = vmax.f32 %v346_v43, 0.0  ;;  %412 = vst [vmem:[#allocation2 + $0x60] sm:$0x1] %v411_v45  ;;  %vm657_vm5 = vcmask 1043456  }
  0x18   : > { %1357 = vmatpush.bf16.msra.mxu0 %v2869_v29  ;;  %3008 = vmatpush.bf16.msra.mxu1 %v2869_v29  ;;  %v363_v52 = vmax.f32 %v347_v44, 0.0  ;;  %v481_v54 = vpack.c.bf16 %v354_v47, %v354_v47  ;;  %v482_v55 = vpack.c.bf16 %v355_v48, %v355_v48  ;;  %v331_v15 = vmul.f32 %v3105_v3, %v2939_v53  ;;  %vm3181_vm6 = vmand %vm657_vm5, %vm431_vm3  ;;  %v662_v18 = vld [vmem:[#allocation2 + $0xc] sm:$0x1]  ;;  %v668_v27 = vld [vmem:[#allocation2 + $0x14] sm:$0x1]  ;;  %s2451_s25 = sshll.u32 %s3982_s22, 3 }
  0x19   : > { %3009 = vmatpush.bf16.msra.mxu2 %v2869_v29  ;;  %3010 = vmatpush.bf16.msra.mxu3 %v2869_v29  ;;  %v485_v56 = vpack.c.bf16 %v358_v49, %v358_v49  ;;  %v486_v58 = vpack.c.bf16 %v359_v50, %v359_v50  ;;  %v3167_v59 = vpack.c.bf16 %v362_v51, %v362_v51  ;;  %v2985_v34 = vld [vmem:[%s3126_s11 + $0x8] sm:$0xff]   ;;  %v3205_v39 = vld [vmem:[#allocation2 + $0x78] sm:$0x1]  ;;  %v3207_v40 = vld [vmem:[#allocation2 + $0x80] sm:$0x1]  ;;  %s276_s18 = scalar_lea.vmem %s3971_s5, %s2451_s25  ;;  %s280_s20 = scalar_lea.vmem %s3972_s6, %s2451_s25 }
  0x1a   : > { %v3169_v60 = vpack.c.bf16 %v363_v52, %v363_v52  ;;  %v498_v62 = vshrl.u32 %v481_v54, 16  ;;  %v501_v63 = vshll.u32 %v481_v54, 16  ;;  %v506_v0 = vshrl.u32 %v482_v55, 16  ;;  %v683_v28 = vld [vmem:[#allocation2 + $0x28] sm:$0xf]  ;;  %v3226_v52 = vld [vmem:[%s3126_s11 + $0x18] sm:$0xff]  }
  0x1b   : > { %v509_v1 = vshll.u32 %v482_v55, 16  ;;  %v530_v4 = vshrl.u32 %v485_v56, 16  ;;  %v533_v5 = vshll.u32 %v485_v56, 16  ;;  %v538_v6 = vshrl.u32 %v486_v58, 16  ;;  %v689_v31 = vld [vmem:[#allocation2 + $0x30] sm:$0xf] }
  0x1c   : > { %1358 = vmatpush.bf16.msra.mxu0 %v2868_v46  ;;  %3011 = vmatpush.bf16.msra.mxu1 %v2868_v46  ;;  %v541_v7 = vshll.u32 %v486_v58, 16  ;;  %v500_v10 = vrot.slane %v498_v62, 7  ;;  %v508_v12 = vrot.slane %v506_v0, 7  ;;  %v332_v16 = vmul.f32 %v3105_v3, %v2940_v57  ;;  %v3209_v41 = vld [vmem:[#allocation2 + $0x18] sm:$0x1]  ;;  %v2890_v2 = vld [vmem:[%s3969_s3 + $0x188] sm:$0xff] }
  0x1d   : > { %3012 = vmatpush.bf16.msra.mxu2 %v2868_v46  ;;  %3013 = vmatpush.bf16.msra.mxu3 %v2868_v46  ;;  %v3185_v19 = vrot.slane %v530_v4, 7  ;;  %v3187_v20 = vrot.slane %v538_v6, 7  ;;  %v562_v21 = vshrl.u32 %v3167_v59, 16  ;;  %v570_v22 = vshrl.u32 %v3169_v60, 16  ;;  %v3219_v46 = vld [vmem:[#allocation2 + $0x20] sm:$0x1] }
  0x1e   : > { %v503_v23 = vor.u32 %v501_v63, %v500_v10  ;;  %v504_v24 = vrot.slane %v500_v10, 4  ;;  %v511_v25 = vor.u32 %v509_v1, %v508_v12  ;;  %v512_v26 = vrot.slane %v508_v12, 4  ;;  %v707_v48 = vld [vmem:[#allocation2 + $0x58] sm:$0xf]  ;;  %v713_v49 = vld [vmem:[#allocation2 + $0x60] sm:$0xf] }
  0x1f   : > { %v535_v29 = vor.u32 %v533_v5, %v3185_v19  ;;  %v543_v30 = vor.u32 %v541_v7, %v3187_v20  ;;  %v565_v32 = vshll.u32 %v3167_v59, 16  ;;  %v573_v33 = vshll.u32 %v3169_v60, 16  ;;  %v3236_v57 = vld [vmem:[#allocation2 + $0x38] sm:$0x1] }
  0x20   : > { %1359 = vmatpush.bf16.msra.mxu0 %v2867_v61  ;;  %3014 = vmatpush.bf16.msra.mxu1 %v2867_v61  ;;  %v660_v36 = vsel %vm3181_vm6, %v503_v23, %v659_v13  ;;  %v663_v37 = vsel %vm3098_vm2, %v504_v24, %v662_v18  ;;  %v666_v38 = vsel %vm3181_vm6, %v511_v25, %v665_v14  ;;  %v3215_v44 = vrot.slane %v562_v21, 7  ;;  %v2888_v60 = vld [vmem:[%s3969_s3 + $0x178] sm:$0xff]  ;;  %v2887_v13 = vld [vmem:[%s3969_s3 + $0x170] sm:$0xff] }
  0x21   : > { %3015 = vmatpush.bf16.msra.mxu2 %v2867_v61  ;;  %3016 = vmatpush.bf16.msra.mxu3 %v2867_v61  ;;  %661 = vst [vmem:[#allocation2 + $0x8] sm:$0xf] %v660_v36  ;;  %v669_v42 = vsel %vm3098_vm2, %v512_v26, %v668_v27  ;;  %v684_v43 = vsel %vm3181_vm6, %v535_v29, %v683_v28  ;;  %v3217_v45 = vrot.slane %v570_v22, 7  ;;  %v420_v55 = vsel %vm3098_vm2, 0, %v3205_v39  ;;  %v2848_v61 = vld [vmem:[%s3969_s3 + $0x38] sm:$0xff]  ;;  %v2847_v14 = vld [vmem:[%s3969_s3 + $0x30] sm:$0xff] }
  0x22   : > { %664 = vst [vmem:[#allocation2 + $0xc] sm:$0x1] %v663_v37  ;;  %v690_v47 = vsel %vm3181_vm6, %v543_v30, %v689_v31  ;;  %v350_v50 = vadd.f32 %v3131_v11, %v331_v15  ;;  %v351_v51 = vadd.f32 %v3131_v11, %v332_v16  ;;  %v567_v53 = vor.u32 %v565_v32, %v3215_v44  ;;  %v2880_v4 = vld [vmem:[%s3969_s3 + $0x138] sm:$0xff]  ;;  %v3275_v26 = vld [vmem:[%s3126_s11 + $0x28] sm:$0xff]   ;;  %v2879_v30 = vld [vmem:[%s3969_s3 + $0x130] sm:$0xff] }
  0x23   : > { %667 = vst [vmem:[#allocation2 + $0x10] sm:$0xf] %v666_v38  ;;  %v575_v54 = vor.u32 %v573_v33, %v3217_v45  ;;  %v423_v56 = vsel %vm3098_vm2, 0, %v3207_v40  ;;  %v2919_v62 = vunpack.c.l.bf16 %v2985_v34  ;;  %v2920_v63 = vunpack.c.h.bf16 %v2985_v34  ;;  %v2856_v5 = vld [vmem:[%s3969_s3 + $0x78] sm:$0xff]  ;;  %v2855_v31 = vld [vmem:[%s3969_s3 + $0x70] sm:$0xff] }
  0x24   : > { %1360 = vmatpush.bf16.msra.mxu0 %v2866_v9  ;;  %3017 = vmatpush.bf16.msra.mxu1 %v2866_v9  ;;  %670 = vst [vmem:[#allocation2 + $0x14] sm:$0x1] %v669_v42  ;;  %v366_v58 = vmax.f32 %v350_v50, 0.0  ;;  %v367_v59 = vmax.f32 %v351_v51, 0.0  ;;  %v708_v0 = vsel %vm3181_vm6, %v567_v53, %v707_v48  ;;  %v390_v6 = vsel %vm3098_vm2, 0, %v3209_v41  ;;  %v2878_v51 = vld [vmem:[%s3969_s3 + $0x128] sm:$0xff] }
  0x25   : > { %3018 = vmatpush.bf16.msra.mxu2 %v2866_v9  ;;  %3019 = vmatpush.bf16.msra.mxu3 %v2866_v9  ;;  %685 = vst [vmem:[#allocation2 + $0x28] sm:$0xf] %v684_v43  ;;  %v714_v1 = vsel %vm3181_vm6, %v575_v54, %v713_v49  ;;  %v393_v7 = vsel %vm3098_vm2, 0, %v3219_v46  ;;  %v321_v12 = vmul.f32 %v3105_v3, %v2919_v62  ;;  %v2927_v16 = vunpack.c.l.bf16 %v3226_v52  ;;  %v404_v41 = vld [vmem:[#allocation2 + $0x40] sm:$0x1]  ;;  %v2886_v43 = vld [vmem:[%s3969_s3 + $0x168] sm:$0xff] }
  0x26   : > { %691 = vst [vmem:[#allocation2 + $0x30] sm:$0xf] %v690_v47  ;;  %v493_v9 = vpack.c.bf16 %v366_v58, %v366_v58  ;;  %v494_v10 = vpack.c.bf16 %v367_v59, %v367_v59  ;;  %v322_v15 = vmul.f32 %v3105_v3, %v2920_v63  ;;  %v2928_v18 = vunpack.c.h.bf16 %v3226_v52  ;;  %v2846_v46 = vld [vmem:[%s3969_s3 + $0x28] sm:$0xff]  ;;  %v2845_v62 = vld [vmem:[%s3969_s3 + $0x20] sm:$0xff] }
  0x27   : > { %709 = vst [vmem:[#allocation2 + $0x58] sm:$0xf] %v708_v0  ;;  %v402_v21 = vsel %vm3098_vm2, 0, %v3236_v57  ;;  %v340_v25 = vadd.f32 %v3131_v11, %v321_v12  ;;  %v325_v36 = vmul.f32 %v3105_v3, %v2927_v16  ;;  %v2854_v52 = vld [vmem:[%s3969_s3 + $0x68] sm:$0xff]  ;;  %v2935_v53 = vunpack.c.l.bf16 %v3275_v26  ;;  %v2877_v63 = vld [vmem:[%s3969_s3 + $0x120] sm:$0xff] }
  0x28   : > { %1361 = vmatpush.bf16.msra.mxu0 %v2865_v35  ;;  %3020 = vmatpush.bf16.msra.mxu1 %v2865_v35  ;;  %v757_v22 = vld [vmem:[#allocation2 + $0x8] sm:$0xf]  ;;  %715 = vst [vmem:[#allocation2 + $0x60] sm:$0xf] %v714_v1  ;;  %v594_v23 = vshrl.u32 %v493_v9, 16  ;;  %v597_v24 = vshll.u32 %v493_v9, 16  ;;  %v341_v32 = vadd.f32 %v3131_v11, %v322_v15  ;;  %v326_v40 = vmul.f32 %v3105_v3, %v2928_v18 }
  0x29   : > { %3021 = vmatpush.bf16.msra.mxu2 %v2865_v35  ;;  %3022 = vmatpush.bf16.msra.mxu3 %v2865_v35  ;;  %v3277_v27 = vunpack.c.l.b16 %v757_v22  ;;  %421 = vst [vmem:[#allocation2 + $0x78] sm:$0x1] %v420_v55  ;;  %v602_v28 = vshrl.u32 %v494_v10, 16  ;;  %v605_v29 = vshll.u32 %v494_v10, 16  ;;  %v356_v35 = vmax.f32 %v340_v25, 0.0  ;;  %v2853_v15 = vld [vmem:[%s3969_s3 + $0x60] sm:$0xff] }
  0x2a   : > { %v759_v33 = vld [vmem:[#allocation2 + $0x10] sm:$0xf]  ;;  %424 = vst [vmem:[#allocation2 + $0x80] sm:$0x1] %v423_v56  ;;  %v3286_v34 = vrot.slane %v594_v23, 7  ;;  %v357_v39 = vmax.f32 %v341_v32, 0.0  ;;  %v344_v0 = vadd.f32 %v3131_v11, %v325_v36  ;;  %v345_v1 = vadd.f32 %v3131_v11, %v326_v40 }
  0x2b   : > { %v3289_v37 = vunpack.c.l.b16 %v759_v33  ;;  %v3291_v38 = vrot.slane %v602_v28, 7  ;;  %391 = vst [vmem:[#allocation2 + $0x18] sm:$0x1] %v390_v6  ;;  %v483_v57 = vpack.c.bf16 %v356_v35, %v356_v35  ;;  %v416_v28 = vld [vmem:[#allocation2 + $0x70] sm:$0x1]  ;;  %v2936_v32 = vunpack.c.h.bf16 %v3275_v26 }
  0x2c   : > { %1403 = vmatpush.bf16.msrb.mxu1 %v2880_v4  ;;  %1742 = vmatpush.bf16.msrb.mxu0 %v2856_v5  ;;  %v765_v42 = vld [vmem:[#allocation2 + $0x28] sm:$0xf]  ;;  %394 = vst [vmem:[#allocation2 + $0x20] sm:$0x1] %v393_v7  ;;  %v599_v50 = vor.u32 %v597_v24, %v3286_v34  ;;  %v484_v58 = vpack.c.bf16 %v357_v39, %v357_v39  ;;  %v405_v4 = vsel %vm3098_vm2, 0, %v404_v41  ;;  %v361_v25 = vmax.f32 %v345_v1, 0.0 }
  0x2d   : > { %1452 = vmatpush.bf16.msrb.mxu2 %v2888_v60  ;;  %1693 = vmatpush.bf16.msrb.mxu3 %v2848_v61  ;;  %v1162_v47 = vpack.c.b16 %v3289_v37, %v3277_v27  ;;  %v767_v48 = vld [vmem:[#allocation2 + $0x30] sm:$0xf]  ;;  %v3302_v49 = vunpack.c.l.b16 %v765_v42  ;;  %403 = vst [vmem:[#allocation2 + $0x38] sm:$0x1] %v402_v21  ;;  %v607_v56 = vor.u32 %v605_v29, %v3291_v38  ;;  %v2885_v61 = vld [vmem:[%s3969_s3 + $0x160] sm:$0xff]  ;;  %v514_v10 = vshrl.u32 %v483_v57, 16 }
  0x2e   : > { %v3312_v54 = vunpack.c.l.b16 %v767_v48  ;;  %v777_v55 = vld [vmem:[#allocation2 + $0x58] sm:$0xf]  ;;  %v413_v5 = vld [vmem:[#allocation2 + $0x68] sm:$0x1]  ;;  %v517_v12 = vshll.u32 %v483_v57, 16  ;;  %v522_v16 = vshrl.u32 %v484_v58, 16  ;;  %v329_v33 = vmul.f32 %v3105_v3, %v2935_v53 }
  0x2f   : > { %1362 = vmatmul.bf16.vlgmr.msra.gmra.mxu0 %v1162_v47  ;;  %v779_v59 = vld [vmem:[#allocation2 + $0x60] sm:$0xf]  ;;  %v3315_v60 = vunpack.c.l.b16 %v777_v55  ;;  %406 = vst [vmem:[#allocation2 + $0x40] sm:$0x1] %v405_v4  ;;  %v525_v18 = vshll.u32 %v484_v58, 16  ;;  %v360_v21 = vmax.f32 %v344_v0, 0.0  ;;  %v488_v40 = vpack.c.bf16 %v361_v25, %v361_v25 }
  0x30   : > { %1404 = vmatpush.bf16.msrb.mxu1 %v2879_v30  ;;  %1743 = vmatpush.bf16.msrb.mxu0 %v2855_v31  ;;  %v1168_v6 = vpack.c.b16 %v3312_v54, %v3302_v49  ;;  %v3332_v7 = vunpack.c.l.b16 %v779_v59  ;;  %v731_v9 = vld [vmem:[#allocation2 + $0x78] sm:$0xf]  ;;  %v3343_v24 = vrot.slane %v514_v10, 7  ;;  %v3345_v29 = vrot.slane %v522_v16, 7  ;;  %v3349_v35 = vld [vmem:[#allocation2 + $0xc] sm:$0x1] }
  0x31   : > { %1453 = vmatpush.bf16.msrb.mxu2 %v2887_v13  ;;  %1694 = vmatpush.bf16.msrb.mxu3 %v2847_v14  ;;  %v732_v13 = vsel %vm3181_vm6, %v599_v50, %v731_v9  ;;  %v737_v14 = vld [vmem:[#allocation2 + $0x80] sm:$0xf]  ;;  %v487_v31 = vpack.c.bf16 %v360_v21, %v360_v21  ;;  %v414_v41 = vsel %vm3098_vm2, 0, %v413_v5  ;;  %v2991_v42 = vld [vmem:[%s3126_s11 + $0x38] sm:$0xff]   ;;  %v554_v50 = vshrl.u32 %v488_v40, 16  ;;  %v2843_v10 = vld [vmem:[%s3969_s3 + $0x10] sm:$0xff] }
  0x32   : > { %1372 = vmatmul.bf16.vlgmr.msra.gmra.mxu1 %v1168_v6  ;;  %v1174_v22 = vpack.c.b16 %v3332_v7, %v3315_v60  ;;  %733 = vst [vmem:[#allocation2 + $0x78] sm:$0xf] %v732_v13  ;;  %v738_v23 = vsel %vm3181_vm6, %v607_v56, %v737_v14  ;;  %v671_v30 = vld [vmem:[#allocation2 + $0x18] sm:$0xf]  ;;  %v519_v36 = vor.u32 %v517_v12, %v3343_v24  ;;  %v425_v0 = vld [vmem:[#allocation2 + $0x88] sm:$0x1]  ;;  %v2943_v5 = vunpack.c.l.bf16 %v2991_v42 }
  0x33   : > { %739 = vst [vmem:[#allocation2 + $0x80] sm:$0xf] %v738_v23  ;;  %v677_v39 = vld [vmem:[#allocation2 + $0x20] sm:$0xf]  ;;  %v527_v26 = vor.u32 %v525_v18, %v3345_v29  ;;  %v549_v47 = vshll.u32 %v487_v31, 16  ;;  %v330_v53 = vmul.f32 %v3105_v3, %v2936_v32  ;;  %v2884_v55 = vld [vmem:[%s3969_s3 + $0x158] sm:$0xff]  ;;  %v2944_v6 = vunpack.c.h.bf16 %v2991_v42 }
  0x34   : > { %1405 = vmatpush.bf16.msrb.mxu1 %v2878_v51  ;;  %1744 = vmatpush.bf16.msrb.mxu0 %v2854_v52  ;;  %415 = vst [vmem:[#allocation2 + $0x68] sm:$0x1] %v414_v41  ;;  %v672_v48 = vsel %vm3181_vm6, %v519_v36, %v671_v30  ;;  %v557_v51 = vshll.u32 %v488_v40, 16  ;;  %v695_v52 = vld [vmem:[#allocation2 + $0x38] sm:$0xf]  ;;  %v3377_v1 = vrot.slane %v554_v50, 7  ;;  %v830_v12 = vunpack.c.l.b16 %v3349_v35 }
  0x35   : > { %1454 = vmatpush.bf16.msrb.mxu2 %v2886_v43  ;;  %1695 = vmatpush.bf16.msrb.mxu3 %v2846_v46  ;;  %v3355_v43 = vld [vmem:[#allocation2 + $0x14] sm:$0x1]  ;;  %v546_v46 = vshrl.u32 %v487_v31, 16  ;;  %v2844_v56 = vld [vmem:[%s3969_s3 + $0x18] sm:$0xff]  ;;  %673 = vst [vmem:[#allocation2 + $0x18] sm:$0xf] %v672_v48  ;;  %v678_v58 = vsel %vm3181_vm6, %v527_v26, %v677_v39  ;;  %v349_v4 = vadd.f32 %v3131_v11, %v330_v53 }
  0x36   : > { %1382 = vmatmul.bf16.vlgmr.msra.gmra.mxu2 %v1174_v22  ;;  %v2876_v57 = vld [vmem:[%s3969_s3 + $0x118] sm:$0xff]  ;;  %679 = vst [vmem:[#allocation2 + $0x20] sm:$0xf] %v678_v58  ;;  %v2883_v16 = vld [vmem:[%s3969_s3 + $0x150] sm:$0xff]  ;;  %v832_v18 = vunpack.c.l.b16 %v3355_v43  ;;  %v559_v23 = vor.u32 %v557_v51, %v3377_v1  ;;  %v333_v35 = vmul.f32 %v3105_v3, %v2943_v5  ;;  %v334_v41 = vmul.f32 %v3105_v3, %v2944_v6  ;;  %v2882_v43 = vld [vmem:[%s3969_s3 + $0x148] sm:$0xff] }
  0x37   : > { %v3372_v59 = vrot.slane %v546_v46, 7  ;;  %v2852_v9 = vld [vmem:[%s3969_s3 + $0x58] sm:$0xff]  ;;  %v365_v25 = vmax.f32 %v349_v4, 0.0  ;;  %v2851_v30 = vld [vmem:[%s3969_s3 + $0x50] sm:$0xff]  ;;  %v426_v42 = vsel %vm3098_vm2, 0, %v425_v0  ;;  %v2842_v26 = vld [vmem:[%s3969_s3 + $0x8] sm:$0xff] }
  0x38   : > { %1406 = vmatpush.bf16.msrb.mxu1 %v2877_v63  ;;  %1745 = vmatpush.bf16.msrb.mxu0 %v2853_v15  ;;  %v417_v63 = vsel %vm3098_vm2, 0, %v416_v28  ;;  %v2875_v28 = vld [vmem:[%s3969_s3 + $0x110] sm:$0xff]  ;;  %v352_v3 = vadd.f32 %v3131_v11, %v333_v35  ;;  %v2874_v50 = vld [vmem:[%s3969_s3 + $0x108] sm:$0xff]  ;;  %v353_v58 = vadd.f32 %v3131_v11, %v334_v41  ;;  %427 = vst [vmem:[#allocation2 + $0x88] sm:$0x1] %v426_v42 }
  0x39   : > { %1696 = vmatpush.bf16.msrb.mxu3 %v2845_v62  ;;  %1455 = vmatpush.bf16.msrb.mxu2 %v2885_v61  ;;  %v701_v61 = vld [vmem:[#allocation2 + $0x40] sm:$0xf]  ;;  %v348_v62 = vadd.f32 %v3131_v11, %v329_v33  ;;  %v785_v13 = vld [vmem:[#allocation2 + $0x78] sm:$0xf]  ;;  %v551_v14 = vor.u32 %v549_v47, %v3372_v59  ;;  %418 = vst [vmem:[#allocation2 + $0x70] sm:$0x1] %v417_v63 }
  0x3a   : > { %v787_v21 = vld [vmem:[#allocation2 + $0x80] sm:$0xf]  ;;  %v3392_v22 = vunpack.c.l.b16 %v785_v13  ;;  %v428_v36 = vld [vmem:[#allocation2 + $0x90] sm:$0x1]  ;;  %v702_v39 = vsel %vm3181_vm6, %v559_v23, %v701_v61  ;;  %v492_v40 = vpack.c.bf16 %v365_v25, %v365_v25  ;;  %v2850_v51 = vld [vmem:[%s3969_s3 + $0x48] sm:$0xff]  ;;  %v368_v0 = vmax.f32 %v352_v3, 0.0 }
  0x3b   : > { %v364_v15 = vmax.f32 %v348_v62, 0.0  ;;  %v3401_v31 = vunpack.c.l.b16 %v787_v21  ;;  %v696_v32 = vsel %vm3181_vm6, %v551_v14, %v695_v52  ;;  %703 = vst [vmem:[#allocation2 + $0x40] sm:$0xf] %v702_v39  ;;  %v3427_v52 = vpack.c.b16 %v830_v12, %v3277_v27  ;;  %v2841_v11 = vld [vmem:[%s3969_s3] sm:$0xff] }
  0x3c   : > { %1407 = vmatpush.bf16.msrb.mxu1 %v2876_v57  ;;  %1746 = vmatpush.bf16.msrb.mxu0 %v2852_v9  ;;  %697 = vst [vmem:[#allocation2 + $0x38] sm:$0xf] %v696_v32  ;;  %v761_v53 = vld [vmem:[#allocation2 + $0x18] sm:$0xf]  ;;  %v719_v57 = vld [vmem:[#allocation2 + $0x68] sm:$0xf]  ;;  %v495_v13 = vpack.c.bf16 %v368_v0, %v368_v0 }
  0x3d   : > { %1697 = vmatpush.bf16.msrb.mxu3 %v2844_v56  ;;  %1456 = vmatpush.bf16.msrb.mxu2 %v2884_v55  ;;  %v491_v33 = vpack.c.bf16 %v364_v15, %v364_v15  ;;  %v1180_v46 = vpack.c.b16 %v3401_v31, %v3392_v22  ;;  %v586_v55 = vshrl.u32 %v492_v40, 16  ;;  %v589_v56 = vshll.u32 %v492_v40, 16  ;;  %v763_v61 = vld [vmem:[#allocation2 + $0x20] sm:$0xf]  ;;  %v2912_v0 = vld [vmem:[%s3969_s3 + $0x238] sm:$0xff] }
  0x3e   : > { %v3430_v62 = vunpack.c.l.b16 %v761_v53  ;;  %v429_v4 = vsel %vm3098_vm2, 0, %v428_v36  ;;  %v3436_v5 = vunpack.c.l.b16 %v763_v61  ;;  %v369_v9 = vmax.f32 %v353_v58, 0.0  ;;  %v2881_v14 = vld [vmem:[%s3969_s3 + $0x140] sm:$0xff]  ;;  %v2896_v53 = vld [vmem:[%s3969_s3 + $0x1b8] sm:$0xff] }
  0x3f   : > { %v578_v47 = vshrl.u32 %v491_v33, 16  ;;  %v581_v48 = vshll.u32 %v491_v33, 16  ;;  %1392 = vmatmul.bf16.vlgmr.msra.gmra.mxu3 %v1180_v46  ;;  %v3438_v6 = vrot.slane %v586_v55, 7  ;;  %430 = vst [vmem:[#allocation2 + $0x90] sm:$0x1] %v429_v4  ;;  %v2873_v15 = vld [vmem:[%s3969_s3 + $0x100] sm:$0xff] }
  0x40   : > { %1408 = vmatpush.bf16.msrb.mxu1 %v2875_v28  ;;  %1747 = vmatpush.bf16.msrb.mxu0 %v2851_v30  ;;  %v725_v12 = vld [vmem:[#allocation2 + $0x70] sm:$0xf]  ;;  %v1165_v21 = vpack.c.b16 %v3436_v5, %v3430_v62  ;;  %v496_v25 = vpack.c.bf16 %v369_v9, %v369_v9  ;;  %v2849_v28 = vld [vmem:[%s3969_s3 + $0x40] sm:$0xff]  ;;  %v610_v33 = vshrl.u32 %v495_v13, 16  ;;  %v613_v35 = vshll.u32 %v495_v13, 16  ;;  %v2904_v55 = vld [vmem:[%s3969_s3 + $0x1f8] sm:$0xff] }
  0x41   : > { %1698 = vmatpush.bf16.msrb.mxu3 %v2843_v10  ;;  %1457 = vmatpush.bf16.msrb.mxu2 %v2883_v16  ;;  %v3432_v63 = vrot.slane %v578_v47, 7  ;;  %v3451_v16 = vpack.c.b16 %v832_v18, %v3289_v37  ;;  %v591_v23 = vor.u32 %v589_v56, %v3438_v6  ;;  %v885_v18 = vshll.u32 %v3427_v52, 16  ;;  %v743_v47 = vld [vmem:[#allocation2 + $0x88] sm:$0xf]  ;;  %v2864_v61 = vld [vmem:[%s3969_s3 + $0xb8] sm:$0xff] }
  0x42   : > { %1367 = vmatmul.bf16.gmra.mxu0 %v1165_v21  ;;  %v771_v36 = vld [vmem:[#allocation2 + $0x40] sm:$0xf]  ;;  %v618_v41 = vshrl.u32 %v496_v25, 16  ;;  %v621_v42 = vshll.u32 %v496_v25, 16 }
  0x43   : > { %v583_v10 = vor.u32 %v581_v48, %v3432_v63  ;;  %v769_v30 = vld [vmem:[#allocation2 + $0x38] sm:$0xf]  ;;  %v726_v40 = vsel %vm3181_vm6, %v591_v23, %v725_v12  ;;  %v892_v48 = vshll.u32 %v3451_v16, 16  ;;  %v887_v58 = vrot.slane %v885_v18, 1 }
  0x44   : > { %1409 = vmatpush.bf16.msrb.mxu1 %v2874_v50  ;;  %1748 = vmatpush.bf16.msrb.mxu0 %v2850_v51  ;;  %v3462_v39 = vunpack.c.l.b16 %v769_v30  ;;  %727 = vst [vmem:[#allocation2 + $0x70] sm:$0xf] %v726_v40  ;;  %v3470_v46 = vrot.slane %v618_v41, 7  ;;  %v890_v9 = vshrl.u32 %v3451_v16, 16  ;;  %v442_v30 = vld [vmem:[#allocation2 + $0x24] sm:$0x1] }
  0x45   : > { %1699 = vmatpush.bf16.msrb.mxu3 %v2842_v26  ;;  %1458 = vmatpush.bf16.msrb.mxu2 %v2882_v43  ;;  %v720_v32 = vsel %vm3181_vm6, %v583_v10, %v719_v57  ;;  %v3466_v43 = vunpack.c.l.b16 %v771_v36  ;;  %v3468_v26 = vrot.slane %v610_v33, 7  ;;  %v883_v57 = vshrl.u32 %v3427_v52, 16  ;;  %v448_v33 = vld [vmem:[#allocation2 + $0x34] sm:$0x1] }
  0x46   : > { %721 = vst [vmem:[#allocation2 + $0x68] sm:$0xf] %v720_v32  ;;  %v749_v51 = vld [vmem:[#allocation2 + $0x90] sm:$0xf]  ;;  %v623_v56 = vor.u32 %v621_v42, %v3470_v46  ;;  %v445_v32 = vld [vmem:[#allocation2 + $0x2c] sm:$0x1] }
  0x47   : > { %v1171_v3 = vpack.c.b16 %v3466_v43, %v3462_v39  ;;  %v615_v50 = vor.u32 %v613_v35, %v3468_v26  ;;  %v3499_v23 = vor.u32 %v887_v58, %v883_v57  ;;  %v440_v40 = vsel %vm3114_vm4, 0, %v439_v17  ;;  %v2911_v17 = vld [vmem:[%s3969_s3 + $0x230] sm:$0xff] }
  0x48   : > { %1410 = vmatpush.bf16.msrb.mxu1 %v2873_v15  ;;  %1749 = vmatpush.bf16.msrb.mxu0 %v2849_v28  ;;  %v750_v10 = vsel %vm3181_vm6, %v623_v56, %v749_v51  ;;  %v3042_v15 = vmov 0   ;;  %v988_v51 = vrot.slane %v3427_v52, 1  ;;  %441 = vst [vmem:[#allocation2 + $0x1c] sm:$0x1] %v440_v40  ;;  %v449_v56 = vsel %vm3114_vm4, 0, %v448_v33 }
  0x49   : > { %1700 = vmatpush.bf16.msrb.mxu3 %v2841_v11  ;;  %1459 = vmatpush.bf16.msrb.mxu2 %v2881_v14  ;;  %v744_v4 = vsel %vm3181_vm6, %v615_v50, %v743_v47  ;;  %v894_v11 = vrot.slane %v892_v48, 1  ;;  %751 = vst [vmem:[#allocation2 + $0x90] sm:$0xf] %v750_v10  ;;  %v1005_v18 = vunpack.c.l.b16 %v3499_v23  ;;  %v443_v47 = vsel %vm3114_vm4, 0, %v442_v30  ;;  %v451_v52 = vld [vmem:[#allocation2 + $0x3c] sm:$0x1] }
  0x4a   : > { %1377 = vmatmul.bf16.gmra.mxu1 %v1171_v3  ;;  %745 = vst [vmem:[#allocation2 + $0x88] sm:$0xf] %v744_v4  ;;  %v446_v50 = vsel %vm3114_vm4, 0, %v445_v32  ;;  %v454_v4 = vld [vmem:[#allocation2 + $0x44] sm:$0x1]  ;;  %v2903_v10 = vld [vmem:[%s3969_s3 + $0x1f0] sm:$0xff]  ;;  %v3550_v30 = vunpack.c.l.b16 %v988_v51 }
  0x4b   : > { %v783_v13 = vld [vmem:[#allocation2 + $0x70] sm:$0xf]  ;;  %370 = vst [vmem:[#allocation2] sm:$0xf] %v3042_v15  ;;  %v3501_v25 = vor.u32 %v894_v11, %v890_v9  ;;  %v560_v51 = vrot.slane %v3377_v1, 4 }
  0x4c   : > { %1791 = vmatpush.bf16.msra.mxu1 %v2864_v61  ;;  %2173 = vmatpush.bf16.msra.mxu0 %v2912_v0  ;;  %v3497_v21 = vunpack.c.l.b16 %v783_v13  ;;  %371 = vst [vmem:[#allocation2 + $0x4] sm:$0x1] %v3042_v15  ;;  %v989_v61 = vrot.slane %v3451_v16, 1  ;;  %v2895_v11 = vld [vmem:[%s3969_s3 + $0x1b0] sm:$0xff]  ;;  %v520_v13 = vrot.slane %v3343_v24, 4  ;;  %v536_v24 = vrot.slane %v3185_v19, 4 }
  0x4d   : > { %2075 = vmatpush.bf16.msra.mxu2 %v2896_v53  ;;  %2124 = vmatpush.bf16.msra.mxu3 %v2904_v55  ;;  %v781_v12 = vld [vmem:[#allocation2 + $0x68] sm:$0xf]  ;;  %372 = vst [vmem:[#allocation2 + $0x50] sm:$0xf] %v3042_v15  ;;  %v1007_v36 = vunpack.c.l.b16 %v3501_v25  ;;  %v2863_v16 = vld [vmem:[%s3969_s3 + $0xb0] sm:$0xff] }
  0x4e   : > { %v3495_v14 = vunpack.c.l.b16 %v781_v12  ;;  %373 = vst [vmem:[#allocation2 + $0x54] sm:$0x1] %v3042_v15  ;;  %v452_v12 = vsel %vm3114_vm4, 0, %v451_v52  ;;  %v3552_v32 = vunpack.c.l.b16 %v989_v61  ;;  %v460_v23 = vld [vmem:[#allocation2 + $0x64] sm:$0x1] }
  0x4f   : > { %375 = vst [vmem:[#allocation2 + $0x48] sm:$0xf] %v3042_v15  ;;  %v1163_v58 = vpack.c.b16 %v1007_v36, %v1005_v18 }
  0x50   : > { %v1177_v28 = vpack.c.b16 %v3497_v21, %v3495_v14  ;;  %376 = vst [vmem:[#allocation2 + $0x4c] sm:$0x1] %v3042_v15  ;;  %v791_v41 = vld [vmem:[#allocation2 + $0x90] sm:$0xf]  ;;  %1792 = vmatpush.bf16.msra.mxu1 %v2863_v16  ;;  %2174 = vmatpush.bf16.msra.mxu0 %v2911_v17 }
  0x51   : > { %v789_v35 = vld [vmem:[#allocation2 + $0x88] sm:$0xf]  ;;  %377 = vst [vmem:[#allocation2 + $0x98] sm:$0xf] %v3042_v15  ;;  %v3513_v48 = vunpack.c.l.b16 %v791_v41  ;;  %2076 = vmatpush.bf16.msra.mxu2 %v2895_v11  ;;  %2125 = vmatpush.bf16.msra.mxu3 %v2903_v10  ;;  %v674_v41 = vld [vmem:[#allocation2 + $0x1c] sm:$0x1] }
  0x52   : > { %1387 = vmatmul.bf16.gmra.mxu2 %v1177_v28  ;;  %v3509_v42 = vunpack.c.l.b16 %v789_v35  ;;  %v3515_v3 = vld [vmem:[#allocation2] sm:$0xf]  ;;  %378 = vst [vmem:[#allocation2 + $0x9c] sm:$0x1] %v3042_v15  ;;  %v528_v15 = vrot.slane %v3345_v29, 4  ;;  %v455_v28 = vsel %vm3114_vm4, 0, %v454_v4 }
  0x53   : > { %v756_v53 = vld [vmem:[#allocation2 + $0x4] sm:$0x1]  ;;  %v827_v55 = vunpack.c.l.b16 %v3515_v3  ;;  %444 = vst [vmem:[#allocation2 + $0x24] sm:$0x1] %v443_v47  ;;  %v544_v29 = vrot.slane %v3187_v20, 4  ;;  %v552_v47 = vrot.slane %v3372_v59, 4  ;;  %v675_v3 = vsel %vm3098_vm2, %v520_v13, %v674_v41 }
  0x54   : > { %v1183_v57 = vpack.c.b16 %v3513_v48, %v3509_v42  ;;  %v828_v0 = vunpack.c.l.b16 %v756_v53  ;;  %447 = vst [vmem:[#allocation2 + $0x2c] sm:$0x1] %v446_v50  ;;  %v1164_v53 = vpack.c.b16 %v3552_v32, %v3550_v30 }
  0x55   : > { %450 = vst [vmem:[#allocation2 + $0x34] sm:$0x1] %v449_v56  ;;  %v1501_v10 = vpack.c.b16 %v3277_v27, %v827_v55  ;;  %v2894_v27 = vld [vmem:[%s3969_s3 + $0x1a8] sm:$0xff] }
  0x56   : > { %1397 = vmatmul.bf16.gmra.mxu3 %v1183_v57  ;;  %v3530_v9 = vpack.c.b16 %v828_v0, %v827_v55  ;;  %453 = vst [vmem:[#allocation2 + $0x3c] sm:$0x1] %v452_v12  ;;  %v3579_v12 = vpack.c.b16 %v3302_v49, %v3436_v5  ;;  %v2902_v55 = vld [vmem:[%s3969_s3 + $0x1e8] sm:$0xff]  ;;  %2077 = vmatpush.bf16.msra.mxu2 %v2894_v27 }
  0x57   : > { %456 = vst [vmem:[#allocation2 + $0x44] sm:$0x1] %v455_v28  ;;  %2126 = vmatpush.bf16.msra.mxu3 %v2902_v55 }
  0x58   : > { %v876_v33 = vshrl.u32 %v3530_v9, 16  ;;  %v878_v35 = vshll.u32 %v3530_v9, 16  ;;  %676 = vst [vmem:[#allocation2 + $0x1c] sm:$0x1] %v675_v3  ;;  %v2862_v3 = vld [vmem:[%s3969_s3 + $0xa8] sm:$0xff] }
  0x59   : > { %1793 = vmatpush.bf16.msra.mxu1 %v2862_v3  ;;  %v463_v3 = vld [vmem:[#allocation2 + $0x6c] sm:$0x1] }
  0x5a   : > { %1411 = vmatmul.bf16.vlgmr.msrb.gmra.mxu1 %v1163_v58  ;;  %v880_v40 = vrot.slane %v878_v35, 1  ;;  %v680_v50 = vld [vmem:[#allocation2 + $0x24] sm:$0x1] }
  0x5b   : > { %v681_v19 = vsel %vm3098_vm2, %v528_v15, %v680_v50  ;;  %v686_v20 = vld [vmem:[#allocation2 + $0x2c] sm:$0x1] }
  0x5c   : > { %v881_v56 = vor.u32 %v880_v40, %v876_v33  ;;  %682 = vst [vmem:[#allocation2 + $0x24] sm:$0x1] %v681_v19  ;;  %v687_v57 = vsel %vm3098_vm2, %v536_v24, %v686_v20  ;;  %v692_v59 = vld [vmem:[#allocation2 + $0x34] sm:$0x1]  ;;  %v457_v33 = vld [vmem:[#allocation2 + $0x5c] sm:$0x1] }
  0x5d   : > { %688 = vst [vmem:[#allocation2 + $0x2c] sm:$0x1] %v687_v57  ;;  %v693_v61 = vsel %vm3098_vm2, %v544_v29, %v692_v59  ;;  %v698_v1 = vld [vmem:[#allocation2 + $0x3c] sm:$0x1]  ;;  %v458_v29 = vsel %vm3114_vm4, 0, %v457_v33  ;;  %v461_v40 = vsel %vm3114_vm4, 0, %v460_v23 }
  0x5e   : > { %v1003_v58 = vunpack.c.l.b16 %v881_v56  ;;  %694 = vst [vmem:[#allocation2 + $0x34] sm:$0x1] %v693_v61  ;;  %v699_v0 = vsel %vm3098_vm2, %v552_v47, %v698_v1  ;;  %v704_v52 = vld [vmem:[#allocation2 + $0x44] sm:$0x1]  ;;  %v2910_v50 = vld [vmem:[%s3969_s3 + $0x228] sm:$0xff] }
  0x5f   : > { %700 = vst [vmem:[#allocation2 + $0x3c] sm:$0x1] %v699_v0  ;;  %v705_v11 = vsel %vm3098_vm2, %v560_v51, %v704_v52  ;;  %v762_v16 = vld [vmem:[#allocation2 + $0x1c] sm:$0x1]  ;;  %2175 = vmatpush.bf16.msra.mxu0 %v2910_v50  ;;  %v568_v52 = vrot.slane %v3215_v44, 4  ;;  %v2901_v50 = vld [vmem:[%s3969_s3 + $0x1e0] sm:$0xff] }
  0x60   : > { %v1502_v4 = vpack.c.b16 %v1005_v18, %v1003_v58  ;;  %706 = vst [vmem:[#allocation2 + $0x44] sm:$0x1] %v705_v11  ;;  %v834_v15 = vunpack.c.l.b16 %v762_v16  ;;  %2127 = vmatpush.bf16.msra.mxu3 %v2901_v50 }
  0x61   : > { %459 = vst [vmem:[#allocation2 + $0x5c] sm:$0x1] %v458_v29 }
  0x62   : > { %1460 = vmatmul.bf16.vlgmr.msrb.gmra.mxu2 %v1164_v53  ;;  %1750 = vmatmul.bf16.vlgmr.msrb.gmra.mxu0 %v1502_v4  ;;  %v862_v18 = vpack.c.b16 %v834_v15, %v3430_v62  ;;  %462 = vst [vmem:[#allocation2 + $0x64] sm:$0x1] %v461_v40 }
  0x63   : > { %v764_v13 = vld [vmem:[#allocation2 + $0x24] sm:$0x1] }
  0x64   : > { %v836_v17 = vunpack.c.l.b16 %v764_v13  ;;  %v766_v28 = vld [vmem:[#allocation2 + $0x2c] sm:$0x1]  ;;  %v897_v51 = vshrl.u32 %v862_v18, 16  ;;  %v899_v53 = vshll.u32 %v862_v18, 16  ;;  %v990_v56 = vrot.slane %v862_v18, 1 }
  0x65   : > { %v768_v35 = vld [vmem:[#allocation2 + $0x34] sm:$0x1]  ;;  %v838_v24 = vunpack.c.l.b16 %v766_v28 }
  0x66   : > { %1701 = vmatmul.bf16.vlgmr.msrb.gmra.mxu3 %v1501_v10  ;;  %v863_v41 = vpack.c.b16 %v836_v17, %v3436_v5  ;;  %v840_v47 = vunpack.c.l.b16 %v768_v35  ;;  %v901_v5 = vrot.slane %v899_v53, 1  ;;  %v1010_v59 = vunpack.c.l.b16 %v990_v56 }
  0x67   : > { %v864_v58 = vpack.c.b16 %v838_v24, %v3302_v49  ;;  %v576_v49 = vrot.slane %v3217_v45, 4  ;;  %v3617_v35 = vpack.c.b16 %v3430_v62, %v3289_v37  ;;  %v770_v45 = vld [vmem:[#allocation2 + $0x3c] sm:$0x1]  ;;  %v772_v40 = vld [vmem:[#allocation2 + $0x44] sm:$0x1]  ;;  %v464_v53 = vsel %vm3114_vm4, 0, %v463_v3 }
  0x68   : > { %v904_v19 = vshrl.u32 %v863_v41, 16  ;;  %v906_v20 = vshll.u32 %v863_v41, 16  ;;  %v991_v57 = vrot.slane %v863_v41, 1  ;;  %v865_v0 = vpack.c.b16 %v840_v47, %v3312_v54  ;;  %v710_v17 = vld [vmem:[#allocation2 + $0x5c] sm:$0x1]  ;;  %v2893_v62 = vld [vmem:[%s3969_s3 + $0x1a0] sm:$0xff] }
  0x69   : > { %v902_v4 = vor.u32 %v901_v5, %v897_v51  ;;  %v3605_v11 = vpack.c.b16 %v1010_v59, %v3552_v32  ;;  %v913_v15 = vshll.u32 %v864_v58, 16  ;;  %v711_v44 = vsel %vm3098_vm2, %v568_v52, %v710_v17  ;;  %v716_v18 = vld [vmem:[#allocation2 + $0x64] sm:$0x1]  ;;  %2078 = vmatpush.bf16.msra.mxu2 %v2893_v62  ;;  %465 = vst [vmem:[#allocation2 + $0x6c] sm:$0x1] %v464_v53  ;;  %v2900_v53 = vld [vmem:[%s3969_s3 + $0x1d8] sm:$0xff] }
  0x6a   : > { %v908_v61 = vrot.slane %v906_v20, 1  ;;  %v3600_v1 = vunpack.c.l.b16 %v991_v57  ;;  %v920_v33 = vshll.u32 %v865_v0, 16  ;;  %712 = vst [vmem:[#allocation2 + $0x5c] sm:$0x1] %v711_v44  ;;  %v911_v24 = vshrl.u32 %v864_v58, 16  ;;  %v2861_v51 = vld [vmem:[%s3969_s3 + $0xa0] sm:$0xff]  ;;  %2128 = vmatpush.bf16.msra.mxu3 %v2900_v53 }
  0x6b   : > { %v1009_v13 = vunpack.c.l.b16 %v902_v4  ;;  %v915_v27 = vrot.slane %v913_v15, 1  ;;  %v918_v55 = vshrl.u32 %v865_v0, 16  ;;  %v993_v29 = vrot.slane %v865_v0, 1  ;;  %v2909_v20 = vld [vmem:[%s3969_s3 + $0x220] sm:$0xff]  ;;  %1794 = vmatpush.bf16.msra.mxu1 %v2861_v51  ;;  %v469_v3 = vld [vmem:[#allocation2 + $0x7c] sm:$0x1] }
  0x6c   : > { %v909_v10 = vor.u32 %v908_v61, %v904_v19  ;;  %v1167_v16 = vpack.c.b16 %v3600_v1, %v1010_v59  ;;  %v922_v25 = vrot.slane %v920_v33, 1  ;;  %v717_v41 = vsel %vm3098_vm2, %v576_v49, %v716_v18  ;;  %v466_v59 = vld [vmem:[#allocation2 + $0x74] sm:$0x1]  ;;  %2176 = vmatpush.bf16.msra.mxu0 %v2909_v20  ;;  %v2892_v51 = vld [vmem:[%s3969_s3 + $0x198] sm:$0xff] }
  0x6d   : > { %v3611_v23 = vpack.c.b16 %v1009_v13, %v1007_v36  ;;  %v992_v36 = vrot.slane %v864_v58, 1  ;;  %v842_v47 = vunpack.c.l.b16 %v770_v45  ;;  %718 = vst [vmem:[#allocation2 + $0x64] sm:$0x1] %v717_v41  ;;  %v916_v37 = vor.u32 %v915_v27, %v911_v24  ;;  %v776_v27 = vld [vmem:[#allocation2 + $0x54] sm:$0x1]  ;;  %2079 = vmatpush.bf16.msra.mxu2 %v2892_v51 }
  0x6e   : > { %v1011_v28 = vunpack.c.l.b16 %v909_v10  ;;  %v3634_v56 = vor.u32 %v922_v25, %v918_v55  ;;  %v1088_v19 = vunpack.c.l.b16 %v772_v40  ;;  %v3641_v5 = vunpack.c.l.b16 %v993_v29 }
  0x6f   : > { %v3639_v57 = vunpack.c.l.b16 %v992_v36  ;;  %v866_v58 = vpack.c.b16 %v842_v47, %v3462_v39  ;;  %v467_v61 = vsel %vm3114_vm4, 0, %v466_v59  ;;  %v1013_v0 = vunpack.c.l.b16 %v916_v37  ;;  %v472_v37 = vld [vmem:[#allocation2 + $0x84] sm:$0x1] }
  0x70   : > { %v1166_v32 = vpack.c.b16 %v1011_v28, %v1009_v13  ;;  %468 = vst [vmem:[#allocation2 + $0x74] sm:$0x1] %v467_v61  ;;  %v1015_v52 = vunpack.c.l.b16 %v3634_v56  ;;  %v1091_v4 = vpack.c.b16 %v1088_v19, %v3466_v43  ;;  %v584_v10 = vrot.slane %v3432_v63, 4  ;;  %v722_v49 = vld [vmem:[#allocation2 + $0x6c] sm:$0x1]  ;;  %v2860_v56 = vld [vmem:[%s3969_s3 + $0x98] sm:$0xff] }
  0x71   : > { %v927_v13 = vshll.u32 %v866_v58, 16  ;;  %v3651_v15 = vpack.c.b16 %v1013_v0, %v1011_v28  ;;  %v592_v44 = vrot.slane %v3438_v6, 4  ;;  %v925_v18 = vshrl.u32 %v866_v58, 16  ;;  %v3657_v63 = vld [vmem:[#allocation2 + $0x50] sm:$0xf]  ;;  %v2908_v61 = vld [vmem:[%s3969_s3 + $0x218] sm:$0xff]  ;;  %1795 = vmatpush.bf16.msra.mxu1 %v2860_v56 }
  0x72   : > { %1465 = vmatmul.bf16.gmra.mxu2 %v1167_v16  ;;  %1755 = vmatmul.bf16.gmra.mxu0 %v3611_v23  ;;  %v1170_v16 = vpack.c.b16 %v3641_v5, %v3639_v57  ;;  %v1169_v17 = vpack.c.b16 %v1015_v52, %v1013_v0  ;;  %v1096_v33 = vshll.u32 %v1091_v4, 16  ;;  %v1094_v28 = vshrl.u32 %v1091_v4, 16  ;;  %v778_v25 = vld [vmem:[#allocation2 + $0x5c] sm:$0x1]  ;;  %v475_v56 = vld [vmem:[#allocation2 + $0x8c] sm:$0x1] }
  0x73   : > { %1416 = vmatmul.bf16.gmra.mxu1 %v1166_v32  ;;  %v723_v32 = vsel %vm3098_vm2, %v584_v10, %v722_v49  ;;  %v929_v24 = vrot.slane %v927_v13, 1  ;;  %v994_v36 = vrot.slane %v866_v58, 1  ;;  %v1107_v29 = vrot.slane %v1091_v4, 1  ;;  %2177 = vmatpush.bf16.msra.mxu0 %v2908_v61  ;;  %v2859_v61 = vld [vmem:[%s3969_s3 + $0x90] sm:$0xff] }
  0x74   : > { %724 = vst [vmem:[#allocation2 + $0x6c] sm:$0x1] %v723_v32  ;;  %v1098_v55 = vrot.slane %v1096_v33, 1  ;;  %v780_v6 = vld [vmem:[#allocation2 + $0x64] sm:$0x1]  ;;  %v843_v41 = vunpack.c.l.b16 %v3657_v63  ;;  %v844_v47 = vunpack.c.l.b16 %v776_v27  ;;  %v846_v50 = vunpack.c.l.b16 %v778_v25  ;;  %v2858_v63 = vld [vmem:[%s3969_s3 + $0x88] sm:$0xff] }
  0x75   : > { %v930_v62 = vor.u32 %v929_v24, %v925_v18  ;;  %v470_v19 = vsel %vm3114_vm4, 0, %v469_v3  ;;  %v473_v20 = vsel %vm3114_vm4, 0, %v472_v37  ;;  %v848_v58 = vunpack.c.l.b16 %v780_v6  ;;  %1796 = vmatpush.bf16.msra.mxu1 %v2859_v61 }
  0x76   : > { %1706 = vmatmul.bf16.gmra.mxu3 %v3617_v35  ;;  %v3676_v59 = vor.u32 %v1098_v55, %v1094_v28  ;;  %471 = vst [vmem:[#allocation2 + $0x7c] sm:$0x1] %v470_v19  ;;  %v3681_v0 = vunpack.c.l.b16 %v994_v36  ;;  %v3683_v4 = vunpack.c.l.b16 %v1107_v29  ;;  %v3687_v10 = vpack.c.b16 %v844_v47, %v843_v41  ;;  %v478_v19 = vld [vmem:[#allocation2 + $0x94] sm:$0x1] }
  0x77   : > { %v728_v45 = vld [vmem:[#allocation2 + $0x74] sm:$0x1]  ;;  %474 = vst [vmem:[#allocation2 + $0x84] sm:$0x1] %v473_v20  ;;  %v868_v13 = vpack.c.b16 %v846_v50, %v3315_v60  ;;  %v869_v49 = vpack.c.b16 %v848_v58, %v3332_v7 }
  0x78   : > { %v729_v40 = vsel %vm3098_vm2, %v592_v44, %v728_v45  ;;  %v1109_v33 = vunpack.c.l.b16 %v3676_v59  ;;  %v608_v44 = vrot.slane %v3291_v38, 4  ;;  %v1173_v32 = vpack.c.b16 %v3683_v4, %v3681_v0 }
  0x79   : > { %730 = vst [vmem:[#allocation2 + $0x74] sm:$0x1] %v729_v40  ;;  %v934_v18 = vshll.u32 %v3687_v10, 16  ;;  %v941_v27 = vshll.u32 %v868_v13, 16  ;;  %v948_v55 = vshll.u32 %v869_v49, 16  ;;  %v932_v36 = vshrl.u32 %v3687_v10, 16  ;;  %1797 = vmatpush.bf16.msra.mxu1 %v2858_v63 }
  0x7a   : > { %v939_v6 = vshrl.u32 %v868_v13, 16  ;;  %v946_v47 = vshrl.u32 %v869_v49, 16  ;;  %v997_v50 = vrot.slane %v869_v49, 1 }
  0x7b   : > { %v936_v29 = vrot.slane %v934_v18, 1  ;;  %v943_v40 = vrot.slane %v941_v27, 1  ;;  %v950_v3 = vrot.slane %v948_v55, 1  ;;  %v782_v37 = vld [vmem:[#allocation2 + $0x6c] sm:$0x1] }
  0x7c   : > { %v850_v58 = vunpack.c.l.b16 %v782_v37  ;;  %v3730_v18 = vunpack.c.l.b16 %v997_v50 }
  0x7d   : > { %v734_v45 = vld [vmem:[#allocation2 + $0x7c] sm:$0x1]  ;;  %v937_v53 = vor.u32 %v936_v29, %v932_v36  ;;  %v944_v20 = vor.u32 %v943_v40, %v939_v6 }
  0x7e   : > { %v740_v25 = vld [vmem:[#allocation2 + $0x84] sm:$0x1]  ;;  %v870_v8 = vpack.c.b16 %v850_v58, %v3495_v14 }
  0x7f   : > { %v741_v38 = vsel %vm3098_vm2, %v608_v44, %v740_v25  ;;  %v2907_v44 = vld [vmem:[%s3969_s3 + $0x210] sm:$0xff]  ;;  %v1021_v27 = vunpack.c.l.b16 %v944_v20  ;;  %v624_v25 = vrot.slane %v3470_v46, 4  ;;  %v1513_v46 = vpack.c.b16 %v3315_v60, %v843_v41  ;;  %v2898_v60 = vld [vmem:[%s3969_s3 + $0x1c8] sm:$0xff] }
  0x80   : > { %742 = vst [vmem:[#allocation2 + $0x84] sm:$0x1] %v741_v38  ;;  %v784_v51 = vld [vmem:[#allocation2 + $0x74] sm:$0x1]  ;;  %2178 = vmatpush.bf16.msra.mxu0 %v2907_v44  ;;  %v955_v29 = vshll.u32 %v870_v8, 16 }
  0x81   : > { %v852_v49 = vunpack.c.l.b16 %v784_v51 }
  0x82   : > { %1470 = vmatmul.bf16.gmra.mxu2 %v1170_v16  ;;  %1760 = vmatmul.bf16.gmra.mxu0 %v3651_v15  ;;  %v1017_v16 = vunpack.c.l.b16 %v930_v62  ;;  %v996_v62 = vrot.slane %v868_v13, 1  ;;  %v479_v13 = vsel %vm3114_vm4, 0, %v478_v19  ;;  %v957_v50 = vrot.slane %v955_v29, 1 }
  0x83   : > { %1421 = vmatmul.bf16.gmra.mxu1 %v1169_v17  ;;  %v600_v17 = vrot.slane %v3286_v34, 4  ;;  %480 = vst [vmem:[#allocation2 + $0x94] sm:$0x1] %v479_v13  ;;  %v998_v19 = vrot.slane %v870_v8, 1  ;;  %v3771_v29 = vpack.c.b16 %v3495_v14, %v3332_v7  ;;  %v2889_v7 = vld [vmem:[%s3969_s3 + $0x180] sm:$0xff] }
  0x84   : > { %v3697_v24 = vpack.c.b16 %v1017_v16, %v1015_v52  ;;  %v1172_v28 = vpack.c.b16 %v1109_v33, %v1017_v16  ;;  %v3708_v52 = vpack.c.b16 %v3462_v39, %v3312_v54  ;;  %v2891_v54 = vld [vmem:[%s3969_s3 + $0x190] sm:$0xff]  ;;  %v476_v16 = vsel %vm3114_vm4, 0, %v475_v56  ;;  %v2897_v14 = vld [vmem:[%s3969_s3 + $0x1c0] sm:$0xff] }
  0x85   : > { %v735_v34 = vsel %vm3098_vm2, %v600_v17, %v734_v45  ;;  %v2899_v39 = vld [vmem:[%s3969_s3 + $0x1d0] sm:$0xff]  ;;  %v951_v17 = vor.u32 %v950_v3, %v946_v47  ;;  %477 = vst [vmem:[#allocation2 + $0x8c] sm:$0x1] %v476_v16  ;;  %2080 = vmatpush.bf16.msra.mxu2 %v2891_v54  ;;  %v1019_v45 = vunpack.c.l.b16 %v937_v53  ;;  %v2906_v16 = vld [vmem:[%s3969_s3 + $0x208] sm:$0xff]  ;;  %v3757_v13 = vunpack.c.l.b16 %v998_v19 }
  0x86   : > { %1711 = vmatmul.bf16.gmra.mxu3 %v3579_v12  ;;  %736 = vst [vmem:[#allocation2 + $0x7c] sm:$0x1] %v735_v34  ;;  %v871_v34 = vpack.c.b16 %v852_v49, %v3497_v21  ;;  %2179 = vmatpush.bf16.msra.mxu0 %v2906_v16 }
  0x87   : > { %2129 = vmatpush.bf16.msra.mxu3 %v2899_v39  ;;  %v1023_v55 = vunpack.c.l.b16 %v951_v17  ;;  %v1514_v36 = vpack.c.b16 %v1021_v27, %v1019_v45  ;;  %v788_v58 = vld [vmem:[#allocation2 + $0x84] sm:$0x1] }
  0x88   : > { %v962_v47 = vshll.u32 %v871_v34, 16  ;;  %v960_v51 = vshrl.u32 %v871_v34, 16  ;;  %v999_v20 = vrot.slane %v871_v34, 1  ;;  %v856_v61 = vunpack.c.l.b16 %v788_v58  ;;  %v2857_v58 = vld [vmem:[%s3969_s3 + $0x80] sm:$0xff] }
  0x89   : > { %v1175_v40 = vpack.c.b16 %v1023_v55, %v1021_v27  ;;  %2081 = vmatpush.bf16.msra.mxu2 %v2890_v2  ;;  %1798 = vmatpush.bf16.msra.mxu1 %v2857_v58 }
  0x8a   : > { %v752_v37 = vld [vmem:[#allocation2 + $0x94] sm:$0x1]  ;;  %v964_v53 = vrot.slane %v962_v47, 1  ;;  %v3759_v17 = vunpack.c.l.b16 %v999_v20  ;;  %v873_v45 = vpack.c.b16 %v856_v61, %v3401_v31 }
  0x8b   : > { %2130 = vmatpush.bf16.msra.mxu3 %v2898_v60 }
  0x8c   : > { %v746_v6 = vld [vmem:[#allocation2 + $0x8c] sm:$0x1]  ;;  %v965_v41 = vor.u32 %v964_v53, %v960_v51  ;;  %v974_v47 = vshrl.u32 %v873_v45, 16 }
  0x8d   : > { %v786_v56 = vld [vmem:[#allocation2 + $0x7c] sm:$0x1]  ;;  %2082 = vmatpush.bf16.msra.mxu2 %v2889_v7 }
  0x8e   : > { %v854_v39 = vunpack.c.l.b16 %v786_v56  ;;  %v1027_v27 = vunpack.c.l.b16 %v965_v41 }
  0x8f   : > { %2131 = vmatpush.bf16.msra.mxu3 %v2897_v14 }
  0x90   : > { %v872_v44 = vpack.c.b16 %v854_v39, %v3392_v22 }
  0x92   : > { %1475 = vmatmul.bf16.gmra.mxu2 %v1173_v32  ;;  %1765 = vmatmul.bf16.gmra.mxu0 %v3697_v24  ;;  %v3728_v32 = vunpack.c.l.b16 %v996_v62  ;;  %v953_v62 = vshrl.u32 %v870_v8, 16  ;;  %v1179_v8 = vpack.c.b16 %v3759_v17, %v3757_v13  ;;  %v969_v34 = vshll.u32 %v872_v44, 16 }
  0x93   : > { %1426 = vmatmul.bf16.gmra.mxu1 %v1172_v28  ;;  %v616_v28 = vrot.slane %v3468_v26, 4  ;;  %v753_v26 = vsel %vm3098_vm2, %v624_v25, %v752_v37 }
  0x94   : > { %v1176_v38 = vpack.c.b16 %v3730_v18, %v3728_v32  ;;  %754 = vst [vmem:[#allocation2 + $0x94] sm:$0x1] %v753_v26  ;;  %v958_v54 = vor.u32 %v957_v50, %v953_v62  ;;  %v1001_v26 = vrot.slane %v873_v45, 1 }
  0x95   : > { %v747_v3 = vsel %vm3098_vm2, %v616_v28, %v746_v6  ;;  %v967_v6 = vshrl.u32 %v872_v44, 16 }
  0x96   : > { %1716 = vmatmul.bf16.gmra.mxu3 %v3708_v52  ;;  %748 = vst [vmem:[#allocation2 + $0x8c] sm:$0x1] %v747_v3  ;;  %v1025_v49 = vunpack.c.l.b16 %v958_v54  ;;  %v3783_v20 = vunpack.c.l.b16 %v1001_v26  ;;  %v2905_v54 = vld [vmem:[%s3969_s3 + $0x200] sm:$0xff] }
  0x97   : > { %2180 = vmatpush.bf16.msra.mxu0 %v2905_v54 }
  0x98   : > { %v3765_v28 = vpack.c.b16 %v1025_v49, %v1023_v55  ;;  %v1178_v25 = vpack.c.b16 %v1027_v27, %v1025_v49  ;;  %v1000_v55 = vrot.slane %v872_v44, 1 }
  0x9a   : > { %v3781_v19 = vunpack.c.l.b16 %v1000_v55 }
  0x9c   : > { %v1182_v61 = vpack.c.b16 %v3783_v20, %v3781_v19 }
  0x9d   : > { %v790_v37 = vld [vmem:[#allocation2 + $0x8c] sm:$0x1] }
  0x9e   : > { %v858_v50 = vunpack.c.l.b16 %v790_v37 }
  0xa0   : > { %v874_v2 = vpack.c.b16 %v858_v50, %v3509_v42 }
  0xa2   : > { %1480 = vmatmul.bf16.gmra.mxu2 %v1176_v38  ;;  %1770 = vmatmul.bf16.gmra.mxu0 %v1514_v36  ;;  %v976_v38 = vshll.u32 %v873_v45, 16  ;;  %v983_v49 = vshll.u32 %v874_v2, 16 }
  0xa3   : > { %1431 = vmatmul.bf16.gmra.mxu1 %v1175_v40  ;;  %v971_v40 = vrot.slane %v969_v34, 1 }
  0xa4   : > { %v978_v3 = vrot.slane %v976_v38, 1  ;;  %v981_v38 = vshrl.u32 %v874_v2, 16 }
  0xa5   : > { %v972_v62 = vor.u32 %v971_v40, %v967_v6  ;;  %v985_v6 = vrot.slane %v983_v49, 1 }
  0xa6   : > { %1721 = vmatmul.bf16.gmra.mxu3 %v1513_v46  ;;  %v792_v46 = vld [vmem:[#allocation2 + $0x94] sm:$0x1]  ;;  %v979_v53 = vor.u32 %v978_v3, %v974_v47 }
  0xa7   : > { %v1090_v56 = vunpack.c.l.b16 %v792_v46  ;;  %v1029_v39 = vunpack.c.l.b16 %v972_v62  ;;  %v986_v26 = vor.u32 %v985_v6, %v981_v38 }
  0xa8   : > { %v1031_v60 = vunpack.c.l.b16 %v979_v53 }
  0xa9   : > { %v1092_v41 = vpack.c.b16 %v1090_v56, %v3513_v48  ;;  %v3797_v16 = vpack.c.b16 %v1029_v39, %v1027_v27  ;;  %v1002_v27 = vrot.slane %v874_v2, 1  ;;  %v1033_v50 = vunpack.c.l.b16 %v986_v26 }
  0xaa   : > { %v1181_v44 = vpack.c.b16 %v1031_v60, %v1029_v39  ;;  %v3832_v2 = vpack.c.b16 %v3509_v42, %v3401_v31 }
  0xab   : > { %v1101_v40 = vshrl.u32 %v1092_v41, 16  ;;  %v1108_v3 = vrot.slane %v1092_v41, 1  ;;  %v3824_v58 = vpack.c.b16 %v1033_v50, %v1031_v60 }
  0xac   : > { %v1363_v51 = vpop.f32.mrf.mxu0 }
  0xaf   : > { %v3767_v36 = vpop.f32.mrf.mxu1 }
  0xb2   : > { %1485 = vmatmul.bf16.gmra.mxu2 %v1179_v8  ;;  %1775 = vmatmul.bf16.gmra.mxu0 %v3765_v28  ;;  %v1103_v8 = vshll.u32 %v1092_v41, 16 }
  0xb3   : > { %1436 = vmatmul.bf16.gmra.mxu1 %v1178_v25  ;;  %v3803_v25 = vpack.c.b16 %v3392_v22, %v3497_v21  ;;  %v3813_v22 = vunpack.c.l.b16 %v1002_v27  ;;  %v3815_v21 = vunpack.c.l.b16 %v1108_v3 }
  0xb4   : > { %v1365_v34 = vpop.f32.mrf.mxu0  ;;  %v1105_v47 = vrot.slane %v1103_v8, 1 }
  0xb5   : > { %v1185_v53 = vpack.c.b16 %v3815_v21, %v3813_v22 }
  0xb6   : > { %1726 = vmatmul.bf16.gmra.mxu3 %v3771_v29  ;;  %v3811_v46 = vor.u32 %v1105_v47, %v1101_v40 }
  0xb7   : > { %v3792_v63 = vpop.f32.mrf.mxu1 }
  0xb8   : > { %v1111_v14 = vunpack.c.l.b16 %v3811_v46 }
  0xb9   : > { %v3799_v45 = vpop.f32.mrf.mxu2 }
  0xba   : > { %v1184_v39 = vpack.c.b16 %v1111_v14, %v1033_v50 }
  0xbf   : > { %v1368_v7 = vpop.f32.mrf.mxu0 }
  0xc1   : > { %v3817_v62 = vpop.f32.mrf.mxu2 }
  0xc2   : > { %1490 = vmatmul.bf16.gmra.mxu2 %v1182_v61  ;;  %1780 = vmatmul.bf16.gmra.mxu0 %v3797_v16  ;;  %v3806_v37 = vpop.f32.mrf.mxu3 }
  0xc3   : > { %1441 = vmatmul.bf16.gmra.mxu1 %v1181_v44  ;;  %v987_v44 = vrot.slane %v3530_v9, 1 }
  0xc5   : > { %v1004_v6 = vunpack.c.l.b16 %v987_v44 }
  0xc6   : > { %1731 = vmatmul.bf16.gmra.mxu3 %v3803_v25 }
  0xc7   : > { %v3808_v55 = vpop.f32.mrf.mxu1  ;;  %v1370_v61 = vpop.f32.mrf.mxu0  ;;  %v1503_v31 = vpack.c.b16 %v3550_v30, %v1004_v6 }
  0xca   : > { %v3826_v54 = vpop.f32.mrf.mxu3 }
  0xcf   : > { %v3822_v56 = vpop.f32.mrf.mxu1 }
  0xd2   : > { %1495 = vmatmul.bf16.gmra.mxu2 %v1185_v53  ;;  %1785 = vmatmul.bf16.gmra.mxu0 %v3824_v58 }
  0xd3   : > { %1446 = vmatmul.bf16.gmra.mxu1 %v1184_v39 }
  0xd5   : > { %v3835_v41 = vpop.f32.mrf.mxu2 }
  0xd6   : > { %1736 = vmatmul.bf16.gmra.mxu3 %v3832_v2 }
  0xd7   : > { %v1412_v49 = vpop.f32.mrf.mxu1 }
  0xd8   : > { %v1413_v60 = vadd.f32 %v1412_v49, %v1363_v51 }
  0xd9   : > { %v3839_v8 = vpop.f32.mrf.mxu3 }
  0xdd   : > { %v3841_v38 = vpop.f32.mrf.mxu2 }
  0xdf   : > { %v1751_v40 = vpop.f32.mrf.mxu0  ;;  %v1414_v9 = vpop.f32.mrf.mxu1 }
  0xe0   : > { %v1415_v53 = vadd.f32 %v1414_v9, %v1365_v34  ;;  %v774_v9 = vld [vmem:[#allocation2 + $0x4c] sm:$0x1] }
  0xe1   : > { %v3845_v42 = vpop.f32.mrf.mxu3 }
  0xe2   : > { %2083 = vmatmul.bf16.vlgmr.msra.gmra.mxu2 %v3617_v35  ;;  %2181 = vmatmul.bf16.vlgmr.msra.gmra.mxu0 %v3605_v11  ;;  %v1509_v35 = vpack.c.b16 %v3639_v57, %v3600_v1 }
  0xe3   : > { %1799 = vmatmul.bf16.vlgmr.msra.gmra.mxu1 %v1503_v31 }
  0xe5   : > { %v1461_v47 = vpop.f32.mrf.mxu2 }
  0xe6   : > { %v1462_v27 = vadd.f32 %v1461_v47, %v1413_v60  ;;  %2132 = vmatmul.bf16.vlgmr.msra.gmra.mxu3 %v3611_v23 }
  0xe7   : > { %v1753_v51 = vpop.f32.mrf.mxu0 }
  0xe9   : > { %v1702_v3 = vpop.f32.mrf.mxu3 }
  0xea   : > { %v1703_v26 = vadd.f32 %v1702_v3, %v1462_v27 }
  0xec   : > { %v3849_v39 = vadd.f32 %v1751_v40, %v1703_v26  ;;  %v773_v40 = vld [vmem:[#allocation2 + $0x48] sm:$0xf] }
  0xed   : > { %v1463_v50 = vpop.f32.mrf.mxu2 }
  0xee   : > { %v1464_v30 = vadd.f32 %v1463_v50, %v1415_v53  ;;  %v1845_v50 = vunpack.c.l.b16 %v774_v9 }
  0xef   : > { %v1756_v49 = vpop.f32.mrf.mxu0 }
  0xf0   : > { %v1417_v44 = vpop.f32.mrf.mxu1 }
  0xf1   : > { %v1704_v6 = vpop.f32.mrf.mxu3  ;;  %v1418_v60 = vadd.f32 %v1417_v44, %v1368_v7 }
  0xf2   : > { %2088 = vmatmul.bf16.gmra.mxu2 %v3579_v12  ;;  %v1705_v31 = vadd.f32 %v1704_v6, %v1464_v30  ;;  %2186 = vmatmul.bf16.gmra.mxu0 %v1509_v35  ;;  %v1844_v12 = vunpack.c.l.b16 %v773_v40 }
  0xf3   : > { %1804 = vmatmul.bf16.gmra.mxu1 %v3605_v11  ;;  %v1512_v11 = vpack.c.b16 %v3681_v0, %v3641_v5 }
  0xf4   : > { %v3855_v27 = vadd.f32 %v1753_v51, %v1705_v31  ;;  %v1848_v51 = vpack.c.b16 %v1845_v50, %v1844_v12 }
  0xf5   : > { %v1466_v23 = vpop.f32.mrf.mxu2 }
  0xf6   : > { %v1467_v47 = vadd.f32 %v1466_v23, %v1418_v60  ;;  %2137 = vmatmul.bf16.gmra.mxu3 %v3651_v15  ;;  %v1864_v0 = vrot.slane %v1848_v51, 1 }
  0xf7   : > { %v1758_v34 = vpop.f32.mrf.mxu0 }
  0xf8   : > { %v1419_v1 = vpop.f32.mrf.mxu1 }
  0xf9   : > { %v1707_v57 = vpop.f32.mrf.mxu3  ;;  %v1420_v3 = vadd.f32 %v1419_v1, %v1370_v61  ;;  %v1853_v61 = vshll.u32 %v1848_v51, 16 }
  0xfa   : > { %v1708_v26 = vadd.f32 %v1707_v57, %v1467_v47 }
  0xfb   : > { %v1855_v5 = vrot.slane %v1853_v61, 1 }
  0xfc   : > { %v3858_v30 = vadd.f32 %v1756_v49, %v1708_v26  ;;  %v1851_v49 = vshrl.u32 %v1848_v51, 16 }
  0xfd   : > { %v1468_v7 = vpop.f32.mrf.mxu2 }
  0xfe   : > { %v1469_v53 = vadd.f32 %v1468_v7, %v1420_v3  ;;  %v1856_v26 = vor.u32 %v1855_v5, %v1851_v49 }
  0xff   : > { %v1761_v44 = vpop.f32.mrf.mxu0 }
 0x100   : > { %v1422_v6 = vpop.f32.mrf.mxu1 }
 0x101   : > { %v1709_v15 = vpop.f32.mrf.mxu3  ;;  %v1423_v31 = vadd.f32 %v1422_v6, %v3767_v36  ;;  %v1867_v36 = vunpack.c.l.b16 %v1864_v0 }
 0x102   : > { %2093 = vmatmul.bf16.gmra.mxu2 %v3708_v52  ;;  %v1710_v60 = vadd.f32 %v1709_v15, %v1469_v53  ;;  %2191 = vmatmul.bf16.gmra.mxu0 %v1512_v11 }
 0x103   : > { %1809 = vmatmul.bf16.gmra.mxu1 %v1509_v35  ;;  %v1919_v35 = vpack.c.b16 %v1844_v12, %v3466_v43 }
 0x104   : > { %v3864_v40 = vadd.f32 %v1758_v34, %v1710_v60  ;;  %v1866_v34 = vunpack.c.l.b16 %v1856_v26 }
 0x105   : > { %v1471_v23 = vpop.f32.mrf.mxu2 }
 0x106   : > { %v1472_v47 = vadd.f32 %v1471_v23, %v1423_v31  ;;  %2142 = vmatmul.bf16.gmra.mxu3 %v3697_v24  ;;  %v1921_v24 = vpack.c.b16 %v1867_v36, %v3683_v4  ;;  %v995_v4 = vrot.slane %v3687_v10, 1 }
 0x107   : > { %v1763_v9 = vpop.f32.mrf.mxu0 }
 0x108   : > { %v1424_v1 = vpop.f32.mrf.mxu1 }
 0x109   : > { %v1712_v57 = vpop.f32.mrf.mxu3  ;;  %v1425_v3 = vadd.f32 %v1424_v1, %v3792_v63  ;;  %v1920_v63 = vpack.c.b16 %v1866_v34, %v1109_v33  ;;  %v1518_v33 = vpack.c.b16 %v3757_v13, %v3730_v18 }
 0x10a   : > { %v1713_v52 = vadd.f32 %v1712_v57, %v1472_v47 }
 0x10c   : > { %v3869_v53 = vadd.f32 %v1761_v44, %v1713_v52 }
 0x10d   : > { %v1473_v50 = vpop.f32.mrf.mxu2 }
 0x10e   : > { %v1474_v7 = vadd.f32 %v1473_v50, %v1425_v3 }
 0x10f   : > { %v1766_v6 = vpop.f32.mrf.mxu0 }
 0x110   : > { %v1427_v15 = vpop.f32.mrf.mxu1 }
 0x111   : > { %v1714_v51 = vpop.f32.mrf.mxu3  ;;  %v1428_v31 = vadd.f32 %v1427_v15, %v3808_v55  ;;  %v1020_v55 = vunpack.c.l.b16 %v995_v4 }
 0x112   : > { %2098 = vmatmul.bf16.gmra.mxu2 %v1919_v35  ;;  %v1715_v60 = vadd.f32 %v1714_v51, %v1474_v7  ;;  %2196 = vmatmul.bf16.gmra.mxu0 %v1921_v24 }
 0x113   : > { %1814 = vmatmul.bf16.gmra.mxu1 %v1512_v11 }
 0x114   : > { %v3875_v43 = vadd.f32 %v1763_v9, %v1715_v60  ;;  %v1515_v9 = vpack.c.b16 %v3728_v32, %v1020_v55 }
 0x115   : > { %v1476_v61 = vpop.f32.mrf.mxu2 }
 0x116   : > { %v1477_v23 = vadd.f32 %v1476_v61, %v1428_v31  ;;  %2147 = vmatmul.bf16.gmra.mxu3 %v1920_v63  ;;  %v793_v61 = vld [vmem:[#allocation2 + $0x98] sm:$0xf] }
 0x117   : > { %v1768_v12 = vpop.f32.mrf.mxu0  ;;  %v1846_v4 = vunpack.c.l.b16 %v793_v61 }
 0x118   : > { %v1429_v44 = vpop.f32.mrf.mxu1 }
 0x119   : > { %v1717_v47 = vpop.f32.mrf.mxu3  ;;  %v1430_v5 = vadd.f32 %v1429_v44, %v3822_v56 }
 0x11a   : > { %v1718_v49 = vadd.f32 %v1717_v47, %v1477_v23  ;;  %v794_v23 = vld [vmem:[#allocation2 + $0x9c] sm:$0x1] }
 0x11b   : > { %v1847_v44 = vunpack.c.l.b16 %v794_v23 }
 0x11c   : > { %v3879_v59 = vadd.f32 %v1766_v6, %v1718_v49 }
 0x11d   : > { %v1478_v0 = vpop.f32.mrf.mxu2 }
 0x11e   : > { %v1479_v1 = vadd.f32 %v1478_v0, %v1430_v5  ;;  %v1524_v5 = vpack.c.b16 %v3813_v22, %v3783_v20  ;;  %v1849_v0 = vpack.c.b16 %v1847_v44, %v1846_v4 }
 0x11f   : > { %v1771_v11 = vpop.f32.mrf.mxu0 }
 0x120   : > { %v1432_v57 = vpop.f32.mrf.mxu1  ;;  %v1865_v22 = vrot.slane %v1849_v0, 1 }
 0x121   : > { %v1719_v10 = vpop.f32.mrf.mxu3  ;;  %v1433_v3 = vadd.f32 %v1432_v57, %v3799_v45  ;;  %v1521_v45 = vpack.c.b16 %v3781_v19, %v3759_v17 }
 0x122   : > { %2103 = vmatmul.bf16.gmra.mxu2 %v3771_v29  ;;  %v1720_v52 = vadd.f32 %v1719_v10, %v1479_v1  ;;  %2201 = vmatmul.bf16.gmra.mxu0 %v1518_v33 }
 0x123   : > { %1819 = vmatmul.bf16.gmra.mxu1 %v1515_v9 }
 0x124   : > { %v3886_v36 = vadd.f32 %v1768_v12, %v1720_v52  ;;  %v1858_v52 = vshrl.u32 %v1849_v0, 16 }
 0x125   : > { %v1481_v56 = vpop.f32.mrf.mxu2 }
 0x126   : > { %v1482_v26 = vadd.f32 %v1481_v56, %v1433_v3  ;;  %2152 = vmatmul.bf16.gmra.mxu3 %v3765_v28 }
 0x127   : > { %v1773_v50 = vpop.f32.mrf.mxu0 }
 0x128   : > { %v1434_v18 = vpop.f32.mrf.mxu1 }
 0x129   : > { %v1722_v13 = vpop.f32.mrf.mxu3  ;;  %v1435_v32 = vadd.f32 %v1434_v18, %v3817_v62 }
 0x12a   : > { %v1723_v7 = vadd.f32 %v1722_v13, %v1482_v26 }
 0x12c   : > { %v3890_v34 = vadd.f32 %v1771_v11, %v1723_v7 }
 0x12d   : > { %v1483_v35 = vpop.f32.mrf.mxu2 }
 0x12e   : > { %v1484_v29 = vadd.f32 %v1483_v35, %v1435_v32  ;;  %v1922_v32 = vpack.c.b16 %v1846_v4, %v3513_v48 }
 0x12f   : > { %v1776_v24 = vpop.f32.mrf.mxu0 }
 0x130   : > { %v1437_v6 = vpop.f32.mrf.mxu1 }
 0x131   : > { %v1724_v15 = vpop.f32.mrf.mxu3  ;;  %v1438_v28 = vadd.f32 %v1437_v6, %v3835_v41 }
 0x132   : > { %2108 = vmatmul.bf16.gmra.mxu2 %v3803_v25  ;;  %v1725_v51 = vadd.f32 %v1724_v15, %v1484_v29  ;;  %2206 = vmatmul.bf16.gmra.mxu0 %v1521_v45 }
 0x133   : > { %1824 = vmatmul.bf16.gmra.mxu1 %v1518_v33 }
 0x134   : > { %v3896_v62 = vadd.f32 %v1773_v50, %v1725_v51 }
 0x135   : > { %v1486_v60 = vpop.f32.mrf.mxu2 }
 0x136   : > { %v1487_v31 = vadd.f32 %v1486_v60, %v1438_v28  ;;  %2157 = vmatmul.bf16.gmra.mxu3 %v3797_v16 }
 0x137   : > { %v1778_v63 = vpop.f32.mrf.mxu0 }
 0x138   : > { %v1439_v17 = vpop.f32.mrf.mxu1 }
 0x139   : > { %v1727_v19 = vpop.f32.mrf.mxu3  ;;  %v1440_v25 = vadd.f32 %v1439_v17, %v3841_v38  ;;  %v1860_v38 = vshll.u32 %v1849_v0, 16 }
 0x13a   : > { %v1728_v12 = vadd.f32 %v1727_v19, %v1487_v31 }
 0x13b   : > { %v1862_v20 = vrot.slane %v1860_v38, 1 }
 0x13c   : > { %v3900_v49 = vadd.f32 %v1776_v24, %v1728_v12 }
 0x13d   : > { %v1488_v47 = vpop.f32.mrf.mxu2  ;;  %v1863_v18 = vor.u32 %v1862_v20, %v1858_v52 }
 0x13e   : > { %v1489_v41 = vadd.f32 %v1488_v47, %v1440_v25 }
 0x13f   : > { %v1781_v55 = vpop.f32.mrf.mxu0  ;;  %v1868_v29 = vunpack.c.l.b16 %v1863_v18 }
 0x140   : > { %v1442_v16 = vpop.f32.mrf.mxu1 }
 0x141   : > { %v1729_v1 = vpop.f32.mrf.mxu3  ;;  %v1443_v11 = vadd.f32 %v1442_v16, %v3806_v37  ;;  %v1869_v37 = vunpack.c.l.b16 %v1865_v22 }
 0x142   : > { %2113 = vmatmul.bf16.gmra.mxu2 %v3832_v2  ;;  %v1730_v33 = vadd.f32 %v1729_v1, %v1489_v41  ;;  %2211 = vmatmul.bf16.gmra.mxu0 %v1524_v5 }
 0x143   : > { %1829 = vmatmul.bf16.gmra.mxu1 %v1521_v45 }
 0x144   : > { %v3906_v10 = vadd.f32 %v1778_v63, %v1730_v33 }
 0x145   : > { %v1491_v9 = vpop.f32.mrf.mxu2 }
 0x146   : > { %v1492_v57 = vadd.f32 %v1491_v9, %v1443_v11  ;;  %2162 = vmatmul.bf16.gmra.mxu3 %v3824_v58  ;;  %v1924_v58 = vpack.c.b16 %v1869_v37, %v3815_v21 }
 0x147   : > { %v1783_v3 = vpop.f32.mrf.mxu0 }
 0x148   : > { %v1444_v56 = vpop.f32.mrf.mxu1 }
 0x149   : > { %v1732_v26 = vpop.f32.mrf.mxu3  ;;  %v1445_v50 = vadd.f32 %v1444_v56, %v3826_v54  ;;  %v1923_v54 = vpack.c.b16 %v1868_v29, %v1111_v14 }
 0x14a   : > { %v1733_v2 = vadd.f32 %v1732_v26, %v1492_v57 }
 0x14c   : > { %v3911_v35 = vadd.f32 %v1781_v55, %v1733_v2 }
 0x14d   : > { %v1493_v13 = vpop.f32.mrf.mxu2 }
 0x14e   : > { %v1494_v7 = vadd.f32 %v1493_v13, %v1445_v50 }
 0x14f   : > { %v1786_v45 = vpop.f32.mrf.mxu0 }
 0x150   : > { %v1447_v24 = vpop.f32.mrf.mxu1 }
 0x151   : > { %v1734_v6 = vpop.f32.mrf.mxu3  ;;  %v1448_v51 = vadd.f32 %v1447_v24, %v3839_v8 }
 0x152   : > { %2118 = vmatmul.bf16.gmra.mxu2 %v1922_v32  ;;  %v1735_v15 = vadd.f32 %v1734_v6, %v1494_v7  ;;  %2216 = vmatmul.bf16.gmra.mxu0 %v1924_v58 }
 0x153   : > { %1834 = vmatmul.bf16.gmra.mxu1 %v1524_v5 }
 0x154   : > { %v3917_v48 = vadd.f32 %v1783_v3, %v1735_v15 }
 0x155   : > { %v1496_v28 = vpop.f32.mrf.mxu2 }
 0x156   : > { %v1497_v60 = vadd.f32 %v1496_v28, %v1448_v51  ;;  %2167 = vmatmul.bf16.gmra.mxu3 %v1923_v54 }
 0x157   : > { %v1788_v31 = vpop.f32.mrf.mxu0 }
 0x158   : > { %v1449_v63 = vpop.f32.mrf.mxu1 }
 0x159   : > { %v1737_v21 = vpop.f32.mrf.mxu3  ;;  %v1450_v23 = vadd.f32 %v1449_v63, %v3845_v42 }
 0x15a   : > { %v1738_v61 = vadd.f32 %v1737_v21, %v1497_v60 }
 0x15c   : > { %v3920_v12 = vadd.f32 %v1786_v45, %v1738_v61 }
 0x15d   : > { %v1498_v17 = vpop.f32.mrf.mxu2 }
 0x15e   : > { %v1499_v19 = vadd.f32 %v1498_v17, %v1450_v23 }
 0x15f   : > { %v2182_v8 = vpop.f32.mrf.mxu0 }
 0x160   : > { %v1800_v46 = vpop.f32.mrf.mxu1 }
 0x161   : > { %v1739_v14 = vpop.f32.mrf.mxu3  ;;  %v1801_v11 = vadd.f32 %v1800_v46, %v3849_v39 }
 0x162   : > { %v1740_v25 = vadd.f32 %v1739_v14, %v1499_v19 }
 0x164   : > { %v3922_v44 = vadd.f32 %v1788_v31, %v1740_v25 }
 0x165   : > { %v2084_v4 = vpop.f32.mrf.mxu2 }
 0x167   : > { %v2184_v47 = vpop.f32.mrf.mxu0 }
 0x168   : > { %v1802_v41 = vpop.f32.mrf.mxu1 }
 0x169   : > { %v2133_v5 = vpop.f32.mrf.mxu3  ;;  %v1803_v52 = vadd.f32 %v1802_v41, %v3855_v27 }
 0x16a   : > { %v2134_v55 = vadd.f32 %v2133_v5, %v2084_v4 }
 0x16c   : > { %v2183_v1 = vadd.f32 %v2182_v8, %v2134_v55 }
 0x16d   : > { %v2086_v0 = vpop.f32.mrf.mxu2 }
 0x16e   : > { %v2222_v57 = vadd.f32 %v2183_v1, %v1801_v11 }
 0x16f   : > { %v2187_v16 = vpop.f32.mrf.mxu0 }
 0x170   : > { %v1805_v42 = vpop.f32.mrf.mxu1  ;;  %v2274_v56 = vmul.f32 %v2222_v57, %v2222_v57 }
 0x171   : > { %v2135_v33 = vpop.f32.mrf.mxu3  ;;  %v1806_v7 = vadd.f32 %v1805_v42, %v3858_v30 }
 0x172   : > { %v2136_v38 = vadd.f32 %v2135_v33, %v2086_v0 }
 0x174   : > { %v2185_v20 = vadd.f32 %v2184_v47, %v2136_v38 }
 0x175   : > { %v2089_v9 = vpop.f32.mrf.mxu2 }
 0x176   : > { %v2223_v22 = vadd.f32 %v2185_v20, %v1803_v52 }
 0x177   : > { %v2189_v3 = vpop.f32.mrf.mxu0 }
 0x178   : > { %v2948_v26 = vpack.c.bf16 %v2223_v22, %v2222_v57  ;;  %v2270_v2 = vadd.f32 %v2223_v22, %v2222_v57  ;;  %v2275_v50 = vmul.f32 %v2223_v22, %v2223_v22  ;;  %v1807_v39 = vpop.f32.mrf.mxu1 }
 0x179   : > { %v2138_v18 = vpop.f32.mrf.mxu3  ;;  %v1808_v60 = vadd.f32 %v1807_v39, %v3864_v40 }
 0x17a   : > { %2949 = vst [vmem:[%s3931_s16] sm:$0xff] %v2948_v26   ;;  %v2278_v37 = vadd.f32 %v2275_v50, %v2274_v56  ;;  %v2139_v13 = vadd.f32 %v2138_v18, %v2089_v9 }
 0x17c   : > { %v2188_v32 = vadd.f32 %v2187_v16, %v2139_v13 }
 0x17d   : > { %v2091_v27 = vpop.f32.mrf.mxu2 }
 0x17e   : > { %v2224_v29 = vadd.f32 %v2188_v32, %v1806_v7 }
 0x17f   : > { %v2192_v58 = vpop.f32.mrf.mxu0 }
 0x180   : > { %v2271_v45 = vadd.f32 %v2270_v2, %v2224_v29  ;;  %v2276_v24 = vmul.f32 %v2224_v29, %v2224_v29  ;;  %v1810_v6 = vpop.f32.mrf.mxu1 }
 0x181   : > { %v2140_v15 = vpop.f32.mrf.mxu3  ;;  %v1811_v5 = vadd.f32 %v1810_v6, %v3869_v53 }
 0x182   : > { %v2279_v51 = vadd.f32 %v2278_v37, %v2276_v24  ;;  %v2141_v54 = vadd.f32 %v2140_v15, %v2091_v27 }
 0x184   : > { %v2190_v31 = vadd.f32 %v2189_v3, %v2141_v54 }
 0x185   : > { %v2094_v28 = vpop.f32.mrf.mxu2 }
 0x186   : > { %v2225_v63 = vadd.f32 %v2190_v31, %v1808_v60 }
 0x187   : > { %v2194_v21 = vpop.f32.mrf.mxu0 }
 0x188   : > { %v2953_v61 = vpack.c.bf16 %v2225_v63, %v2224_v29  ;;  %v2272_v23 = vadd.f32 %v2271_v45, %v2225_v63  ;;  %v2277_v17 = vmul.f32 %v2225_v63, %v2225_v63  ;;  %v1812_v30 = vpop.f32.mrf.mxu1 }
 0x189   : > { %v2143_v19 = vpop.f32.mrf.mxu3  ;;  %v1813_v16 = vadd.f32 %v1812_v30, %v3875_v43 }
 0x18a   : > { %2992 = vst [vmem:[%s3931_s16 + $0x8] sm:$0xff] %v2953_v61   ;;  %v2280_v8 = vadd.f32 %v2279_v51, %v2277_v17  ;;  %v2144_v14 = vadd.f32 %v2143_v19, %v2094_v28 }
 0x18c   : > { %v2193_v4 = vadd.f32 %v2192_v58, %v2144_v14 }
 0x18d   : > { %v2096_v46 = vpop.f32.mrf.mxu2 }
 0x18e   : > { %v2226_v55 = vadd.f32 %v2193_v4, %v1811_v5 }
 0x18f   : > { %v2197_v25 = vpop.f32.mrf.mxu0 }
 0x190   : > { %v1815_v47 = vpop.f32.mrf.mxu1  ;;  %v2286_v11 = vmul.f32 %v2226_v55, %v2226_v55 }
 0x191   : > { %v2145_v41 = vpop.f32.mrf.mxu3  ;;  %v1816_v53 = vadd.f32 %v1815_v47, %v3879_v59 }
 0x192   : > { %v2146_v40 = vadd.f32 %v2145_v41, %v2096_v46 }
 0x194   : > { %v2195_v1 = vadd.f32 %v2194_v21, %v2146_v40 }
 0x195   : > { %v2099_v0 = vpop.f32.mrf.mxu2 }
 0x196   : > { %v2227_v42 = vadd.f32 %v2195_v1, %v1813_v16 }
 0x197   : > { %v2199_v33 = vpop.f32.mrf.mxu0 }
 0x198   : > { %v2958_v38 = vpack.c.bf16 %v2227_v42, %v2226_v55  ;;  %v2282_v9 = vadd.f32 %v2227_v42, %v2226_v55  ;;  %v2287_v57 = vmul.f32 %v2227_v42, %v2227_v42  ;;  %v1817_v52 = vpop.f32.mrf.mxu1 }
 0x199   : > { %v2148_v20 = vpop.f32.mrf.mxu3  ;;  %v1818_v32 = vadd.f32 %v1817_v52, %v3886_v36 }
 0x19a   : > { %2993 = vst [vmem:[%s3931_s16 + $0x10] sm:$0xff] %v2958_v38   ;;  %v2290_v22 = vadd.f32 %v2287_v57, %v2286_v11  ;;  %v2149_v3 = vadd.f32 %v2148_v20, %v2099_v0 }
 0x19c   : > { %v2198_v26 = vadd.f32 %v2197_v25, %v2149_v3 }
 0x19d   : > { %v2101_v56 = vpop.f32.mrf.mxu2 }
 0x19e   : > { %v2228_v2 = vadd.f32 %v2198_v26, %v1816_v53 }
 0x19f   : > { %v2202_v50 = vpop.f32.mrf.mxu0 }
 0x1a0   : > { %v2283_v39 = vadd.f32 %v2282_v9, %v2228_v2  ;;  %v2288_v43 = vmul.f32 %v2228_v2, %v2228_v2  ;;  %v1820_v18 = vpop.f32.mrf.mxu1 }
 0x1a1   : > { %v2150_v37 = vpop.f32.mrf.mxu3  ;;  %v1821_v36 = vadd.f32 %v1820_v18, %v3890_v34 }
 0x1a2   : > { %v2291_v13 = vadd.f32 %v2290_v22, %v2288_v43  ;;  %v2151_v27 = vadd.f32 %v2150_v37, %v2101_v56 }
 0x1a4   : > { %v2200_v29 = vadd.f32 %v2199_v33, %v2151_v27 }
 0x1a5   : > { %v2104_v7 = vpop.f32.mrf.mxu2 }
 0x1a6   : > { %v2229_v58 = vadd.f32 %v2200_v29, %v1818_v32 }
 0x1a7   : > { %v2204_v45 = vpop.f32.mrf.mxu0 }
 0x1a8   : > { %v2963_v24 = vpack.c.bf16 %v2229_v58, %v2228_v2  ;;  %v2284_v6 = vadd.f32 %v2283_v39, %v2229_v58  ;;  %v2289_v15 = vmul.f32 %v2229_v58, %v2229_v58  ;;  %v1822_v59 = vpop.f32.mrf.mxu1 }
 0x1a9   : > { %v2153_v51 = vpop.f32.mrf.mxu3  ;;  %v1823_v25 = vadd.f32 %v1822_v59, %v3896_v62 }
 0x1aa   : > { %2994 = vst [vmem:[%s3931_s16 + $0x18] sm:$0xff] %v2963_v24   ;;  %v2285_v54 = vadd.f32 %v2284_v6, %v2272_v23  ;;  %v2292_v28 = vadd.f32 %v2291_v13, %v2289_v15  ;;  %v2154_v63 = vadd.f32 %v2153_v51, %v2104_v7 }
 0x1ac   : > { %v2293_v31 = vadd.f32 %v2292_v28, %v2280_v8  ;;  %v2203_v21 = vadd.f32 %v2202_v50, %v2154_v63 }
 0x1ad   : > { %v2106_v60 = vpop.f32.mrf.mxu2 }
 0x1ae   : > { %v2230_v14 = vadd.f32 %v2203_v21, %v1821_v36 }
 0x1af   : > { %v2207_v30 = vpop.f32.mrf.mxu0 }
 0x1b0   : > { %v1825_v61 = vpop.f32.mrf.mxu1  ;;  %v2298_v41 = vmul.f32 %v2230_v14, %v2230_v14 }
 0x1b1   : > { %v2155_v17 = vpop.f32.mrf.mxu3  ;;  %v1826_v34 = vadd.f32 %v1825_v61, %v3900_v49 }
 0x1b2   : > { %v2156_v19 = vadd.f32 %v2155_v17, %v2106_v60 }
 0x1b4   : > { %v2205_v4 = vadd.f32 %v2204_v45, %v2156_v19 }
 0x1b5   : > { %v2109_v46 = vpop.f32.mrf.mxu2 }
 0x1b6   : > { %v2231_v47 = vadd.f32 %v2205_v4, %v1823_v25 }
 0x1b7   : > { %v2209_v1 = vpop.f32.mrf.mxu0 }
 0x1b8   : > { %v2968_v23 = vpack.c.bf16 %v2231_v47, %v2230_v14  ;;  %v2294_v5 = vadd.f32 %v2231_v47, %v2230_v14  ;;  %v2299_v40 = vmul.f32 %v2231_v47, %v2231_v47  ;;  %v1827_v0 = vpop.f32.mrf.mxu1 }
 0x1b9   : > { %v2158_v8 = vpop.f32.mrf.mxu3  ;;  %v1828_v3 = vadd.f32 %v1827_v0, %v3906_v10 }
 0x1ba   : > { %2995 = vst [vmem:[%s3931_s16 + $0x20] sm:$0xff] %v2968_v23   ;;  %v2302_v55 = vadd.f32 %v2299_v40, %v2298_v41  ;;  %v2159_v16 = vadd.f32 %v2158_v8, %v2109_v46 }
 0x1bc   : > { %v2208_v33 = vadd.f32 %v2207_v30, %v2159_v16 }
 0x1bd   : > { %v2111_v42 = vpop.f32.mrf.mxu2 }
 0x1be   : > { %v2232_v11 = vadd.f32 %v2208_v33, %v1826_v34 }
 0x1bf   : > { %v2212_v53 = vpop.f32.mrf.mxu0 }
 0x1c0   : > { %v2295_v38 = vadd.f32 %v2294_v5, %v2232_v11  ;;  %v2300_v62 = vmul.f32 %v2232_v11, %v2232_v11  ;;  %v1830_v20 = vpop.f32.mrf.mxu1 }
 0x1c1   : > { %v2160_v9 = vpop.f32.mrf.mxu3  ;;  %v1831_v10 = vadd.f32 %v1830_v20, %v3911_v35 }
 0x1c2   : > { %v2303_v57 = vadd.f32 %v2302_v55, %v2300_v62  ;;  %v2161_v52 = vadd.f32 %v2160_v9, %v2111_v42 }
 0x1c4   : > { %v2210_v56 = vadd.f32 %v2209_v1, %v2161_v52 }
 0x1c5   : > { %v2114_v22 = vpop.f32.mrf.mxu2 }
 0x1c6   : > { %v2233_v26 = vadd.f32 %v2210_v56, %v1828_v3 }
 0x1c7   : > { %v2214_v32 = vpop.f32.mrf.mxu0 }
 0x1c8   : > { %v2973_v2 = vpack.c.bf16 %v2233_v26, %v2232_v11  ;;  %v2296_v50 = vadd.f32 %v2295_v38, %v2233_v26  ;;  %v2301_v39 = vmul.f32 %v2233_v26, %v2233_v26  ;;  %v1832_v7 = vpop.f32.mrf.mxu1 }
 0x1c9   : > { %v2163_v43 = vpop.f32.mrf.mxu3  ;;  %v1833_v6 = vadd.f32 %v1832_v7, %v3917_v48 }
 0x1ca   : > { %2996 = vst [vmem:[%s3931_s16 + $0x28] sm:$0xff] %v2973_v2   ;;  %v2297_v49 = vadd.f32 %v2296_v50, %v2285_v54  ;;  %v2304_v18 = vadd.f32 %v2303_v57, %v2301_v39  ;;  %v2164_v27 = vadd.f32 %v2163_v43, %v2114_v22 }
 0x1cc   : > { %v2305_v13 = vadd.f32 %v2304_v18, %v2293_v31  ;;  %v2213_v29 = vadd.f32 %v2212_v53, %v2164_v27 }
 0x1cd   : > { %v2116_v37 = vpop.f32.mrf.mxu2 }
 0x1ce   : > { %v2234_v24 = vadd.f32 %v2213_v29, %v1831_v10 }
 0x1cf   : > { %v2217_v21 = vpop.f32.mrf.mxu0 }
 0x1d0   : > { %v1835_v54 = vpop.f32.mrf.mxu1  ;;  %v2310_v28 = vmul.f32 %v2234_v24, %v2234_v24 }
 0x1d1   : > { %v2165_v58 = vpop.f32.mrf.mxu3  ;;  %v1836_v35 = vadd.f32 %v1835_v54, %v3920_v12 }
 0x1d2   : > { %v2166_v45 = vadd.f32 %v2165_v58, %v2116_v37 }
 0x1d4   : > { %v2215_v15 = vadd.f32 %v2214_v32, %v2166_v45 }
 0x1d5   : > { %v2119_v59 = vpop.f32.mrf.mxu2 }
 0x1d6   : > { %v2235_v51 = vadd.f32 %v2215_v15, %v1833_v6 }
 0x1d7   : > { %v2219_v23 = vpop.f32.mrf.mxu0 }
 0x1d8   : > { %v2978_v60 = vpack.c.bf16 %v2235_v51, %v2234_v24  ;;  %v2306_v31 = vadd.f32 %v2235_v51, %v2234_v24  ;;  %v2311_v63 = vmul.f32 %v2235_v51, %v2235_v51  ;;  %v1837_v25 = vpop.f32.mrf.mxu1 }
 0x1d9   : > { %v2168_v61 = vpop.f32.mrf.mxu3  ;;  %v1838_v5 = vadd.f32 %v1837_v25, %v3922_v44 }
 0x1da   : > { %2997 = vst [vmem:[%s3931_s16 + $0x30] sm:$0xff] %v2978_v60   ;;  %v2314_v17 = vadd.f32 %v2311_v63, %v2310_v28  ;;  %v2169_v30 = vadd.f32 %v2168_v61, %v2119_v59 }
 0x1dc   : > { %v2218_v36 = vadd.f32 %v2217_v21, %v2169_v30 }
 0x1dd   : > { %v2121_v48 = vpop.f32.mrf.mxu2 }
 0x1de   : > { %v2236_v19 = vadd.f32 %v2218_v36, %v1836_v35 }
 0x1e0   : > { %v2307_v46 = vadd.f32 %v2306_v31, %v2236_v19  ;;  %v2312_v14 = vmul.f32 %v2236_v19, %v2236_v19 }
 0x1e1   : > { %v2170_v4 = vpop.f32.mrf.mxu3 }
 0x1e2   : > { %v2315_v47 = vadd.f32 %v2314_v17, %v2312_v14  ;;  %v2171_v41 = vadd.f32 %v2170_v4, %v2121_v48 }
 0x1e4   : > { %v2220_v40 = vadd.f32 %v2219_v23, %v2171_v41 }
 0x1e6   : > { %v2237_v8 = vadd.f32 %v2220_v40, %v1838_v5 }
 0x1e8   : > { %v2983_v0 = vpack.c.bf16 %v2237_v8, %v2236_v19  ;;  %v2308_v12 = vadd.f32 %v2307_v46, %v2237_v8  ;;  %v2313_v55 = vmul.f32 %v2237_v8, %v2237_v8 }
 0x1ea   : > { %2998 = vst [vmem:[%s3931_s16 + $0x38] sm:$0xff] %v2983_v0   ;;  %v2309_v16 = vadd.f32 %v2308_v12, %v2297_v49  ;;  %v2316_v1 = vadd.f32 %v2315_v47, %v2313_v55 }
 0x1ec   : > { %v2317_v42 = vadd.f32 %v2316_v1, %v2305_v13  ;;  %2318 = vst [vmem:[%s276_s18] sm:$0xff] %v2309_v16 }
 0x1ee   : > { %2319 = vst [vmem:[%s280_s20] sm:$0xff] %v2317_v42 }
 0x1ef PF: > { %s17_s21 = sadd.s32 1, %s3040_s21  }
 0x1f0   : > { %p14_p5 = scmp.ge.s32.totalorder %s17_s21, 6  }
 0x1f2   :  { %16 = sbr.rel (!%p14_p5) target bundleno = 1 (0x1), region = 94 }

</bundles_post_ra>
